<compile_context>
chip_gen: v6e
topology: v6e:2x2x1
jax: 0.10.0
libtpu: 0.0.40
codegen_flags: <defaults>
</compile_context>

<pallas_src>
import functools
import numpy as np
import jax
import jax.numpy as jnp
from jax.experimental import pallas as pl
from jax.experimental.pallas import tpu as pltpu


_VMEM_LIMIT = 48 * 1024 * 1024  # < 64 MiB physical on v7x, < 128 MiB on v5e/v6e


def _cparams(n_grid_axes):
    if n_grid_axes == 0:
        return pltpu.CompilerParams(vmem_limit_bytes=_VMEM_LIMIT)
    return pltpu.CompilerParams(
        dimension_semantics=("parallel",) * n_grid_axes,
        vmem_limit_bytes=_VMEM_LIMIT)


def _pick_row_block(rows):
    for cand in (2048, 1024, 512, 256, 128, 64, 32, 16, 8):
        if rows % cand == 0:
            return cand
    return rows


def _pick_group_block(g):
    for cand in (128, 64, 32, 16, 8, 4, 2, 1):
        if g % cand == 0:
            return cand
    return g


# ----------------------------------------------------------------------------
# In-kernel math helpers
# ----------------------------------------------------------------------------

def _ln(x, g, b, eps=1e-5):
    """PyTorch-style LayerNorm over the last dim (biased variance), f32."""
    mu = jnp.mean(x, axis=-1, keepdims=True)
    var = jnp.mean(jnp.square(x - mu), axis=-1, keepdims=True)
    return (x - mu) * jax.lax.rsqrt(var + eps) * g + b


_SQRT1_2 = 0.7071067811865476


def _erf_approx(x):
    # Abramowitz & Stegun 7.1.26 (|err| < 1.5e-7): exact-GELU quality using only
    # exp/mul/add so it lowers cleanly in Mosaic (no erf primitive needed).
    a1, a2, a3, a4, a5 = 0.254829592, -0.284496736, 1.421413741, -1.453152027, 1.061405429
    pc = 0.3275911
    sgn = jnp.where(x < 0.0, -1.0, 1.0)
    ax = jnp.abs(x)
    t = 1.0 / (1.0 + pc * ax)
    poly = ((((a5 * t + a4) * t + a3) * t + a2) * t + a1) * t
    return sgn * (1.0 - poly * jnp.exp(-ax * ax))


def _gelu_exact(x):
    return 0.5 * x * (1.0 + _erf_approx(x * _SQRT1_2))


# ----------------------------------------------------------------------------
# Pallas kernels
# ----------------------------------------------------------------------------

def _linear_kernel(x_ref, w_ref, b_ref, o_ref):
    y = jnp.dot(x_ref[...].astype(jnp.bfloat16), w_ref[...],
                preferred_element_type=jnp.float32) + b_ref[...]
    o_ref[...] = y.astype(o_ref.dtype)


def linear(x2d, w, b=None, out_dtype=jnp.float32):
    """y = x2d @ w + b.  bf16 MXU operands, f32 accumulation."""
    R, K = x2d.shape
    N = w.shape[1]
    if b is None:
        b = jnp.zeros((N,), jnp.float32)
    br = _pick_row_block(R)
    return pl.pallas_call(
        _linear_kernel,
        out_shape=jax.ShapeDtypeStruct((R, N), out_dtype),
        grid=(R // br,),
        in_specs=[pl.BlockSpec((br, K), lambda i: (i, 0)),
                  pl.BlockSpec((K, N), lambda i: (0, 0)),
                  pl.BlockSpec((1, N), lambda i: (0, 0))],
        out_specs=pl.BlockSpec((br, N), lambda i: (i, 0)),
        compiler_params=_cparams(1),
    )(x2d.astype(jnp.float32), w.astype(jnp.bfloat16),
      b.reshape(1, N).astype(jnp.float32))


def _ln_linear_kernel(x_ref, g_ref, b_ref, w_ref, wb_ref, o_ref):
    h = _ln(x_ref[...], g_ref[...], b_ref[...])
    y = jnp.dot(h.astype(jnp.bfloat16), w_ref[...],
                preferred_element_type=jnp.float32) + wb_ref[...]
    o_ref[...] = y.astype(o_ref.dtype)


def ln_linear(x2d, gamma, beta, w, wb=None, out_dtype=jnp.float32):
    """Fused LayerNorm(last dim) -> Linear.  x2d: (R, C) -> (R, N)."""
    R, C = x2d.shape
    N = w.shape[1]
    if wb is None:
        wb = jnp.zeros((N,), jnp.float32)
    br = _pick_row_block(R)
    return pl.pallas_call(
        _ln_linear_kernel,
        out_shape=jax.ShapeDtypeStruct((R, N), out_dtype),
        grid=(R // br,),
        in_specs=[pl.BlockSpec((br, C), lambda i: (i, 0)),
                  pl.BlockSpec((1, C), lambda i: (0, 0)),
                  pl.BlockSpec((1, C), lambda i: (0, 0)),
                  pl.BlockSpec((C, N), lambda i: (0, 0)),
                  pl.BlockSpec((1, N), lambda i: (0, 0))],
        out_specs=pl.BlockSpec((br, N), lambda i: (i, 0)),
        compiler_params=_cparams(1),
    )(x2d.astype(jnp.float32),
      gamma.reshape(1, C).astype(jnp.float32),
      beta.reshape(1, C).astype(jnp.float32),
      w.astype(jnp.bfloat16),
      wb.reshape(1, N).astype(jnp.float32))


def _linear_residual_kernel(x_ref, w_ref, b_ref, res_ref, o_ref):
    o_ref[...] = (res_ref[...]
                  + jnp.dot(x_ref[...].astype(jnp.bfloat16), w_ref[...],
                            preferred_element_type=jnp.float32)
                  + b_ref[...])


def linear_residual(x2d, w, b, res2d):
    """Fused (x2d @ w + b) + residual."""
    R, K = x2d.shape
    N = w.shape[1]
    br = _pick_row_block(R)
    return pl.pallas_call(
        _linear_residual_kernel,
        out_shape=jax.ShapeDtypeStruct((R, N), jnp.float32),
        grid=(R // br,),
        in_specs=[pl.BlockSpec((br, K), lambda i: (i, 0)),
                  pl.BlockSpec((K, N), lambda i: (0, 0)),
                  pl.BlockSpec((1, N), lambda i: (0, 0)),
                  pl.BlockSpec((br, N), lambda i: (i, 0))],
        out_specs=pl.BlockSpec((br, N), lambda i: (i, 0)),
        compiler_params=_cparams(1),
    )(x2d.astype(jnp.float32), w.astype(jnp.bfloat16),
      b.reshape(1, N).astype(jnp.float32), res2d.astype(jnp.float32))


def _ln_mlp_residual_kernel(x_ref, g_ref, b_ref, w1_ref, b1_ref, w2_ref, b2_ref, o_ref):
    x = x_ref[...]
    h = _ln(x, g_ref[...], b_ref[...])
    h1 = jnp.dot(h.astype(jnp.bfloat16), w1_ref[...],
                 preferred_element_type=jnp.float32) + b1_ref[...]
    h1 = _gelu_exact(h1)                              # exact GELU, in-kernel
    h2 = jnp.dot(h1.astype(jnp.bfloat16), w2_ref[...],
                 preferred_element_type=jnp.float32) + b2_ref[...]
    o_ref[...] = x + h2


def ln_mlp_residual(x2d, gamma, beta, w1, b1, w2, b2):
    """Fused LayerNorm -> fc1 -> GELU -> fc2 -> + residual.  (R, C) -> (R, C)."""
    R, C = x2d.shape
    Ch = w1.shape[1]
    br = _pick_row_block(R)
    return pl.pallas_call(
        _ln_mlp_residual_kernel,
        out_shape=jax.ShapeDtypeStruct((R, C), jnp.float32),
        grid=(R // br,),
        in_specs=[pl.BlockSpec((br, C), lambda i: (i, 0)),
                  pl.BlockSpec((1, C), lambda i: (0, 0)),
                  pl.BlockSpec((1, C), lambda i: (0, 0)),
                  pl.BlockSpec((C, Ch), lambda i: (0, 0)),
                  pl.BlockSpec((1, Ch), lambda i: (0, 0)),
                  pl.BlockSpec((Ch, C), lambda i: (0, 0)),
                  pl.BlockSpec((1, C), lambda i: (0, 0))],
        out_specs=pl.BlockSpec((br, C), lambda i: (i, 0)),
        compiler_params=_cparams(1),
    )(x2d.astype(jnp.float32),
      gamma.reshape(1, C).astype(jnp.float32),
      beta.reshape(1, C).astype(jnp.float32),
      w1.astype(jnp.bfloat16), b1.reshape(1, Ch).astype(jnp.float32),
      w2.astype(jnp.bfloat16), b2.reshape(1, C).astype(jnp.float32))


def _attn_kernel(scale, q_ref, k_ref, v_ref, bias_ref, o_ref):
    # Batched over all (window, head) pairs of one batch element.
    q = q_ref[0]                                       # (Gb, N, D) bf16
    k = k_ref[0]
    v = v_ref[0]
    s = jnp.einsum('gqd,gkd->gqk', q, k,
                   preferred_element_type=jnp.float32)  # (Gb, N, N) f32
    s = s * scale + bias_ref[...]                       # rel-pos bias + shift mask
    m = jnp.max(s, axis=-1, keepdims=True)
    p = jnp.exp(s - m)
    denom = jnp.sum(p, axis=-1, keepdims=True)
    p = p * pl.reciprocal(denom, approx=True)           # EUP slot
    o_ref[0] = jnp.einsum('gqk,gkd->gqd', p.astype(v.dtype), v,
                          preferred_element_type=jnp.float32)


def attention_core(q, k, v, bias, scale):
    """q,k,v: (B, G, N, D) bf16, G = nW*num_heads; bias: (G, N, N) f32 (VMEM-resident)."""
    B, G, N, D = q.shape
    gb = _pick_group_block(G)
    kern = functools.partial(_attn_kernel, scale)
    return pl.pallas_call(
        kern,
        out_shape=jax.ShapeDtypeStruct((B, G, N, D), jnp.float32),
        grid=(B, G // gb),
        in_specs=[pl.BlockSpec((1, gb, N, D), lambda b, c: (b, c, 0, 0)),
                  pl.BlockSpec((1, gb, N, D), lambda b, c: (b, c, 0, 0)),
                  pl.BlockSpec((1, gb, N, D), lambda b, c: (b, c, 0, 0)),
                  pl.BlockSpec((gb, N, N), lambda b, c: (c, 0, 0))],
        out_specs=pl.BlockSpec((1, gb, N, D), lambda b, c: (b, c, 0, 0)),
        compiler_params=_cparams(2),
    )(q, k, v, bias)


def _head_kernel(x_ref, g_ref, b_ref, wc_ref, bc_ref, wr_ref, br_ref, mlc_ref, reg_ref):
    x = x_ref[...]                                     # (B, L, C)
    h = _ln(x, g_ref[...], b_ref[...])                 # final LayerNorm
    pooled = jnp.mean(h, axis=1).astype(jnp.bfloat16)  # AdaptiveAvgPool1d(1)
    mlc_ref[...] = jnp.dot(pooled, wc_ref[...],
                           preferred_element_type=jnp.float32) + bc_ref[...]
    reg_ref[...] = jnp.dot(pooled, wr_ref[...],
                           preferred_element_type=jnp.float32) + br_ref[...]


def final_head(x_blc, gamma, beta, wc, bc, wr, br):
    """Fused final LayerNorm + global average pool + classifier & regressor heads."""
    B, L, C = x_blc.shape
    NC = wc.shape[1]
    return pl.pallas_call(
        _head_kernel,
        out_shape=(jax.ShapeDtypeStruct((B, NC), jnp.float32),
                   jax.ShapeDtypeStruct((B, NC), jnp.float32)),
        compiler_params=_cparams(0),
    )(x_blc.astype(jnp.float32),
      gamma.reshape(1, 1, C).astype(jnp.float32),
      beta.reshape(1, 1, C).astype(jnp.float32),
      wc.astype(jnp.bfloat16), bc.reshape(1, NC).astype(jnp.float32),
      wr.astype(jnp.bfloat16), br.reshape(1, NC).astype(jnp.float32))


# ----------------------------------------------------------------------------
# Host-side static helpers (exact ports of the PyTorch glue)
# ----------------------------------------------------------------------------

def compute_mask_np(L, window_size, shift_size):
    Lp = int(np.ceil(L / window_size)) * window_size
    img_mask = np.zeros((1, Lp, 1), np.float32)
    pad_size = int(Lp - L)
    if pad_size == 0 or pad_size + shift_size == window_size:
        segs = (slice(-window_size), slice(-window_size, -shift_size),
                slice(-shift_size, None))
    elif pad_size + shift_size > window_size:
        seg1 = int(window_size * 2 - L + shift_size)
        segs = (slice(-seg1), slice(-seg1, -window_size),
                slice(-window_size, -shift_size), slice(-shift_size, None))
    elif pad_size + shift_size < window_size:
        seg1 = int(window_size * 2 - L + shift_size)
        segs = (slice(-window_size), slice(-window_size, -seg1),
                slice(-seg1, -shift_size), slice(-shift_size, None))
    cnt = 0
    for d in segs:
        img_mask[:, d, :] = cnt
        cnt += 1
    mask_windows = img_mask.reshape(1, Lp // window_size, window_size, 1)
    mask_windows = mask_windows.reshape(-1, window_size)          # (nW, ws)
    attn_mask = mask_windows[:, None, :] - mask_windows[:, :, None]
    attn_mask = np.where(attn_mask != 0, -100.0, 0.0).astype(np.float32)
    return attn_mask                                               # (nW, ws, ws)


# ----------------------------------------------------------------------------
# Model glue (JAX): Swin blocks / layers built on the Pallas kernels
# ----------------------------------------------------------------------------

def build_attn_bias(rel_table, rel_index, mask, num_heads, nW, ws):
    """(nW*num_heads, ws, ws) combined relative-position-bias + shift-mask table."""
    rel_bias = rel_table[rel_index.reshape(-1)]                    # (ws*ws, nh)
    rel_bias = rel_bias.reshape(ws, ws, num_heads).transpose(2, 0, 1)  # (nh, ws, ws)
    if mask is not None:
        bias = rel_bias[None, :, :, :] + mask[:, None, :, :]        # (nW, nh, ws, ws)
    else:
        bias = jnp.broadcast_to(rel_bias[None], (nW, num_heads, ws, ws))
    return bias.reshape(nW * num_heads, ws, ws).astype(jnp.float32)


def window_attention(qkv, bias, num_heads, scale, B, nW, ws, C):
    """qkv: (B, Lp, 3C) bf16 (already padded/rolled); returns (B, Lp, C) f32."""
    hd = C // num_heads
    # (B, nW, ws, 3, nh, hd) -> (3, B, nW, nh, ws, hd); small bf16 XLA transpose.
    # TODO(synk): an in-kernel 3C lane-slice layout would remove this transpose,
    #             but the in-kernel head relayout is brittle in Mosaic; kept in XLA.
    qkv = qkv.reshape(B, nW, ws, 3, num_heads, hd)
    qkv = jnp.transpose(qkv, (3, 0, 1, 4, 2, 5))
    G = nW * num_heads
    q = qkv[0].reshape(B, G, ws, hd)
    k = qkv[1].reshape(B, G, ws, hd)
    v = qkv[2].reshape(B, G, ws, hd)
    out = attention_core(q, k, v, bias, scale)                      # (B, G, ws, hd)
    out = out.reshape(B, nW, num_heads, ws, hd)
    out = jnp.transpose(out, (0, 1, 3, 2, 4)).reshape(B, nW * ws, C)
    return out


def swin_block(x, p, window_size, shift_size, attn_mask, num_heads):
    B, L, C = x.shape
    scale = float(C // num_heads) ** (-0.5)
    shortcut = x

    # --- fused LayerNorm1 + QKV projection (lane-dense 3C output, bf16) ---
    qkv = ln_linear(x.reshape(B * L, C), p['norm1_g'], p['norm1_b'],
                    p['qkv_w'], p['qkv_b'], out_dtype=jnp.bfloat16)
    qkv = qkv.reshape(B, L, 3 * C)

    pad_r = (window_size - L % window_size) % window_size
    Lp = L + pad_r
    if pad_r:
        # PyTorch pads (with zeros) AFTER norm1 and BEFORE qkv, so padded tokens
        # carry exactly qkv_b through the projection.
        pad_rows = jnp.broadcast_to(p['qkv_b'].astype(jnp.bfloat16)[None, None, :],
                                    (B, pad_r, 3 * C))
        qkv = jnp.concatenate([qkv, pad_rows], axis=1)
    if shift_size > 0:
        qkv = jnp.roll(qkv, -shift_size, axis=1)
        mask = attn_mask
    else:
        mask = None

    nW = Lp // window_size
    bias = build_attn_bias(p['rel_table'], p['rel_index'], mask,
                           num_heads, nW, window_size)
    attn = window_attention(qkv, bias, num_heads, scale, B, nW, window_size, C)

    if shift_size > 0:
        attn = jnp.roll(attn, shift_size, axis=1)
    if pad_r:
        attn = attn[:, :L, :]

    # --- fused attention output projection + residual add ---
    x = linear_residual(attn.reshape(B * L, C), p['proj_w'], p['proj_b'],
                        shortcut.reshape(B * L, C)).reshape(B, L, C)

    # --- fused LayerNorm2 + MLP (fc1 -> GELU -> fc2) + residual ---
    x = ln_mlp_residual(x.reshape(B * L, C), p['norm2_g'], p['norm2_b'],
                        p['fc1_w'], p['fc1_b'], p['fc2_w'], p['fc2_b'])
    return x.reshape(B, L, C)


def patch_merging(x, p):
    B, L, C = x.shape
    if L % 2 == 1:
        x = jnp.pad(x, ((0, 0), (0, 1), (0, 0)))
        L += 1
    x0 = x[:, 0::2, :]
    x1 = x[:, 1::2, :]
    x = jnp.concatenate([x0, x1], axis=-1).reshape(B * (L // 2), 2 * C)
    # Fused LayerNorm + reduction Linear (no bias).
    x = ln_linear(x, p['norm_g'], p['norm_b'], p['red_w'], None)
    return x.reshape(B, L // 2, 2 * C)


def basic_layer(x_bcl, lp, window_size, num_heads, has_downsample):
    B, C, L = x_bcl.shape
    shift_size = window_size // 2
    x = jnp.transpose(x_bcl, (0, 2, 1))                       # (B, L, C)
    attn_mask = jnp.asarray(compute_mask_np(L, window_size, shift_size))
    for i, bp in enumerate(lp['blocks']):
        ss = 0 if i % 2 == 0 else shift_size
        x = swin_block(x, bp, window_size, ss, attn_mask, num_heads)
    if has_downsample:
        x = patch_merging(x, lp['down'])
    return jnp.transpose(x, (0, 2, 1))                        # (B, C', L')


def patch_embed(x_bcl, p, patch_size, embed_dim):
    B, Cin, L = x_bcl.shape
    # Conv1d(k=stride=patch_size) == reshape + matmul.
    assert L % patch_size == 0  # TODO(synk): torch F.pad here pads the channel dim (quirk) and breaks Conv1d anyway.
    nP = L // patch_size
    xp = x_bcl.reshape(B, Cin, nP, patch_size).transpose(0, 2, 1, 3)
    xp = xp.reshape(B * nP, Cin * patch_size)
    w = p['conv_w'].reshape(embed_dim, Cin * patch_size).T    # (Cin*p, E)
    y = linear(xp, w, p['conv_b'])                            # (B*nP, E)
    return y.reshape(B, nP, embed_dim).transpose(0, 2, 1)     # (B, E, nP)


def swin_transformer_1d_forward(x, params, cfg):
    x = patch_embed(x, params['patch_embed'], cfg['patch_size'], cfg['embed_dim'])
    # pos_drop: identity (drop_rate=0 / eval)
    num_layers = len(cfg['depths'])
    for i in range(num_layers):
        x = basic_layer(x, params['layers'][i], cfg['window_size'],
                        cfg['num_heads'][i], has_downsample=(i < num_layers - 1))
    xt = jnp.transpose(x, (0, 2, 1))                          # (B, L, C)
    mlc, reg = final_head(xt, params['norm_g'], params['norm_b'],
                          params['cls_w'], params['cls_b'],
                          params['reg_w'], params['reg_b'])
    return mlc, reg


# ----------------------------------------------------------------------------
# Deterministic synthetic parameters
# ----------------------------------------------------------------------------

def init_params(key, cfg):
    keys = iter(jax.random.split(key, 512))

    def nrm(shape, std=0.02):
        return jax.random.normal(next(keys), shape, jnp.float32) * std

    E, P, Cin = cfg['embed_dim'], cfg['patch_size'], cfg['in_chans']
    ws, mr = cfg['window_size'], cfg['mlp_ratio']
    params = {'patch_embed': {'conv_w': nrm((E, Cin, P), 0.1),
                              'conv_b': nrm((E,), 0.02)}}
    coords = np.arange(ws)
    rel_index = jnp.asarray(coords[:, None] - coords[None, :] + ws - 1, jnp.int32)

    layers = []
    for i, (depth, nh) in enumerate(zip(cfg['depths'], cfg['num_heads'])):
        C = E * (2 ** i)
        Ch = int(C * mr)
        blocks = []
        for _ in range(depth):
            blocks.append({
                'norm1_g': jnp.ones((C,), jnp.float32), 'norm1_b': jnp.zeros((C,), jnp.float32),
                'qkv_w': nrm((C, 3 * C)), 'qkv_b': nrm((3 * C,), 0.01),
                'rel_table': nrm((2 * ws - 1, nh)), 'rel_index': rel_index,
                'proj_w': nrm((C, C)), 'proj_b': nrm((C,), 0.01),
                'norm2_g': jnp.ones((C,), jnp.float32), 'norm2_b': jnp.zeros((C,), jnp.float32),
                'fc1_w': nrm((C, Ch)), 'fc1_b': nrm((Ch,), 0.01),
                'fc2_w': nrm((Ch, C)), 'fc2_b': nrm((C,), 0.01),
            })
        lp = {'blocks': blocks}
        if i < len(cfg['depths']) - 1:
            lp['down'] = {'norm_g': jnp.ones((2 * C,), jnp.float32),
                          'norm_b': jnp.zeros((2 * C,), jnp.float32),
                          'red_w': nrm((2 * C, 2 * C))}
        layers.append(lp)
    params['layers'] = layers

    NF = E * (2 ** (len(cfg['depths']) - 1))
    params['norm_g'] = jnp.ones((NF,), jnp.float32)
    params['norm_b'] = jnp.zeros((NF,), jnp.float32)
    params['cls_w'] = nrm((NF, cfg['num_classes']))
    params['cls_b'] = jnp.zeros((cfg['num_classes'],), jnp.float32)
    params['reg_w'] = nrm((NF, cfg['num_classes']))
    params['reg_b'] = jnp.zeros((cfg['num_classes'],), jnp.float32)
    return params


# ----------------------------------------------------------------------------

if __name__ == "__main__":
    # Small but shape-consistent config (dims double per stage, heads divide dim).
    cfg = dict(num_classes=4, patch_size=4, in_chans=4, embed_dim=16,
               depths=[2, 2], num_heads=[2, 4], window_size=8, mlp_ratio=2.0)

    key = jax.random.PRNGKey(0)
    kx, kp = jax.random.split(key)
    x = jax.random.normal(kx, (2, cfg['in_chans'], 256), jnp.float32)  # (B, C_in, L)
    params = init_params(kp, cfg)

    fwd = jax.jit(lambda xx, pp: swin_transformer_1d_forward(xx, pp, cfg))
    mlc, reg = fwd(x, params)
    jax.block_until_ready((mlc, reg))

    assert mlc.shape == (2, cfg['num_classes'])
    assert reg.shape == (2, cfg['num_classes'])
    assert bool(jnp.all(jnp.isfinite(mlc))) and bool(jnp.all(jnp.isfinite(reg)))
    print("KERNEL_OK")
</pallas_src>

<mosaic_0001>
module attributes {stable_mosaic.version = 11 : i64} {
  func.func @_linear_kernel(%arg0: i32, %arg1: memref<128x16xf32, #tpu.memory_space<vmem>>, %arg2: memref<16x16xbf16, #tpu.memory_space<vmem>>, %arg3: memref<1x16xf32, #tpu.memory_space<vmem>>, %arg4: memref<128x16xf32, #tpu.memory_space<vmem>>) attributes {dimension_semantics = [#tpu.dimension_semantics<parallel>], iteration_bounds = array<i64: 1>, scalar_prefetch = 0 : i64, scratch_operands = 0 : i64, tpu.core_type = #tpu.core_type<tc>, window_params = [{transform_indices = @transform_0, window_bounds = array<i64: 128, 16>}, {pipeline_mode = #tpu.pipeline_mode<synchronous>, transform_indices = @transform_1, window_bounds = array<i64: 16, 16>}, {pipeline_mode = #tpu.pipeline_mode<synchronous>, transform_indices = @transform_2, window_bounds = array<i64: 1, 16>}, {transform_indices = @transform_3, window_bounds = array<i64: 128, 16>}]} {
    %c0 = arith.constant 0 : index
    %c0_0 = arith.constant 0 : index
    %0 = vector.load %arg1[%c0, %c0_0] : memref<128x16xf32, #tpu.memory_space<vmem>>, vector<128x16xf32>
    %1 = arith.truncf %0 : vector<128x16xf32> to vector<128x16xbf16>
    %c0_1 = arith.constant 0 : index
    %c0_2 = arith.constant 0 : index
    %2 = vector.load %arg2[%c0_1, %c0_2] : memref<16x16xbf16, #tpu.memory_space<vmem>>, vector<16x16xbf16>
    %cst = arith.constant dense<0.000000e+00> : vector<128x16xf32>
    %3 = tpu.matmul %1, %2, %cst {dimension_numbers = #tpu.dot_dimension_numbers<[1], [0], [0], [1], [0, 0, 1, 1], [], []>} : vector<128x16xbf16>, vector<16x16xbf16>, vector<128x16xf32> -> vector<128x16xf32>
    %c0_3 = arith.constant 0 : index
    %c0_4 = arith.constant 0 : index
    %4 = vector.load %arg3[%c0_3, %c0_4] : memref<1x16xf32, #tpu.memory_space<vmem>>, vector<1x16xf32>
    %5 = vector.broadcast %4 : vector<1x16xf32> to vector<128x16xf32>
    %6 = arith.addf %3, %5 : vector<128x16xf32>
    %c0_5 = arith.constant 0 : index
    %c0_6 = arith.constant 0 : index
    %7 = vector.load %arg4[%c0_5, %c0_6] : memref<128x16xf32, #tpu.memory_space<vmem>>, vector<128x16xf32>
    tpu.vector_store %arg4[%c0_5, %c0_6], %6 {strides = array<i32>} : memref<128x16xf32, #tpu.memory_space<vmem>>, vector<128x16xf32>,
    return
  }
  func.func @transform_0(%arg0: i32) -> (i32, i32) {
    %c0_i32 = arith.constant 0 : i32
    %c0_i32_0 = arith.constant 0 : i32
    return %arg0, %c0_i32 : i32, i32
  }
  func.func @transform_1(%arg0: i32) -> (i32, i32) {
    %c0_i32 = arith.constant 0 : i32
    %c0_i32_0 = arith.constant 0 : i32
    %c0_i32_1 = arith.constant 0 : i32
    return %c0_i32, %c0_i32_0 : i32, i32
  }
  func.func @transform_2(%arg0: i32) -> (i32, i32) {
    %c0_i32 = arith.constant 0 : i32
    %c0_i32_0 = arith.constant 0 : i32
    %c0_i32_1 = arith.constant 0 : i32
    return %c0_i32, %c0_i32_0 : i32, i32
  }
  func.func @transform_3(%arg0: i32) -> (i32, i32) {
    %c0_i32 = arith.constant 0 : i32
    %c0_i32_0 = arith.constant 0 : i32
    return %arg0, %c0_i32 : i32, i32
  }
}

module attributes {stable_mosaic.version = 11 : i64} {
  func.func @_ln_linear_kernel(%arg0: i32, %arg1: memref<128x16xf32, #tpu.memory_space<vmem>>, %arg2: memref<1x16xf32, #tpu.memory_space<vmem>>, %arg3: memref<1x16xf32, #tpu.memory_space<vmem>>, %arg4: memref<16x48xbf16, #tpu.memory_space<vmem>>, %arg5: memref<1x48xf32, #tpu.memory_space<vmem>>, %arg6: memref<128x48xbf16, #tpu.memory_space<vmem>>) attributes {dimension_semantics = [#tpu.dimension_semantics<parallel>], iteration_bounds = array<i64: 1>, scalar_prefetch = 0 : i64, scratch_operands = 0 : i64, tpu.core_type = #tpu.core_type<tc>, window_params = [{transform_indices = @transform_0, window_bounds = array<i64: 128, 16>}, {pipeline_mode = #tpu.pipeline_mode<synchronous>, transform_indices = @transform_1, window_bounds = array<i64: 1, 16>}, {pipeline_mode = #tpu.pipeline_mode<synchronous>, transform_indices = @transform_2, window_bounds = array<i64: 1, 16>}, {pipeline_mode = #tpu.pipeline_mode<synchronous>, transform_indices = @transform_3, window_bounds = array<i64: 16, 48>}, {pipeline_mode = #tpu.pipeline_mode<synchronous>, transform_indices = @transform_4, window_bounds = array<i64: 1, 48>}, {transform_indices = @transform_5, window_bounds = array<i64: 128, 48>}]} {
    %c0 = arith.constant 0 : index
    %c0_0 = arith.constant 0 : index
    %0 = vector.load %arg1[%c0, %c0_0] : memref<128x16xf32, #tpu.memory_space<vmem>>, vector<128x16xf32>
    %c0_1 = arith.constant 0 : index
    %c0_2 = arith.constant 0 : index
    %1 = vector.load %arg2[%c0_1, %c0_2] : memref<1x16xf32, #tpu.memory_space<vmem>>, vector<1x16xf32>
    %c0_3 = arith.constant 0 : index
    %c0_4 = arith.constant 0 : index
    %2 = vector.load %arg3[%c0_3, %c0_4] : memref<1x16xf32, #tpu.memory_space<vmem>>, vector<1x16xf32>
    %cst = arith.constant dense<0.000000e+00> : vector<128xf32>
    %3 = vector.multi_reduction <add>, %0, %cst [1] : vector<128x16xf32> to vector<128xf32>
    %4 = vector.shape_cast %3 : vector<128xf32> to vector<128x1xf32>
    %cst_5 = arith.constant 1.600000e+01 : f32
    %5 = vector.broadcast %cst_5 : f32 to vector<128x1xf32>
    %6 = arith.divf %4, %5 : vector<128x1xf32>
    %7 = vector.broadcast %6 : vector<128x1xf32> to vector<128x16xf32>
    %8 = arith.subf %0, %7 : vector<128x16xf32>
    %9 = arith.mulf %8, %8 : vector<128x16xf32>
    %cst_6 = arith.constant dense<0.000000e+00> : vector<128xf32>
    %10 = vector.multi_reduction <add>, %9, %cst_6 [1] : vector<128x16xf32> to vector<128xf32>
    %11 = vector.shape_cast %10 : vector<128xf32> to vector<128x1xf32>
    %cst_7 = arith.constant 1.600000e+01 : f32
    %12 = vector.broadcast %cst_7 : f32 to vector<128x1xf32>
    %13 = arith.divf %11, %12 : vector<128x1xf32>
    %14 = vector.broadcast %6 : vector<128x1xf32> to vector<128x16xf32>
    %15 = arith.subf %0, %14 : vector<128x16xf32>
    %cst_8 = arith.constant 9.99999974E-6 : f32
    %16 = vector.broadcast %cst_8 : f32 to vector<128x1xf32>
    %17 = arith.addf %13, %16 : vector<128x1xf32>
    %18 = math.rsqrt %17 : vector<128x1xf32>
    %19 = vector.broadcast %18 : vector<128x1xf32> to vector<128x16xf32>
    %20 = arith.mulf %15, %19 : vector<128x16xf32>
    %21 = vector.broadcast %1 : vector<1x16xf32> to vector<128x16xf32>
    %22 = arith.mulf %20, %21 : vector<128x16xf32>
    %23 = vector.broadcast %2 : vector<1x16xf32> to vector<128x16xf32>
    %24 = arith.addf %22, %23 : vector<128x16xf32>
    %25 = arith.truncf %24 : vector<128x16xf32> to vector<128x16xbf16>
    %c0_9 = arith.constant 0 : index
    %c0_10 = arith.constant 0 : index
    %26 = vector.load %arg4[%c0_9, %c0_10] : memref<16x48xbf16, #tpu.memory_space<vmem>>, vector<16x48xbf16>
    %cst_11 = arith.constant dense<0.000000e+00> : vector<128x48xf32>
    %27 = tpu.matmul %25, %26, %cst_11 {dimension_numbers = #tpu.dot_dimension_numbers<[1], [0], [0], [1], [0, 0, 1, 1], [], []>} : vector<128x16xbf16>, vector<16x48xbf16>, vector<128x48xf32> -> vector<128x48xf32>
    %c0_12 = arith.constant 0 : index
    %c0_13 = arith.constant 0 : index
    %28 = vector.load %arg5[%c0_12, %c0_13] : memref<1x48xf32, #tpu.memory_space<vmem>>, vector<1x48xf32>
    %29 = vector.broadcast %28 : vector<1x48xf32> to vector<128x48xf32>
    %30 = arith.addf %27, %29 : vector<128x48xf32>
    %31 = arith.truncf %30 : vector<128x48xf32> to vector<128x48xbf16>
    %c0_14 = arith.constant 0 : index
    %c0_15 = arith.constant 0 : index
    %32 = vector.load %arg6[%c0_14, %c0_15] : memref<128x48xbf16, #tpu.memory_space<vmem>>, vector<128x48xbf16>
    tpu.vector_store %arg6[%c0_14, %c0_15], %31 {strides = array<i32>} : memref<128x48xbf16, #tpu.memory_space<vmem>>, vector<128x48xbf16>,
    return
  }
  func.func @transform_0(%arg0: i32) -> (i32, i32) {
    %c0_i32 = arith.constant 0 : i32
    %c0_i32_0 = arith.constant 0 : i32
    return %arg0, %c0_i32 : i32, i32
  }
  func.func @transform_1(%arg0: i32) -> (i32, i32) {
    %c0_i32 = arith.constant 0 : i32
    %c0_i32_0 = arith.constant 0 : i32
    %c0_i32_1 = arith.constant 0 : i32
    return %c0_i32, %c0_i32_0 : i32, i32
  }
  func.func @transform_2(%arg0: i32) -> (i32, i32) {
    %c0_i32 = arith.constant 0 : i32
    %c0_i32_0 = arith.constant 0 : i32
    %c0_i32_1 = arith.constant 0 : i32
    return %c0_i32, %c0_i32_0 : i32, i32
  }
  func.func @transform_3(%arg0: i32) -> (i32, i32) {
    %c0_i32 = arith.constant 0 : i32
    %c0_i32_0 = arith.constant 0 : i32
    %c0_i32_1 = arith.constant 0 : i32
    return %c0_i32, %c0_i32_0 : i32, i32
  }
  func.func @transform_4(%arg0: i32) -> (i32, i32) {
    %c0_i32 = arith.constant 0 : i32
    %c0_i32_0 = arith.constant 0 : i32
    %c0_i32_1 = arith.constant 0 : i32
    return %c0_i32, %c0_i32_0 : i32, i32
  }
  func.func @transform_5(%arg0: i32) -> (i32, i32) {
    %c0_i32 = arith.constant 0 : i32
    %c0_i32_0 = arith.constant 0 : i32
    return %arg0, %c0_i32 : i32, i32
  }
}

module attributes {stable_mosaic.version = 11 : i64} {
  func.func @_attn_kernel(%arg0: i32, %arg1: i32, %arg2: memref<1x16x8x8xbf16, #tpu.memory_space<vmem>>, %arg3: memref<1x16x8x8xbf16, #tpu.memory_space<vmem>>, %arg4: memref<1x16x8x8xbf16, #tpu.memory_space<vmem>>, %arg5: memref<16x8x8xf32, #tpu.memory_space<vmem>>, %arg6: memref<1x16x8x8xf32, #tpu.memory_space<vmem>>) attributes {dimension_semantics = [#tpu.dimension_semantics<parallel>, #tpu.dimension_semantics<parallel>], iteration_bounds = array<i64: 2, 1>, scalar_prefetch = 0 : i64, scratch_operands = 0 : i64, tpu.core_type = #tpu.core_type<tc>, window_params = [{transform_indices = @transform_0, window_bounds = array<i64: 1, 16, 8, 8>}, {transform_indices = @transform_1, window_bounds = array<i64: 1, 16, 8, 8>}, {transform_indices = @transform_2, window_bounds = array<i64: 1, 16, 8, 8>}, {transform_indices = @transform_3, window_bounds = array<i64: 16, 8, 8>}, {transform_indices = @transform_4, window_bounds = array<i64: 1, 16, 8, 8>}]} {
    %c0 = arith.constant 0 : index
    %c0_0 = arith.constant 0 : index
    %c0_1 = arith.constant 0 : index
    %c0_2 = arith.constant 0 : index
    %0 = vector.load %arg2[%c0, %c0_0, %c0_1, %c0_2] : memref<1x16x8x8xbf16, #tpu.memory_space<vmem>>, vector<1x16x8x8xbf16>
    %1 = vector.shape_cast %0 : vector<1x16x8x8xbf16> to vector<16x8x8xbf16>
    %c0_3 = arith.constant 0 : index
    %c0_4 = arith.constant 0 : index
    %c0_5 = arith.constant 0 : index
    %c0_6 = arith.constant 0 : index
    %2 = vector.load %arg3[%c0_3, %c0_4, %c0_5, %c0_6] : memref<1x16x8x8xbf16, #tpu.memory_space<vmem>>, vector<1x16x8x8xbf16>
    %3 = vector.shape_cast %2 : vector<1x16x8x8xbf16> to vector<16x8x8xbf16>
    %c0_7 = arith.constant 0 : index
    %c0_8 = arith.constant 0 : index
    %c0_9 = arith.constant 0 : index
    %c0_10 = arith.constant 0 : index
    %4 = vector.load %arg4[%c0_7, %c0_8, %c0_9, %c0_10] : memref<1x16x8x8xbf16, #tpu.memory_space<vmem>>, vector<1x16x8x8xbf16>
    %5 = vector.shape_cast %4 : vector<1x16x8x8xbf16> to vector<16x8x8xbf16>
    "tpu.trace_start"() <{level = 10 : i32, message = "gqd,gkd->gqk"}> : () -> ()
    %cst = arith.constant dense<0.000000e+00> : vector<16x8x8xf32>
    %6 = tpu.matmul %1, %3, %cst {dimension_numbers = #tpu.dot_dimension_numbers<[2], [2], [1], [1], [0, 0, 0, 1, 1, 1], [0], [0]>} : vector<16x8x8xbf16>, vector<16x8x8xbf16>, vector<16x8x8xf32> -> vector<16x8x8xf32>
    "tpu.trace_stop"() : () -> ()
    %cst_11 = arith.constant 0.353553385 : f32
    %7 = vector.broadcast %cst_11 : f32 to vector<16x8x8xf32>
    %8 = arith.mulf %6, %7 : vector<16x8x8xf32>
    %c0_12 = arith.constant 0 : index
    %c0_13 = arith.constant 0 : index
    %c0_14 = arith.constant 0 : index
    %9 = vector.load %arg5[%c0_12, %c0_13, %c0_14] : memref<16x8x8xf32, #tpu.memory_space<vmem>>, vector<16x8x8xf32>
    %10 = arith.addf %8, %9 : vector<16x8x8xf32>
    %cst_15 = arith.constant dense<0xFF800000> : vector<16x8xf32>
    %11 = vector.multi_reduction <maximumf>, %10, %cst_15 [2] : vector<16x8x8xf32> to vector<16x8xf32>
    %12 = vector.shape_cast %11 : vector<16x8xf32> to vector<16x8x1xf32>
    %13 = vector.broadcast %12 : vector<16x8x1xf32> to vector<16x8x8xf32>
    %14 = arith.subf %10, %13 : vector<16x8x8xf32>
    %15 = math.exp %14 : vector<16x8x8xf32>
    %cst_16 = arith.constant dense<0.000000e+00> : vector<16x8xf32>
    %16 = vector.multi_reduction <add>, %15, %cst_16 [2] : vector<16x8x8xf32> to vector<16x8xf32>
    %17 = vector.shape_cast %16 : vector<16x8xf32> to vector<16x8x1xf32>
    %18 = tpu.reciprocal %17 {approx = true} : vector<16x8x1xf32> -> vector<16x8x1xf32>
    %19 = vector.broadcast %18 : vector<16x8x1xf32> to vector<16x8x8xf32>
    %20 = arith.mulf %15, %19 : vector<16x8x8xf32>
    %21 = arith.truncf %20 : vector<16x8x8xf32> to vector<16x8x8xbf16>
    "tpu.trace_start"() <{level = 10 : i32, message = "gqk,gkd->gqd"}> : () -> ()
    %cst_17 = arith.constant dense<0.000000e+00> : vector<16x8x8xf32>
    %22 = tpu.matmul %21, %5, %cst_17 {dimension_numbers = #tpu.dot_dimension_numbers<[2], [1], [1], [2], [0, 0, 0, 1, 1, 2], [0], [0]>} : vector<16x8x8xbf16>, vector<16x8x8xbf16>, vector<16x8x8xf32> -> vector<16x8x8xf32>
    "tpu.trace_stop"() : () -> ()
    %c0_18 = arith.constant 0 : index
    %c0_19 = arith.constant 0 : index
    %c0_20 = arith.constant 0 : index
    %c0_21 = arith.constant 0 : index
    %23 = vector.load %arg6[%c0_18, %c0_19, %c0_20, %c0_21] : memref<1x16x8x8xf32, #tpu.memory_space<vmem>>, vector<1x16x8x8xf32>
    %24 = vector.shape_cast %23 : vector<1x16x8x8xf32> to vector<16x8x8xf32>
    %25 = vector.shape_cast %22 : vector<16x8x8xf32> to vector<1x16x8x8xf32>
    tpu.vector_store %arg6[%c0_18, %c0_19, %c0_20, %c0_21], %25 {strides = array<i32>} : memref<1x16x8x8xf32, #tpu.memory_space<vmem>>, vector<1x16x8x8xf32>,
    return
  }
  func.func @transform_0(%arg0: i32, %arg1: i32) -> (i32, i32, i32, i32) {
    %c0_i32 = arith.constant 0 : i32
    %c0_i32_0 = arith.constant 0 : i32
    %c0_i32_1 = arith.constant 0 : i32
    return %arg0, %arg1, %c0_i32, %c0_i32_0 : i32, i32, i32, i32
  }
  func.func @transform_1(%arg0: i32, %arg1: i32) -> (i32, i32, i32, i32) {
    %c0_i32 = arith.constant 0 : i32
    %c0_i32_0 = arith.constant 0 : i32
    %c0_i32_1 = arith.constant 0 : i32
    return %arg0, %arg1, %c0_i32, %c0_i32_0 : i32, i32, i32, i32
  }
  func.func @transform_2(%arg0: i32, %arg1: i32) -> (i32, i32, i32, i32) {
    %c0_i32 = arith.constant 0 : i32
    %c0_i32_0 = arith.constant 0 : i32
    %c0_i32_1 = arith.constant 0 : i32
    return %arg0, %arg1, %c0_i32, %c0_i32_0 : i32, i32, i32, i32
  }
  func.func @transform_3(%arg0: i32, %arg1: i32) -> (i32, i32, i32) {
    %c0_i32 = arith.constant 0 : i32
    %c0_i32_0 = arith.constant 0 : i32
    %c0_i32_1 = arith.constant 0 : i32
    return %arg1, %c0_i32, %c0_i32_0 : i32, i32, i32
  }
  func.func @transform_4(%arg0: i32, %arg1: i32) -> (i32, i32, i32, i32) {
    %c0_i32 = arith.constant 0 : i32
    %c0_i32_0 = arith.constant 0 : i32
    %c0_i32_1 = arith.constant 0 : i32
    return %arg0, %arg1, %c0_i32, %c0_i32_0 : i32, i32, i32, i32
  }
}

module attributes {stable_mosaic.version = 11 : i64} {
  func.func @_linear_residual_kernel(%arg0: i32, %arg1: memref<128x16xf32, #tpu.memory_space<vmem>>, %arg2: memref<16x16xbf16, #tpu.memory_space<vmem>>, %arg3: memref<1x16xf32, #tpu.memory_space<vmem>>, %arg4: memref<128x16xf32, #tpu.memory_space<vmem>>, %arg5: memref<128x16xf32, #tpu.memory_space<vmem>>) attributes {dimension_semantics = [#tpu.dimension_semantics<parallel>], iteration_bounds = array<i64: 1>, scalar_prefetch = 0 : i64, scratch_operands = 0 : i64, tpu.core_type = #tpu.core_type<tc>, window_params = [{transform_indices = @transform_0, window_bounds = array<i64: 128, 16>}, {pipeline_mode = #tpu.pipeline_mode<synchronous>, transform_indices = @transform_1, window_bounds = array<i64: 16, 16>}, {pipeline_mode = #tpu.pipeline_mode<synchronous>, transform_indices = @transform_2, window_bounds = array<i64: 1, 16>}, {transform_indices = @transform_3, window_bounds = array<i64: 128, 16>}, {transform_indices = @transform_4, window_bounds = array<i64: 128, 16>}]} {
    %c0 = arith.constant 0 : index
    %c0_0 = arith.constant 0 : index
    %0 = vector.load %arg4[%c0, %c0_0] : memref<128x16xf32, #tpu.memory_space<vmem>>, vector<128x16xf32>
    %c0_1 = arith.constant 0 : index
    %c0_2 = arith.constant 0 : index
    %1 = vector.load %arg1[%c0_1, %c0_2] : memref<128x16xf32, #tpu.memory_space<vmem>>, vector<128x16xf32>
    %2 = arith.truncf %1 : vector<128x16xf32> to vector<128x16xbf16>
    %c0_3 = arith.constant 0 : index
    %c0_4 = arith.constant 0 : index
    %3 = vector.load %arg2[%c0_3, %c0_4] : memref<16x16xbf16, #tpu.memory_space<vmem>>, vector<16x16xbf16>
    %cst = arith.constant dense<0.000000e+00> : vector<128x16xf32>
    %4 = tpu.matmul %2, %3, %cst {dimension_numbers = #tpu.dot_dimension_numbers<[1], [0], [0], [1], [0, 0, 1, 1], [], []>} : vector<128x16xbf16>, vector<16x16xbf16>, vector<128x16xf32> -> vector<128x16xf32>
    %5 = arith.addf %0, %4 : vector<128x16xf32>
    %c0_5 = arith.constant 0 : index
    %c0_6 = arith.constant 0 : index
    %6 = vector.load %arg3[%c0_5, %c0_6] : memref<1x16xf32, #tpu.memory_space<vmem>>, vector<1x16xf32>
    %7 = vector.broadcast %6 : vector<1x16xf32> to vector<128x16xf32>
    %8 = arith.addf %5, %7 : vector<128x16xf32>
    %c0_7 = arith.constant 0 : index
    %c0_8 = arith.constant 0 : index
    %9 = vector.load %arg5[%c0_7, %c0_8] : memref<128x16xf32, #tpu.memory_space<vmem>>, vector<128x16xf32>
    tpu.vector_store %arg5[%c0_7, %c0_8], %8 {strides = array<i32>} : memref<128x16xf32, #tpu.memory_space<vmem>>, vector<128x16xf32>,
    return
  }
  func.func @transform_0(%arg0: i32) -> (i32, i32) {
    %c0_i32 = arith.constant 0 : i32
    %c0_i32_0 = arith.constant 0 : i32
    return %arg0, %c0_i32 : i32, i32
  }
  func.func @transform_1(%arg0: i32) -> (i32, i32) {
    %c0_i32 = arith.constant 0 : i32
    %c0_i32_0 = arith.constant 0 : i32
    %c0_i32_1 = arith.constant 0 : i32
    return %c0_i32, %c0_i32_0 : i32, i32
  }
  func.func @transform_2(%arg0: i32) -> (i32, i32) {
    %c0_i32 = arith.constant 0 : i32
    %c0_i32_0 = arith.constant 0 : i32
    %c0_i32_1 = arith.constant 0 : i32
    return %c0_i32, %c0_i32_0 : i32, i32
  }
  func.func @transform_3(%arg0: i32) -> (i32, i32) {
    %c0_i32 = arith.constant 0 : i32
    %c0_i32_0 = arith.constant 0 : i32
    return %arg0, %c0_i32 : i32, i32
  }
  func.func @transform_4(%arg0: i32) -> (i32, i32) {
    %c0_i32 = arith.constant 0 : i32
    %c0_i32_0 = arith.constant 0 : i32
    return %arg0, %c0_i32 : i32, i32
  }
}

module attributes {stable_mosaic.version = 11 : i64} {
  func.func @_ln_mlp_residual_kernel(%arg0: i32, %arg1: memref<128x16xf32, #tpu.memory_space<vmem>>, %arg2: memref<1x16xf32, #tpu.memory_space<vmem>>, %arg3: memref<1x16xf32, #tpu.memory_space<vmem>>, %arg4: memref<16x32xbf16, #tpu.memory_space<vmem>>, %arg5: memref<1x32xf32, #tpu.memory_space<vmem>>, %arg6: memref<32x16xbf16, #tpu.memory_space<vmem>>, %arg7: memref<1x16xf32, #tpu.memory_space<vmem>>, %arg8: memref<128x16xf32, #tpu.memory_space<vmem>>) attributes {dimension_semantics = [#tpu.dimension_semantics<parallel>], iteration_bounds = array<i64: 1>, scalar_prefetch = 0 : i64, scratch_operands = 0 : i64, tpu.core_type = #tpu.core_type<tc>, window_params = [{transform_indices = @transform_0, window_bounds = array<i64: 128, 16>}, {pipeline_mode = #tpu.pipeline_mode<synchronous>, transform_indices = @transform_1, window_bounds = array<i64: 1, 16>}, {pipeline_mode = #tpu.pipeline_mode<synchronous>, transform_indices = @transform_2, window_bounds = array<i64: 1, 16>}, {pipeline_mode = #tpu.pipeline_mode<synchronous>, transform_indices = @transform_3, window_bounds = array<i64: 16, 32>}, {pipeline_mode = #tpu.pipeline_mode<synchronous>, transform_indices = @transform_4, window_bounds = array<i64: 1, 32>}, {pipeline_mode = #tpu.pipeline_mode<synchronous>, transform_indices = @transform_5, window_bounds = array<i64: 32, 16>}, {pipeline_mode = #tpu.pipeline_mode<synchronous>, transform_indices = @transform_6, window_bounds = array<i64: 1, 16>}, {transform_indices = @transform_7, window_bounds = array<i64: 128, 16>}]} {
    %c0 = arith.constant 0 : index
    %c0_0 = arith.constant 0 : index
    %0 = vector.load %arg1[%c0, %c0_0] : memref<128x16xf32, #tpu.memory_space<vmem>>, vector<128x16xf32>
    %c0_1 = arith.constant 0 : index
    %c0_2 = arith.constant 0 : index
    %1 = vector.load %arg2[%c0_1, %c0_2] : memref<1x16xf32, #tpu.memory_space<vmem>>, vector<1x16xf32>
    %c0_3 = arith.constant 0 : index
    %c0_4 = arith.constant 0 : index
    %2 = vector.load %arg3[%c0_3, %c0_4] : memref<1x16xf32, #tpu.memory_space<vmem>>, vector<1x16xf32>
    %cst = arith.constant dense<0.000000e+00> : vector<128xf32>
    %3 = vector.multi_reduction <add>, %0, %cst [1] : vector<128x16xf32> to vector<128xf32>
    %4 = vector.shape_cast %3 : vector<128xf32> to vector<128x1xf32>
    %cst_5 = arith.constant 1.600000e+01 : f32
    %5 = vector.broadcast %cst_5 : f32 to vector<128x1xf32>
    %6 = arith.divf %4, %5 : vector<128x1xf32>
    %7 = vector.broadcast %6 : vector<128x1xf32> to vector<128x16xf32>
    %8 = arith.subf %0, %7 : vector<128x16xf32>
    %9 = arith.mulf %8, %8 : vector<128x16xf32>
    %cst_6 = arith.constant dense<0.000000e+00> : vector<128xf32>
    %10 = vector.multi_reduction <add>, %9, %cst_6 [1] : vector<128x16xf32> to vector<128xf32>
    %11 = vector.shape_cast %10 : vector<128xf32> to vector<128x1xf32>
    %cst_7 = arith.constant 1.600000e+01 : f32
    %12 = vector.broadcast %cst_7 : f32 to vector<128x1xf32>
    %13 = arith.divf %11, %12 : vector<128x1xf32>
    %14 = vector.broadcast %6 : vector<128x1xf32> to vector<128x16xf32>
    %15 = arith.subf %0, %14 : vector<128x16xf32>
    %cst_8 = arith.constant 9.99999974E-6 : f32
    %16 = vector.broadcast %cst_8 : f32 to vector<128x1xf32>
    %17 = arith.addf %13, %16 : vector<128x1xf32>
    %18 = math.rsqrt %17 : vector<128x1xf32>
    %19 = vector.broadcast %18 : vector<128x1xf32> to vector<128x16xf32>
    %20 = arith.mulf %15, %19 : vector<128x16xf32>
    %21 = vector.broadcast %1 : vector<1x16xf32> to vector<128x16xf32>
    %22 = arith.mulf %20, %21 : vector<128x16xf32>
    %23 = vector.broadcast %2 : vector<1x16xf32> to vector<128x16xf32>
    %24 = arith.addf %22, %23 : vector<128x16xf32>
    %25 = arith.truncf %24 : vector<128x16xf32> to vector<128x16xbf16>
    %c0_9 = arith.constant 0 : index
    %c0_10 = arith.constant 0 : index
    %26 = vector.load %arg4[%c0_9, %c0_10] : memref<16x32xbf16, #tpu.memory_space<vmem>>, vector<16x32xbf16>
    %cst_11 = arith.constant dense<0.000000e+00> : vector<128x32xf32>
    %27 = tpu.matmul %25, %26, %cst_11 {dimension_numbers = #tpu.dot_dimension_numbers<[1], [0], [0], [1], [0, 0, 1, 1], [], []>} : vector<128x16xbf16>, vector<16x32xbf16>, vector<128x32xf32> -> vector<128x32xf32>
    %c0_12 = arith.constant 0 : index
    %c0_13 = arith.constant 0 : index
    %28 = vector.load %arg5[%c0_12, %c0_13] : memref<1x32xf32, #tpu.memory_space<vmem>>, vector<1x32xf32>
    %29 = vector.broadcast %28 : vector<1x32xf32> to vector<128x32xf32>
    %30 = arith.addf %27, %29 : vector<128x32xf32>
    %cst_14 = arith.constant 5.000000e-01 : f32
    %31 = vector.broadcast %cst_14 : f32 to vector<128x32xf32>
    %32 = arith.mulf %31, %30 : vector<128x32xf32>
    %cst_15 = arith.constant 0.707106769 : f32
    %33 = vector.broadcast %cst_15 : f32 to vector<128x32xf32>
    %34 = arith.mulf %30, %33 : vector<128x32xf32>
    %cst_16 = arith.constant 0.000000e+00 : f32
    %35 = vector.broadcast %cst_16 : f32 to vector<128x32xf32>
    %36 = arith.cmpf olt, %34, %35 : vector<128x32xf32>
    %cst_17 = arith.constant -1.000000e+00 : f32
    %cst_18 = arith.constant 1.000000e+00 : f32
    %37 = vector.broadcast %cst_17 : f32 to vector<128x32xf32>
    %38 = vector.broadcast %cst_18 : f32 to vector<128x32xf32>
    %39 = arith.select %36, %37, %38 : vector<128x32xi1>, vector<128x32xf32>
    %40 = math.absf %34 : vector<128x32xf32>
    %cst_19 = arith.constant 0.327591091 : f32
    %41 = vector.broadcast %cst_19 : f32 to vector<128x32xf32>
    %42 = arith.mulf %41, %40 : vector<128x32xf32>
    %cst_20 = arith.constant 1.000000e+00 : f32
    %43 = vector.broadcast %cst_20 : f32 to vector<128x32xf32>
    %44 = arith.addf %43, %42 : vector<128x32xf32>
    %cst_21 = arith.constant 1.000000e+00 : f32
    %45 = vector.broadcast %cst_21 : f32 to vector<128x32xf32>
    %46 = arith.divf %45, %44 : vector<128x32xf32>
    %cst_22 = arith.constant 1.06140542 : f32
    %47 = vector.broadcast %cst_22 : f32 to vector<128x32xf32>
    %48 = arith.mulf %47, %46 : vector<128x32xf32>
    %cst_23 = arith.constant -1.45315206 : f32
    %49 = vector.broadcast %cst_23 : f32 to vector<128x32xf32>
    %50 = arith.addf %48, %49 : vector<128x32xf32>
    %51 = arith.mulf %50, %46 : vector<128x32xf32>
    %cst_24 = arith.constant 1.42141378 : f32
    %52 = vector.broadcast %cst_24 : f32 to vector<128x32xf32>
    %53 = arith.addf %51, %52 : vector<128x32xf32>
    %54 = arith.mulf %53, %46 : vector<128x32xf32>
    %cst_25 = arith.constant -0.284496725 : f32
    %55 = vector.broadcast %cst_25 : f32 to vector<128x32xf32>
    %56 = arith.addf %54, %55 : vector<128x32xf32>
    %57 = arith.mulf %56, %46 : vector<128x32xf32>
    %cst_26 = arith.constant 0.254829586 : f32
    %58 = vector.broadcast %cst_26 : f32 to vector<128x32xf32>
    %59 = arith.addf %57, %58 : vector<128x32xf32>
    %60 = arith.mulf %59, %46 : vector<128x32xf32>
    %cst_27 = arith.constant 0.000000e+00 : f32
    %61 = vector.broadcast %cst_27 : f32 to vector<128x32xf32>
    %62 = arith.subf %61, %40 : vector<128x32xf32>
    %63 = arith.mulf %62, %40 : vector<128x32xf32>
    %64 = math.exp %63 : vector<128x32xf32>
    %65 = arith.mulf %60, %64 : vector<128x32xf32>
    %cst_28 = arith.constant 1.000000e+00 : f32
    %66 = vector.broadcast %cst_28 : f32 to vector<128x32xf32>
    %67 = arith.subf %66, %65 : vector<128x32xf32>
    %68 = arith.mulf %39, %67 : vector<128x32xf32>
    %cst_29 = arith.constant 1.000000e+00 : f32
    %69 = vector.broadcast %cst_29 : f32 to vector<128x32xf32>
    %70 = arith.addf %69, %68 : vector<128x32xf32>
    %71 = arith.mulf %32, %70 : vector<128x32xf32>
    %72 = arith.truncf %71 : vector<128x32xf32> to vector<128x32xbf16>
    %c0_30 = arith.constant 0 : index
    %c0_31 = arith.constant 0 : index
    %73 = vector.load %arg6[%c0_30, %c0_31] : memref<32x16xbf16, #tpu.memory_space<vmem>>, vector<32x16xbf16>
    %cst_32 = arith.constant dense<0.000000e+00> : vector<128x16xf32>
    %74 = tpu.matmul %72, %73, %cst_32 {dimension_numbers = #tpu.dot_dimension_numbers<[1], [0], [0], [1], [0, 0, 1, 1], [], []>} : vector<128x32xbf16>, vector<32x16xbf16>, vector<128x16xf32> -> vector<128x16xf32>
    %c0_33 = arith.constant 0 : index
    %c0_34 = arith.constant 0 : index
    %75 = vector.load %arg7[%c0_33, %c0_34] : memref<1x16xf32, #tpu.memory_space<vmem>>, vector<1x16xf32>
    %76 = vector.broadcast %75 : vector<1x16xf32> to vector<128x16xf32>
    %77 = arith.addf %74, %76 : vector<128x16xf32>
    %78 = arith.addf %0, %77 : vector<128x16xf32>
    %c0_35 = arith.constant 0 : index
    %c0_36 = arith.constant 0 : index
    %79 = vector.load %arg8[%c0_35, %c0_36] : memref<128x16xf32, #tpu.memory_space<vmem>>, vector<128x16xf32>
    tpu.vector_store %arg8[%c0_35, %c0_36], %78 {strides = array<i32>} : memref<128x16xf32, #tpu.memory_space<vmem>>, vector<128x16xf32>,
    return
  }
  func.func @transform_0(%arg0: i32) -> (i32, i32) {
    %c0_i32 = arith.constant 0 : i32
    %c0_i32_0 = arith.constant 0 : i32
    return %arg0, %c0_i32 : i32, i32
  }
  func.func @transform_1(%arg0: i32) -> (i32, i32) {
    %c0_i32 = arith.constant 0 : i32
    %c0_i32_0 = arith.constant 0 : i32
    %c0_i32_1 = arith.constant 0 : i32
    return %c0_i32, %c0_i32_0 : i32, i32
  }
  func.func @transform_2(%arg0: i32) -> (i32, i32) {
    %c0_i32 = arith.constant 0 : i32
    %c0_i32_0 = arith.constant 0 : i32
    %c0_i32_1 = arith.constant 0 : i32
    return %c0_i32, %c0_i32_0 : i32, i32
  }
  func.func @transform_3(%arg0: i32) -> (i32, i32) {
    %c0_i32 = arith.constant 0 : i32
    %c0_i32_0 = arith.constant 0 : i32
    %c0_i32_1 = arith.constant 0 : i32
    return %c0_i32, %c0_i32_0 : i32, i32
  }
  func.func @transform_4(%arg0: i32) -> (i32, i32) {
    %c0_i32 = arith.constant 0 : i32
    %c0_i32_0 = arith.constant 0 : i32
    %c0_i32_1 = arith.constant 0 : i32
    return %c0_i32, %c0_i32_0 : i32, i32
  }
  func.func @transform_5(%arg0: i32) -> (i32, i32) {
    %c0_i32 = arith.constant 0 : i32
    %c0_i32_0 = arith.constant 0 : i32
    %c0_i32_1 = arith.constant 0 : i32
    return %c0_i32, %c0_i32_0 : i32, i32
  }
  func.func @transform_6(%arg0: i32) -> (i32, i32) {
    %c0_i32 = arith.constant 0 : i32
    %c0_i32_0 = arith.constant 0 : i32
    %c0_i32_1 = arith.constant 0 : i32
    return %c0_i32, %c0_i32_0 : i32, i32
  }
  func.func @transform_7(%arg0: i32) -> (i32, i32) {
    %c0_i32 = arith.constant 0 : i32
    %c0_i32_0 = arith.constant 0 : i32
    return %arg0, %c0_i32 : i32, i32
  }
}

module attributes {stable_mosaic.version = 11 : i64} {
  func.func @_ln_linear_kernel(%arg0: i32, %arg1: memref<64x32xf32, #tpu.memory_space<vmem>>, %arg2: memref<1x32xf32, #tpu.memory_space<vmem>>, %arg3: memref<1x32xf32, #tpu.memory_space<vmem>>, %arg4: memref<32x32xbf16, #tpu.memory_space<vmem>>, %arg5: memref<1x32xf32, #tpu.memory_space<vmem>>, %arg6: memref<64x32xf32, #tpu.memory_space<vmem>>) attributes {dimension_semantics = [#tpu.dimension_semantics<parallel>], iteration_bounds = array<i64: 1>, scalar_prefetch = 0 : i64, scratch_operands = 0 : i64, tpu.core_type = #tpu.core_type<tc>, window_params = [{transform_indices = @transform_0, window_bounds = array<i64: 64, 32>}, {pipeline_mode = #tpu.pipeline_mode<synchronous>, transform_indices = @transform_1, window_bounds = array<i64: 1, 32>}, {pipeline_mode = #tpu.pipeline_mode<synchronous>, transform_indices = @transform_2, window_bounds = array<i64: 1, 32>}, {pipeline_mode = #tpu.pipeline_mode<synchronous>, transform_indices = @transform_3, window_bounds = array<i64: 32, 32>}, {pipeline_mode = #tpu.pipeline_mode<synchronous>, transform_indices = @transform_4, window_bounds = array<i64: 1, 32>}, {transform_indices = @transform_5, window_bounds = array<i64: 64, 32>}]} {
    %c0 = arith.constant 0 : index
    %c0_0 = arith.constant 0 : index
    %0 = vector.load %arg1[%c0, %c0_0] : memref<64x32xf32, #tpu.memory_space<vmem>>, vector<64x32xf32>
    %c0_1 = arith.constant 0 : index
    %c0_2 = arith.constant 0 : index
    %1 = vector.load %arg2[%c0_1, %c0_2] : memref<1x32xf32, #tpu.memory_space<vmem>>, vector<1x32xf32>
    %c0_3 = arith.constant 0 : index
    %c0_4 = arith.constant 0 : index
    %2 = vector.load %arg3[%c0_3, %c0_4] : memref<1x32xf32, #tpu.memory_space<vmem>>, vector<1x32xf32>
    %cst = arith.constant dense<0.000000e+00> : vector<64xf32>
    %3 = vector.multi_reduction <add>, %0, %cst [1] : vector<64x32xf32> to vector<64xf32>
    %4 = vector.shape_cast %3 : vector<64xf32> to vector<64x1xf32>
    %cst_5 = arith.constant 3.200000e+01 : f32
    %5 = vector.broadcast %cst_5 : f32 to vector<64x1xf32>
    %6 = arith.divf %4, %5 : vector<64x1xf32>
    %7 = vector.broadcast %6 : vector<64x1xf32> to vector<64x32xf32>
    %8 = arith.subf %0, %7 : vector<64x32xf32>
    %9 = arith.mulf %8, %8 : vector<64x32xf32>
    %cst_6 = arith.constant dense<0.000000e+00> : vector<64xf32>
    %10 = vector.multi_reduction <add>, %9, %cst_6 [1] : vector<64x32xf32> to vector<64xf32>
    %11 = vector.shape_cast %10 : vector<64xf32> to vector<64x1xf32>
    %cst_7 = arith.constant 3.200000e+01 : f32
    %12 = vector.broadcast %cst_7 : f32 to vector<64x1xf32>
    %13 = arith.divf %11, %12 : vector<64x1xf32>
    %14 = vector.broadcast %6 : vector<64x1xf32> to vector<64x32xf32>
    %15 = arith.subf %0, %14 : vector<64x32xf32>
    %cst_8 = arith.constant 9.99999974E-6 : f32
    %16 = vector.broadcast %cst_8 : f32 to vector<64x1xf32>
    %17 = arith.addf %13, %16 : vector<64x1xf32>
    %18 = math.rsqrt %17 : vector<64x1xf32>
    %19 = vector.broadcast %18 : vector<64x1xf32> to vector<64x32xf32>
    %20 = arith.mulf %15, %19 : vector<64x32xf32>
    %21 = vector.broadcast %1 : vector<1x32xf32> to vector<64x32xf32>
    %22 = arith.mulf %20, %21 : vector<64x32xf32>
    %23 = vector.broadcast %2 : vector<1x32xf32> to vector<64x32xf32>
    %24 = arith.addf %22, %23 : vector<64x32xf32>
    %25 = arith.truncf %24 : vector<64x32xf32> to vector<64x32xbf16>
    %c0_9 = arith.constant 0 : index
    %c0_10 = arith.constant 0 : index
    %26 = vector.load %arg4[%c0_9, %c0_10] : memref<32x32xbf16, #tpu.memory_space<vmem>>, vector<32x32xbf16>
    %cst_11 = arith.constant dense<0.000000e+00> : vector<64x32xf32>
    %27 = tpu.matmul %25, %26, %cst_11 {dimension_numbers = #tpu.dot_dimension_numbers<[1], [0], [0], [1], [0, 0, 1, 1], [], []>} : vector<64x32xbf16>, vector<32x32xbf16>, vector<64x32xf32> -> vector<64x32xf32>
    %c0_12 = arith.constant 0 : index
    %c0_13 = arith.constant 0 : index
    %28 = vector.load %arg5[%c0_12, %c0_13] : memref<1x32xf32, #tpu.memory_space<vmem>>, vector<1x32xf32>
    %29 = vector.broadcast %28 : vector<1x32xf32> to vector<64x32xf32>
    %30 = arith.addf %27, %29 : vector<64x32xf32>
    %c0_14 = arith.constant 0 : index
    %c0_15 = arith.constant 0 : index
    %31 = vector.load %arg6[%c0_14, %c0_15] : memref<64x32xf32, #tpu.memory_space<vmem>>, vector<64x32xf32>
    tpu.vector_store %arg6[%c0_14, %c0_15], %30 {strides = array<i32>} : memref<64x32xf32, #tpu.memory_space<vmem>>, vector<64x32xf32>,
    return
  }
  func.func @transform_0(%arg0: i32) -> (i32, i32) {
    %c0_i32 = arith.constant 0 : i32
    %c0_i32_0 = arith.constant 0 : i32
    return %arg0, %c0_i32 : i32, i32
  }
  func.func @transform_1(%arg0: i32) -> (i32, i32) {
    %c0_i32 = arith.constant 0 : i32
    %c0_i32_0 = arith.constant 0 : i32
    %c0_i32_1 = arith.constant 0 : i32
    return %c0_i32, %c0_i32_0 : i32, i32
  }
  func.func @transform_2(%arg0: i32) -> (i32, i32) {
    %c0_i32 = arith.constant 0 : i32
    %c0_i32_0 = arith.constant 0 : i32
    %c0_i32_1 = arith.constant 0 : i32
    return %c0_i32, %c0_i32_0 : i32, i32
  }
  func.func @transform_3(%arg0: i32) -> (i32, i32) {
    %c0_i32 = arith.constant 0 : i32
    %c0_i32_0 = arith.constant 0 : i32
    %c0_i32_1 = arith.constant 0 : i32
    return %c0_i32, %c0_i32_0 : i32, i32
  }
  func.func @transform_4(%arg0: i32) -> (i32, i32) {
    %c0_i32 = arith.constant 0 : i32
    %c0_i32_0 = arith.constant 0 : i32
    %c0_i32_1 = arith.constant 0 : i32
    return %c0_i32, %c0_i32_0 : i32, i32
  }
  func.func @transform_5(%arg0: i32) -> (i32, i32) {
    %c0_i32 = arith.constant 0 : i32
    %c0_i32_0 = arith.constant 0 : i32
    return %arg0, %c0_i32 : i32, i32
  }
}

module attributes {stable_mosaic.version = 11 : i64} {
  func.func @_ln_linear_kernel(%arg0: i32, %arg1: memref<64x32xf32, #tpu.memory_space<vmem>>, %arg2: memref<1x32xf32, #tpu.memory_space<vmem>>, %arg3: memref<1x32xf32, #tpu.memory_space<vmem>>, %arg4: memref<32x96xbf16, #tpu.memory_space<vmem>>, %arg5: memref<1x96xf32, #tpu.memory_space<vmem>>, %arg6: memref<64x96xbf16, #tpu.memory_space<vmem>>) attributes {dimension_semantics = [#tpu.dimension_semantics<parallel>], iteration_bounds = array<i64: 1>, scalar_prefetch = 0 : i64, scratch_operands = 0 : i64, tpu.core_type = #tpu.core_type<tc>, window_params = [{transform_indices = @transform_0, window_bounds = array<i64: 64, 32>}, {pipeline_mode = #tpu.pipeline_mode<synchronous>, transform_indices = @transform_1, window_bounds = array<i64: 1, 32>}, {pipeline_mode = #tpu.pipeline_mode<synchronous>, transform_indices = @transform_2, window_bounds = array<i64: 1, 32>}, {pipeline_mode = #tpu.pipeline_mode<synchronous>, transform_indices = @transform_3, window_bounds = array<i64: 32, 96>}, {pipeline_mode = #tpu.pipeline_mode<synchronous>, transform_indices = @transform_4, window_bounds = array<i64: 1, 96>}, {transform_indices = @transform_5, window_bounds = array<i64: 64, 96>}]} {
    %c0 = arith.constant 0 : index
    %c0_0 = arith.constant 0 : index
    %0 = vector.load %arg1[%c0, %c0_0] : memref<64x32xf32, #tpu.memory_space<vmem>>, vector<64x32xf32>
    %c0_1 = arith.constant 0 : index
    %c0_2 = arith.constant 0 : index
    %1 = vector.load %arg2[%c0_1, %c0_2] : memref<1x32xf32, #tpu.memory_space<vmem>>, vector<1x32xf32>
    %c0_3 = arith.constant 0 : index
    %c0_4 = arith.constant 0 : index
    %2 = vector.load %arg3[%c0_3, %c0_4] : memref<1x32xf32, #tpu.memory_space<vmem>>, vector<1x32xf32>
    %cst = arith.constant dense<0.000000e+00> : vector<64xf32>
    %3 = vector.multi_reduction <add>, %0, %cst [1] : vector<64x32xf32> to vector<64xf32>
    %4 = vector.shape_cast %3 : vector<64xf32> to vector<64x1xf32>
    %cst_5 = arith.constant 3.200000e+01 : f32
    %5 = vector.broadcast %cst_5 : f32 to vector<64x1xf32>
    %6 = arith.divf %4, %5 : vector<64x1xf32>
    %7 = vector.broadcast %6 : vector<64x1xf32> to vector<64x32xf32>
    %8 = arith.subf %0, %7 : vector<64x32xf32>
    %9 = arith.mulf %8, %8 : vector<64x32xf32>
    %cst_6 = arith.constant dense<0.000000e+00> : vector<64xf32>
    %10 = vector.multi_reduction <add>, %9, %cst_6 [1] : vector<64x32xf32> to vector<64xf32>
    %11 = vector.shape_cast %10 : vector<64xf32> to vector<64x1xf32>
    %cst_7 = arith.constant 3.200000e+01 : f32
    %12 = vector.broadcast %cst_7 : f32 to vector<64x1xf32>
    %13 = arith.divf %11, %12 : vector<64x1xf32>
    %14 = vector.broadcast %6 : vector<64x1xf32> to vector<64x32xf32>
    %15 = arith.subf %0, %14 : vector<64x32xf32>
    %cst_8 = arith.constant 9.99999974E-6 : f32
    %16 = vector.broadcast %cst_8 : f32 to vector<64x1xf32>
    %17 = arith.addf %13, %16 : vector<64x1xf32>
    %18 = math.rsqrt %17 : vector<64x1xf32>
    %19 = vector.broadcast %18 : vector<64x1xf32> to vector<64x32xf32>
    %20 = arith.mulf %15, %19 : vector<64x32xf32>
    %21 = vector.broadcast %1 : vector<1x32xf32> to vector<64x32xf32>
    %22 = arith.mulf %20, %21 : vector<64x32xf32>
    %23 = vector.broadcast %2 : vector<1x32xf32> to vector<64x32xf32>
    %24 = arith.addf %22, %23 : vector<64x32xf32>
    %25 = arith.truncf %24 : vector<64x32xf32> to vector<64x32xbf16>
    %c0_9 = arith.constant 0 : index
    %c0_10 = arith.constant 0 : index
    %26 = vector.load %arg4[%c0_9, %c0_10] : memref<32x96xbf16, #tpu.memory_space<vmem>>, vector<32x96xbf16>
    %cst_11 = arith.constant dense<0.000000e+00> : vector<64x96xf32>
    %27 = tpu.matmul %25, %26, %cst_11 {dimension_numbers = #tpu.dot_dimension_numbers<[1], [0], [0], [1], [0, 0, 1, 1], [], []>} : vector<64x32xbf16>, vector<32x96xbf16>, vector<64x96xf32> -> vector<64x96xf32>
    %c0_12 = arith.constant 0 : index
    %c0_13 = arith.constant 0 : index
    %28 = vector.load %arg5[%c0_12, %c0_13] : memref<1x96xf32, #tpu.memory_space<vmem>>, vector<1x96xf32>
    %29 = vector.broadcast %28 : vector<1x96xf32> to vector<64x96xf32>
    %30 = arith.addf %27, %29 : vector<64x96xf32>
    %31 = arith.truncf %30 : vector<64x96xf32> to vector<64x96xbf16>
    %c0_14 = arith.constant 0 : index
    %c0_15 = arith.constant 0 : index
    %32 = vector.load %arg6[%c0_14, %c0_15] : memref<64x96xbf16, #tpu.memory_space<vmem>>, vector<64x96xbf16>
    tpu.vector_store %arg6[%c0_14, %c0_15], %31 {strides = array<i32>} : memref<64x96xbf16, #tpu.memory_space<vmem>>, vector<64x96xbf16>,
    return
  }
  func.func @transform_0(%arg0: i32) -> (i32, i32) {
    %c0_i32 = arith.constant 0 : i32
    %c0_i32_0 = arith.constant 0 : i32
    return %arg0, %c0_i32 : i32, i32
  }
  func.func @transform_1(%arg0: i32) -> (i32, i32) {
    %c0_i32 = arith.constant 0 : i32
    %c0_i32_0 = arith.constant 0 : i32
    %c0_i32_1 = arith.constant 0 : i32
    return %c0_i32, %c0_i32_0 : i32, i32
  }
  func.func @transform_2(%arg0: i32) -> (i32, i32) {
    %c0_i32 = arith.constant 0 : i32
    %c0_i32_0 = arith.constant 0 : i32
    %c0_i32_1 = arith.constant 0 : i32
    return %c0_i32, %c0_i32_0 : i32, i32
  }
  func.func @transform_3(%arg0: i32) -> (i32, i32) {
    %c0_i32 = arith.constant 0 : i32
    %c0_i32_0 = arith.constant 0 : i32
    %c0_i32_1 = arith.constant 0 : i32
    return %c0_i32, %c0_i32_0 : i32, i32
  }
  func.func @transform_4(%arg0: i32) -> (i32, i32) {
    %c0_i32 = arith.constant 0 : i32
    %c0_i32_0 = arith.constant 0 : i32
    %c0_i32_1 = arith.constant 0 : i32
    return %c0_i32, %c0_i32_0 : i32, i32
  }
  func.func @transform_5(%arg0: i32) -> (i32, i32) {
    %c0_i32 = arith.constant 0 : i32
    %c0_i32_0 = arith.constant 0 : i32
    return %arg0, %c0_i32 : i32, i32
  }
}

module attributes {stable_mosaic.version = 11 : i64} {
  func.func @_linear_residual_kernel(%arg0: i32, %arg1: memref<64x32xf32, #tpu.memory_space<vmem>>, %arg2: memref<32x32xbf16, #tpu.memory_space<vmem>>, %arg3: memref<1x32xf32, #tpu.memory_space<vmem>>, %arg4: memref<64x32xf32, #tpu.memory_space<vmem>>, %arg5: memref<64x32xf32, #tpu.memory_space<vmem>>) attributes {dimension_semantics = [#tpu.dimension_semantics<parallel>], iteration_bounds = array<i64: 1>, scalar_prefetch = 0 : i64, scratch_operands = 0 : i64, tpu.core_type = #tpu.core_type<tc>, window_params = [{transform_indices = @transform_0, window_bounds = array<i64: 64, 32>}, {pipeline_mode = #tpu.pipeline_mode<synchronous>, transform_indices = @transform_1, window_bounds = array<i64: 32, 32>}, {pipeline_mode = #tpu.pipeline_mode<synchronous>, transform_indices = @transform_2, window_bounds = array<i64: 1, 32>}, {transform_indices = @transform_3, window_bounds = array<i64: 64, 32>}, {transform_indices = @transform_4, window_bounds = array<i64: 64, 32>}]} {
    %c0 = arith.constant 0 : index
    %c0_0 = arith.constant 0 : index
    %0 = vector.load %arg4[%c0, %c0_0] : memref<64x32xf32, #tpu.memory_space<vmem>>, vector<64x32xf32>
    %c0_1 = arith.constant 0 : index
    %c0_2 = arith.constant 0 : index
    %1 = vector.load %arg1[%c0_1, %c0_2] : memref<64x32xf32, #tpu.memory_space<vmem>>, vector<64x32xf32>
    %2 = arith.truncf %1 : vector<64x32xf32> to vector<64x32xbf16>
    %c0_3 = arith.constant 0 : index
    %c0_4 = arith.constant 0 : index
    %3 = vector.load %arg2[%c0_3, %c0_4] : memref<32x32xbf16, #tpu.memory_space<vmem>>, vector<32x32xbf16>
    %cst = arith.constant dense<0.000000e+00> : vector<64x32xf32>
    %4 = tpu.matmul %2, %3, %cst {dimension_numbers = #tpu.dot_dimension_numbers<[1], [0], [0], [1], [0, 0, 1, 1], [], []>} : vector<64x32xbf16>, vector<32x32xbf16>, vector<64x32xf32> -> vector<64x32xf32>
    %5 = arith.addf %0, %4 : vector<64x32xf32>
    %c0_5 = arith.constant 0 : index
    %c0_6 = arith.constant 0 : index
    %6 = vector.load %arg3[%c0_5, %c0_6] : memref<1x32xf32, #tpu.memory_space<vmem>>, vector<1x32xf32>
    %7 = vector.broadcast %6 : vector<1x32xf32> to vector<64x32xf32>
    %8 = arith.addf %5, %7 : vector<64x32xf32>
    %c0_7 = arith.constant 0 : index
    %c0_8 = arith.constant 0 : index
    %9 = vector.load %arg5[%c0_7, %c0_8] : memref<64x32xf32, #tpu.memory_space<vmem>>, vector<64x32xf32>
    tpu.vector_store %arg5[%c0_7, %c0_8], %8 {strides = array<i32>} : memref<64x32xf32, #tpu.memory_space<vmem>>, vector<64x32xf32>,
    return
  }
  func.func @transform_0(%arg0: i32) -> (i32, i32) {
    %c0_i32 = arith.constant 0 : i32
    %c0_i32_0 = arith.constant 0 : i32
    return %arg0, %c0_i32 : i32, i32
  }
  func.func @transform_1(%arg0: i32) -> (i32, i32) {
    %c0_i32 = arith.constant 0 : i32
    %c0_i32_0 = arith.constant 0 : i32
    %c0_i32_1 = arith.constant 0 : i32
    return %c0_i32, %c0_i32_0 : i32, i32
  }
  func.func @transform_2(%arg0: i32) -> (i32, i32) {
    %c0_i32 = arith.constant 0 : i32
    %c0_i32_0 = arith.constant 0 : i32
    %c0_i32_1 = arith.constant 0 : i32
    return %c0_i32, %c0_i32_0 : i32, i32
  }
  func.func @transform_3(%arg0: i32) -> (i32, i32) {
    %c0_i32 = arith.constant 0 : i32
    %c0_i32_0 = arith.constant 0 : i32
    return %arg0, %c0_i32 : i32, i32
  }
  func.func @transform_4(%arg0: i32) -> (i32, i32) {
    %c0_i32 = arith.constant 0 : i32
    %c0_i32_0 = arith.constant 0 : i32
    return %arg0, %c0_i32 : i32, i32
  }
}

module attributes {stable_mosaic.version = 11 : i64} {
  func.func @_ln_mlp_residual_kernel(%arg0: i32, %arg1: memref<64x32xf32, #tpu.memory_space<vmem>>, %arg2: memref<1x32xf32, #tpu.memory_space<vmem>>, %arg3: memref<1x32xf32, #tpu.memory_space<vmem>>, %arg4: memref<32x64xbf16, #tpu.memory_space<vmem>>, %arg5: memref<1x64xf32, #tpu.memory_space<vmem>>, %arg6: memref<64x32xbf16, #tpu.memory_space<vmem>>, %arg7: memref<1x32xf32, #tpu.memory_space<vmem>>, %arg8: memref<64x32xf32, #tpu.memory_space<vmem>>) attributes {dimension_semantics = [#tpu.dimension_semantics<parallel>], iteration_bounds = array<i64: 1>, scalar_prefetch = 0 : i64, scratch_operands = 0 : i64, tpu.core_type = #tpu.core_type<tc>, window_params = [{transform_indices = @transform_0, window_bounds = array<i64: 64, 32>}, {pipeline_mode = #tpu.pipeline_mode<synchronous>, transform_indices = @transform_1, window_bounds = array<i64: 1, 32>}, {pipeline_mode = #tpu.pipeline_mode<synchronous>, transform_indices = @transform_2, window_bounds = array<i64: 1, 32>}, {pipeline_mode = #tpu.pipeline_mode<synchronous>, transform_indices = @transform_3, window_bounds = array<i64: 32, 64>}, {pipeline_mode = #tpu.pipeline_mode<synchronous>, transform_indices = @transform_4, window_bounds = array<i64: 1, 64>}, {pipeline_mode = #tpu.pipeline_mode<synchronous>, transform_indices = @transform_5, window_bounds = array<i64: 64, 32>}, {pipeline_mode = #tpu.pipeline_mode<synchronous>, transform_indices = @transform_6, window_bounds = array<i64: 1, 32>}, {transform_indices = @transform_7, window_bounds = array<i64: 64, 32>}]} {
    %c0 = arith.constant 0 : index
    %c0_0 = arith.constant 0 : index
    %0 = vector.load %arg1[%c0, %c0_0] : memref<64x32xf32, #tpu.memory_space<vmem>>, vector<64x32xf32>
    %c0_1 = arith.constant 0 : index
    %c0_2 = arith.constant 0 : index
    %1 = vector.load %arg2[%c0_1, %c0_2] : memref<1x32xf32, #tpu.memory_space<vmem>>, vector<1x32xf32>
    %c0_3 = arith.constant 0 : index
    %c0_4 = arith.constant 0 : index
    %2 = vector.load %arg3[%c0_3, %c0_4] : memref<1x32xf32, #tpu.memory_space<vmem>>, vector<1x32xf32>
    %cst = arith.constant dense<0.000000e+00> : vector<64xf32>
    %3 = vector.multi_reduction <add>, %0, %cst [1] : vector<64x32xf32> to vector<64xf32>
    %4 = vector.shape_cast %3 : vector<64xf32> to vector<64x1xf32>
    %cst_5 = arith.constant 3.200000e+01 : f32
    %5 = vector.broadcast %cst_5 : f32 to vector<64x1xf32>
    %6 = arith.divf %4, %5 : vector<64x1xf32>
    %7 = vector.broadcast %6 : vector<64x1xf32> to vector<64x32xf32>
    %8 = arith.subf %0, %7 : vector<64x32xf32>
    %9 = arith.mulf %8, %8 : vector<64x32xf32>
    %cst_6 = arith.constant dense<0.000000e+00> : vector<64xf32>
    %10 = vector.multi_reduction <add>, %9, %cst_6 [1] : vector<64x32xf32> to vector<64xf32>
    %11 = vector.shape_cast %10 : vector<64xf32> to vector<64x1xf32>
    %cst_7 = arith.constant 3.200000e+01 : f32
    %12 = vector.broadcast %cst_7 : f32 to vector<64x1xf32>
    %13 = arith.divf %11, %12 : vector<64x1xf32>
    %14 = vector.broadcast %6 : vector<64x1xf32> to vector<64x32xf32>
    %15 = arith.subf %0, %14 : vector<64x32xf32>
    %cst_8 = arith.constant 9.99999974E-6 : f32
    %16 = vector.broadcast %cst_8 : f32 to vector<64x1xf32>
    %17 = arith.addf %13, %16 : vector<64x1xf32>
    %18 = math.rsqrt %17 : vector<64x1xf32>
    %19 = vector.broadcast %18 : vector<64x1xf32> to vector<64x32xf32>
    %20 = arith.mulf %15, %19 : vector<64x32xf32>
    %21 = vector.broadcast %1 : vector<1x32xf32> to vector<64x32xf32>
    %22 = arith.mulf %20, %21 : vector<64x32xf32>
    %23 = vector.broadcast %2 : vector<1x32xf32> to vector<64x32xf32>
    %24 = arith.addf %22, %23 : vector<64x32xf32>
    %25 = arith.truncf %24 : vector<64x32xf32> to vector<64x32xbf16>
    %c0_9 = arith.constant 0 : index
    %c0_10 = arith.constant 0 : index
    %26 = vector.load %arg4[%c0_9, %c0_10] : memref<32x64xbf16, #tpu.memory_space<vmem>>, vector<32x64xbf16>
    %cst_11 = arith.constant dense<0.000000e+00> : vector<64x64xf32>
    %27 = tpu.matmul %25, %26, %cst_11 {dimension_numbers = #tpu.dot_dimension_numbers<[1], [0], [0], [1], [0, 0, 1, 1], [], []>} : vector<64x32xbf16>, vector<32x64xbf16>, vector<64x64xf32> -> vector<64x64xf32>
    %c0_12 = arith.constant 0 : index
    %c0_13 = arith.constant 0 : index
    %28 = vector.load %arg5[%c0_12, %c0_13] : memref<1x64xf32, #tpu.memory_space<vmem>>, vector<1x64xf32>
    %29 = vector.broadcast %28 : vector<1x64xf32> to vector<64x64xf32>
    %30 = arith.addf %27, %29 : vector<64x64xf32>
    %cst_14 = arith.constant 5.000000e-01 : f32
    %31 = vector.broadcast %cst_14 : f32 to vector<64x64xf32>
    %32 = arith.mulf %31, %30 : vector<64x64xf32>
    %cst_15 = arith.constant 0.707106769 : f32
    %33 = vector.broadcast %cst_15 : f32 to vector<64x64xf32>
    %34 = arith.mulf %30, %33 : vector<64x64xf32>
    %cst_16 = arith.constant 0.000000e+00 : f32
    %35 = vector.broadcast %cst_16 : f32 to vector<64x64xf32>
    %36 = arith.cmpf olt, %34, %35 : vector<64x64xf32>
    %cst_17 = arith.constant -1.000000e+00 : f32
    %cst_18 = arith.constant 1.000000e+00 : f32
    %37 = vector.broadcast %cst_17 : f32 to vector<64x64xf32>
    %38 = vector.broadcast %cst_18 : f32 to vector<64x64xf32>
    %39 = arith.select %36, %37, %38 : vector<64x64xi1>, vector<64x64xf32>
    %40 = math.absf %34 : vector<64x64xf32>
    %cst_19 = arith.constant 0.327591091 : f32
    %41 = vector.broadcast %cst_19 : f32 to vector<64x64xf32>
    %42 = arith.mulf %41, %40 : vector<64x64xf32>
    %cst_20 = arith.constant 1.000000e+00 : f32
    %43 = vector.broadcast %cst_20 : f32 to vector<64x64xf32>
    %44 = arith.addf %43, %42 : vector<64x64xf32>
    %cst_21 = arith.constant 1.000000e+00 : f32
    %45 = vector.broadcast %cst_21 : f32 to vector<64x64xf32>
    %46 = arith.divf %45, %44 : vector<64x64xf32>
    %cst_22 = arith.constant 1.06140542 : f32
    %47 = vector.broadcast %cst_22 : f32 to vector<64x64xf32>
    %48 = arith.mulf %47, %46 : vector<64x64xf32>
    %cst_23 = arith.constant -1.45315206 : f32
    %49 = vector.broadcast %cst_23 : f32 to vector<64x64xf32>
    %50 = arith.addf %48, %49 : vector<64x64xf32>
    %51 = arith.mulf %50, %46 : vector<64x64xf32>
    %cst_24 = arith.constant 1.42141378 : f32
    %52 = vector.broadcast %cst_24 : f32 to vector<64x64xf32>
    %53 = arith.addf %51, %52 : vector<64x64xf32>
    %54 = arith.mulf %53, %46 : vector<64x64xf32>
    %cst_25 = arith.constant -0.284496725 : f32
    %55 = vector.broadcast %cst_25 : f32 to vector<64x64xf32>
    %56 = arith.addf %54, %55 : vector<64x64xf32>
    %57 = arith.mulf %56, %46 : vector<64x64xf32>
    %cst_26 = arith.constant 0.254829586 : f32
    %58 = vector.broadcast %cst_26 : f32 to vector<64x64xf32>
    %59 = arith.addf %57, %58 : vector<64x64xf32>
    %60 = arith.mulf %59, %46 : vector<64x64xf32>
    %cst_27 = arith.constant 0.000000e+00 : f32
    %61 = vector.broadcast %cst_27 : f32 to vector<64x64xf32>
    %62 = arith.subf %61, %40 : vector<64x64xf32>
    %63 = arith.mulf %62, %40 : vector<64x64xf32>
    %64 = math.exp %63 : vector<64x64xf32>
    %65 = arith.mulf %60, %64 : vector<64x64xf32>
    %cst_28 = arith.constant 1.000000e+00 : f32
    %66 = vector.broadcast %cst_28 : f32 to vector<64x64xf32>
    %67 = arith.subf %66, %65 : vector<64x64xf32>
    %68 = arith.mulf %39, %67 : vector<64x64xf32>
    %cst_29 = arith.constant 1.000000e+00 : f32
    %69 = vector.broadcast %cst_29 : f32 to vector<64x64xf32>
    %70 = arith.addf %69, %68 : vector<64x64xf32>
    %71 = arith.mulf %32, %70 : vector<64x64xf32>
    %72 = arith.truncf %71 : vector<64x64xf32> to vector<64x64xbf16>
    %c0_30 = arith.constant 0 : index
    %c0_31 = arith.constant 0 : index
    %73 = vector.load %arg6[%c0_30, %c0_31] : memref<64x32xbf16, #tpu.memory_space<vmem>>, vector<64x32xbf16>
    %cst_32 = arith.constant dense<0.000000e+00> : vector<64x32xf32>
    %74 = tpu.matmul %72, %73, %cst_32 {dimension_numbers = #tpu.dot_dimension_numbers<[1], [0], [0], [1], [0, 0, 1, 1], [], []>} : vector<64x64xbf16>, vector<64x32xbf16>, vector<64x32xf32> -> vector<64x32xf32>
    %c0_33 = arith.constant 0 : index
    %c0_34 = arith.constant 0 : index
    %75 = vector.load %arg7[%c0_33, %c0_34] : memref<1x32xf32, #tpu.memory_space<vmem>>, vector<1x32xf32>
    %76 = vector.broadcast %75 : vector<1x32xf32> to vector<64x32xf32>
    %77 = arith.addf %74, %76 : vector<64x32xf32>
    %78 = arith.addf %0, %77 : vector<64x32xf32>
    %c0_35 = arith.constant 0 : index
    %c0_36 = arith.constant 0 : index
    %79 = vector.load %arg8[%c0_35, %c0_36] : memref<64x32xf32, #tpu.memory_space<vmem>>, vector<64x32xf32>
    tpu.vector_store %arg8[%c0_35, %c0_36], %78 {strides = array<i32>} : memref<64x32xf32, #tpu.memory_space<vmem>>, vector<64x32xf32>,
    return
  }
  func.func @transform_0(%arg0: i32) -> (i32, i32) {
    %c0_i32 = arith.constant 0 : i32
    %c0_i32_0 = arith.constant 0 : i32
    return %arg0, %c0_i32 : i32, i32
  }
  func.func @transform_1(%arg0: i32) -> (i32, i32) {
    %c0_i32 = arith.constant 0 : i32
    %c0_i32_0 = arith.constant 0 : i32
    %c0_i32_1 = arith.constant 0 : i32
    return %c0_i32, %c0_i32_0 : i32, i32
  }
  func.func @transform_2(%arg0: i32) -> (i32, i32) {
    %c0_i32 = arith.constant 0 : i32
    %c0_i32_0 = arith.constant 0 : i32
    %c0_i32_1 = arith.constant 0 : i32
    return %c0_i32, %c0_i32_0 : i32, i32
  }
  func.func @transform_3(%arg0: i32) -> (i32, i32) {
    %c0_i32 = arith.constant 0 : i32
    %c0_i32_0 = arith.constant 0 : i32
    %c0_i32_1 = arith.constant 0 : i32
    return %c0_i32, %c0_i32_0 : i32, i32
  }
  func.func @transform_4(%arg0: i32) -> (i32, i32) {
    %c0_i32 = arith.constant 0 : i32
    %c0_i32_0 = arith.constant 0 : i32
    %c0_i32_1 = arith.constant 0 : i32
    return %c0_i32, %c0_i32_0 : i32, i32
  }
  func.func @transform_5(%arg0: i32) -> (i32, i32) {
    %c0_i32 = arith.constant 0 : i32
    %c0_i32_0 = arith.constant 0 : i32
    %c0_i32_1 = arith.constant 0 : i32
    return %c0_i32, %c0_i32_0 : i32, i32
  }
  func.func @transform_6(%arg0: i32) -> (i32, i32) {
    %c0_i32 = arith.constant 0 : i32
    %c0_i32_0 = arith.constant 0 : i32
    %c0_i32_1 = arith.constant 0 : i32
    return %c0_i32, %c0_i32_0 : i32, i32
  }
  func.func @transform_7(%arg0: i32) -> (i32, i32) {
    %c0_i32 = arith.constant 0 : i32
    %c0_i32_0 = arith.constant 0 : i32
    return %arg0, %c0_i32 : i32, i32
  }
}

module attributes {stable_mosaic.version = 11 : i64} {
  func.func @_head_kernel(%arg0: memref<2x32x32xf32, #tpu.memory_space<vmem>>, %arg1: memref<1x1x32xf32, #tpu.memory_space<vmem>>, %arg2: memref<1x1x32xf32, #tpu.memory_space<vmem>>, %arg3: memref<32x4xbf16, #tpu.memory_space<vmem>>, %arg4: memref<1x4xf32, #tpu.memory_space<vmem>>, %arg5: memref<32x4xbf16, #tpu.memory_space<vmem>>, %arg6: memref<1x4xf32, #tpu.memory_space<vmem>>, %arg7: memref<2x4xf32, #tpu.memory_space<vmem>>, %arg8: memref<2x4xf32, #tpu.memory_space<vmem>>) attributes {dimension_semantics = [], scalar_prefetch = 0 : i64, scratch_operands = 0 : i64, tpu.core_type = #tpu.core_type<tc>} {
    %c0 = arith.constant 0 : index
    %c0_0 = arith.constant 0 : index
    %c0_1 = arith.constant 0 : index
    %0 = vector.load %arg0[%c0, %c0_0, %c0_1] : memref<2x32x32xf32, #tpu.memory_space<vmem>>, vector<2x32x32xf32>
    %c0_2 = arith.constant 0 : index
    %c0_3 = arith.constant 0 : index
    %c0_4 = arith.constant 0 : index
    %1 = vector.load %arg1[%c0_2, %c0_3, %c0_4] : memref<1x1x32xf32, #tpu.memory_space<vmem>>, vector<1x1x32xf32>
    %c0_5 = arith.constant 0 : index
    %c0_6 = arith.constant 0 : index
    %c0_7 = arith.constant 0 : index
    %2 = vector.load %arg2[%c0_5, %c0_6, %c0_7] : memref<1x1x32xf32, #tpu.memory_space<vmem>>, vector<1x1x32xf32>
    %cst = arith.constant dense<0.000000e+00> : vector<2x32xf32>
    %3 = vector.multi_reduction <add>, %0, %cst [2] : vector<2x32x32xf32> to vector<2x32xf32>
    %4 = vector.shape_cast %3 : vector<2x32xf32> to vector<2x32x1xf32>
    %cst_8 = arith.constant 3.200000e+01 : f32
    %5 = vector.broadcast %cst_8 : f32 to vector<2x32x1xf32>
    %6 = arith.divf %4, %5 : vector<2x32x1xf32>
    %7 = vector.broadcast %6 : vector<2x32x1xf32> to vector<2x32x32xf32>
    %8 = arith.subf %0, %7 : vector<2x32x32xf32>
    %9 = arith.mulf %8, %8 : vector<2x32x32xf32>
    %cst_9 = arith.constant dense<0.000000e+00> : vector<2x32xf32>
    %10 = vector.multi_reduction <add>, %9, %cst_9 [2] : vector<2x32x32xf32> to vector<2x32xf32>
    %11 = vector.shape_cast %10 : vector<2x32xf32> to vector<2x32x1xf32>
    %cst_10 = arith.constant 3.200000e+01 : f32
    %12 = vector.broadcast %cst_10 : f32 to vector<2x32x1xf32>
    %13 = arith.divf %11, %12 : vector<2x32x1xf32>
    %14 = vector.broadcast %6 : vector<2x32x1xf32> to vector<2x32x32xf32>
    %15 = arith.subf %0, %14 : vector<2x32x32xf32>
    %cst_11 = arith.constant 9.99999974E-6 : f32
    %16 = vector.broadcast %cst_11 : f32 to vector<2x32x1xf32>
    %17 = arith.addf %13, %16 : vector<2x32x1xf32>
    %18 = math.rsqrt %17 : vector<2x32x1xf32>
    %19 = vector.broadcast %18 : vector<2x32x1xf32> to vector<2x32x32xf32>
    %20 = arith.mulf %15, %19 : vector<2x32x32xf32>
    %21 = vector.broadcast %1 : vector<1x1x32xf32> to vector<2x32x32xf32>
    %22 = arith.mulf %20, %21 : vector<2x32x32xf32>
    %23 = vector.broadcast %2 : vector<1x1x32xf32> to vector<2x32x32xf32>
    %24 = arith.addf %22, %23 : vector<2x32x32xf32>
    %cst_12 = arith.constant dense<0.000000e+00> : vector<2x32xf32>
    %25 = vector.multi_reduction <add>, %24, %cst_12 [1] : vector<2x32x32xf32> to vector<2x32xf32>
    %cst_13 = arith.constant 3.200000e+01 : f32
    %26 = vector.broadcast %cst_13 : f32 to vector<2x32xf32>
    %27 = arith.divf %25, %26 : vector<2x32xf32>
    %28 = arith.truncf %27 : vector<2x32xf32> to vector<2x32xbf16>
    %c0_14 = arith.constant 0 : index
    %c0_15 = arith.constant 0 : index
    %29 = vector.load %arg3[%c0_14, %c0_15] : memref<32x4xbf16, #tpu.memory_space<vmem>>, vector<32x4xbf16>
    %cst_16 = arith.constant dense<0.000000e+00> : vector<2x4xf32>
    %30 = tpu.matmul %28, %29, %cst_16 {dimension_numbers = #tpu.dot_dimension_numbers<[1], [0], [0], [1], [0, 0, 1, 1], [], []>} : vector<2x32xbf16>, vector<32x4xbf16>, vector<2x4xf32> -> vector<2x4xf32>
    %c0_17 = arith.constant 0 : index
    %c0_18 = arith.constant 0 : index
    %31 = vector.load %arg4[%c0_17, %c0_18] : memref<1x4xf32, #tpu.memory_space<vmem>>, vector<1x4xf32>
    %32 = vector.broadcast %31 : vector<1x4xf32> to vector<2x4xf32>
    %33 = arith.addf %30, %32 : vector<2x4xf32>
    %c0_19 = arith.constant 0 : index
    %c0_20 = arith.constant 0 : index
    %34 = vector.load %arg7[%c0_19, %c0_20] : memref<2x4xf32, #tpu.memory_space<vmem>>, vector<2x4xf32>
    tpu.vector_store %arg7[%c0_19, %c0_20], %33 {strides = array<i32>} : memref<2x4xf32, #tpu.memory_space<vmem>>, vector<2x4xf32>,
    %c0_21 = arith.constant 0 : index
    %c0_22 = arith.constant 0 : index
    %35 = vector.load %arg5[%c0_21, %c0_22] : memref<32x4xbf16, #tpu.memory_space<vmem>>, vector<32x4xbf16>
    %cst_23 = arith.constant dense<0.000000e+00> : vector<2x4xf32>
    %36 = tpu.matmul %28, %35, %cst_23 {dimension_numbers = #tpu.dot_dimension_numbers<[1], [0], [0], [1], [0, 0, 1, 1], [], []>} : vector<2x32xbf16>, vector<32x4xbf16>, vector<2x4xf32> -> vector<2x4xf32>
    %c0_24 = arith.constant 0 : index
    %c0_25 = arith.constant 0 : index
    %37 = vector.load %arg6[%c0_24, %c0_25] : memref<1x4xf32, #tpu.memory_space<vmem>>, vector<1x4xf32>
    %38 = vector.broadcast %37 : vector<1x4xf32> to vector<2x4xf32>
    %39 = arith.addf %36, %38 : vector<2x4xf32>
    %c0_26 = arith.constant 0 : index
    %c0_27 = arith.constant 0 : index
    %40 = vector.load %arg8[%c0_26, %c0_27] : memref<2x4xf32, #tpu.memory_space<vmem>>, vector<2x4xf32>
    tpu.vector_store %arg8[%c0_26, %c0_27], %39 {strides = array<i32>} : memref<2x4xf32, #tpu.memory_space<vmem>>, vector<2x4xf32>,
    return
  }
}

</mosaic_0001>

<bundles_post_ra>
// kernel: _lambda_.19
= control target key start
LH: loop header
LB: loop body
LE: loop exit
PB: predicated region body
PF: predicated region fallthrough
CT: control target
= control target key end

     0   :  { %vm54_vm0 = vcmask 130048   ;;  %s382_s1 = inlined_call_operand.vmem [shape: bf16[16,16], index: 1, kind: input, shape index: {}]   ;;  %s383_s0 = inlined_call_operand.vmem [shape: f32[128,16], index: 0, kind: input, shape index: {}]   ;;  %s384_s2 = inlined_call_operand.vmem [shape: f32[1,16], index: 2, kind: input, shape index: {}]   ;;  %s385_s3 = inlined_call_operand.vmem [shape: f32[128,16], index: 3, kind: output, shape index: {}]  }
   0x1   :  { %v235_v0 = vld [vmem:[%s382_s1] sm:$0xff]   ;;  %v16_v2 = vld [vmem:[%s383_s0 + $0x8] sm:$0xff]  ;;  %v17_v6 = vld [vmem:[%s383_s0 + $0x10] sm:$0xff] }
   0x2   :  { %v15_v1 = vld [vmem:[%s383_s0] sm:$0xff]  ;;  %215 = vmatprep.subr.bf16.mxu0 %v235_v0  ;;  %233 = vmatprep.subr.bf16.mxu1 %v235_v0  ;;  %v24_v5 = vld [vmem:[%s383_s0 + $0x48] sm:$0xff]  ;;  %v18_v7 = vld [vmem:[%s383_s0 + $0x18] sm:$0xff] }
   0x3   :  { %v23_v3 = vld [vmem:[%s383_s0 + $0x40] sm:$0xff]  ;;  %v31_v4 = vpack.c.bf16 %v16_v2, %v15_v1  ;;  %216 = vmatpush3.bf16.msra.mxu0 %v235_v0  ;;  %234 = vmatpush3.bf16.msra.mxu1 %v235_v0  ;;  %v32_v9 = vpack.c.bf16 %v18_v7, %v17_v6  ;;  %v25_v10 = vld [vmem:[%s383_s0 + $0x50] sm:$0xff]  ;;  %v26_v11 = vld [vmem:[%s383_s0 + $0x58] sm:$0xff] }
   0x4   :  { %v35_v8 = vpack.c.bf16 %v24_v5, %v23_v3  ;;  %v19_v12 = vld [vmem:[%s383_s0 + $0x20] sm:$0xff]  ;;  %v36_v13 = vpack.c.bf16 %v26_v11, %v25_v10  ;;  %v20_v14 = vld [vmem:[%s383_s0 + $0x28] sm:$0xff]  ;;  %v21_v19 = vld [vmem:[%s383_s0 + $0x30] sm:$0xff] }
   0x5   :  { %217 = vmatprep.mubr.msk.bf16.mxu0 %vm54_vm0, %v31_v4  ;;  %v27_v15 = vld [vmem:[%s383_s0 + $0x60] sm:$0xff]  ;;  %v28_v16 = vld [vmem:[%s383_s0 + $0x68] sm:$0xff]  ;;  %v33_v17 = vpack.c.bf16 %v20_v14, %v19_v12  ;;  %v22_v20 = vld [vmem:[%s383_s0 + $0x38] sm:$0xff] }
   0x6   :  { %225 = vmatprep.mubr.msk.bf16.mxu1 %vm54_vm0, %v35_v8  ;;  %v37_v18 = vpack.c.bf16 %v28_v16, %v27_v15  ;;  %218 = vmatmul.mubr.msk.bf16.vlgmr.msra.gmra.mxu0 %vm54_vm0, %v32_v9  ;;  %v29_v21 = vld [vmem:[%s383_s0 + $0x70] sm:$0xff]  ;;  %v30_v22 = vld [vmem:[%s383_s0 + $0x78] sm:$0xff]  ;;  %v34_v23 = vpack.c.bf16 %v22_v20, %v21_v19  ;;  %v196_v25 = vld [vmem:[%s384_s2] ss:$0 sm:$0xff] }
   0x7   :  { %226 = vmatmul.mubr.msk.bf16.vlgmr.msra.gmra.mxu1 %vm54_vm0, %v36_v13  ;;  %221 = vmatprep.mubr.msk.bf16.mxu0 %vm54_vm0, %v33_v17  ;;  %v38_v24 = vpack.c.bf16 %v30_v22, %v29_v21 }
   0x8   :  { %229 = vmatprep.mubr.msk.bf16.mxu1 %vm54_vm0, %v37_v18 }
   0xe   :  { %222 = vmatmul.mubr.msk.bf16.gmra.mxu0 %vm54_vm0, %v34_v23 }
   0xf   :  { %230 = vmatmul.mubr.msk.bf16.gmra.mxu1 %vm54_vm0, %v38_v24 }
  0xc6   :  { %v219_v26 = vpop.f32.mrf.mxu0 }
  0xc7   :  { %v227_v27 = vpop.f32.mrf.mxu1  ;;  %v122_v28 = vadd.f32 %v219_v26, %v196_v25 }
  0xc8   :  { %v154_v29 = vadd.f32 %v227_v27, %v196_v25  ;;  %v113_v30 = vpop.f32.mrf.mxu0 }
  0xc9   :  { %v145_v31 = vpop.f32.mrf.mxu1  ;;  %178 = vst.msk [vmem:[%s385_s3 + $0x10] sm:$0xff] %vm54_vm0, %v122_v28  ;;  %v114_v32 = vadd.f32 %v196_v25, %v113_v30 }
  0xca   :  { %186 = vst.msk [vmem:[%s385_s3 + $0x50] sm:$0xff] %vm54_vm0, %v154_v29  ;;  %v146_v33 = vadd.f32 %v196_v25, %v145_v31  ;;  %v220_v34 = vpop.f32.mrf.mxu0 }
  0xcb   :  { %v228_v35 = vpop.f32.mrf.mxu1  ;;  %176 = vst.msk [vmem:[%s385_s3] sm:$0xff] %vm54_vm0, %v114_v32  ;;  %v125_v36 = vadd.f32 %v220_v34, %v196_v25 }
  0xcc   :  { %184 = vst.msk [vmem:[%s385_s3 + $0x40] sm:$0xff] %vm54_vm0, %v146_v33  ;;  %v157_v37 = vadd.f32 %v228_v35, %v196_v25  ;;  %v116_v38 = vpop.f32.mrf.mxu0 }
  0xcd   :  { %v148_v39 = vpop.f32.mrf.mxu1  ;;  %179 = vst.msk [vmem:[%s385_s3 + $0x18] sm:$0xff] %vm54_vm0, %v125_v36  ;;  %v117_v40 = vadd.f32 %v196_v25, %v116_v38 }
  0xce   :  { %187 = vst.msk [vmem:[%s385_s3 + $0x58] sm:$0xff] %vm54_vm0, %v157_v37  ;;  %v149_v41 = vadd.f32 %v196_v25, %v148_v39  ;;  %v223_v42 = vpop.f32.mrf.mxu0 }
  0xcf   :  { %v231_v43 = vpop.f32.mrf.mxu1  ;;  %177 = vst.msk [vmem:[%s385_s3 + $0x8] sm:$0xff] %vm54_vm0, %v117_v40  ;;  %v138_v44 = vadd.f32 %v223_v42, %v196_v25 }
  0xd0   :  { %185 = vst.msk [vmem:[%s385_s3 + $0x48] sm:$0xff] %vm54_vm0, %v149_v41  ;;  %v170_v45 = vadd.f32 %v231_v43, %v196_v25  ;;  %v129_v46 = vpop.f32.mrf.mxu0 }
  0xd1   :  { %v161_v47 = vpop.f32.mrf.mxu1  ;;  %182 = vst.msk [vmem:[%s385_s3 + $0x30] sm:$0xff] %vm54_vm0, %v138_v44  ;;  %v130_v48 = vadd.f32 %v196_v25, %v129_v46 }
  0xd2   :  { %190 = vst.msk [vmem:[%s385_s3 + $0x70] sm:$0xff] %vm54_vm0, %v170_v45  ;;  %v162_v49 = vadd.f32 %v196_v25, %v161_v47  ;;  %v224_v50 = vpop.f32.mrf.mxu0 }
  0xd3   :  { %v232_v51 = vpop.f32.mrf.mxu1  ;;  %180 = vst.msk [vmem:[%s385_s3 + $0x20] sm:$0xff] %vm54_vm0, %v130_v48  ;;  %v141_v52 = vadd.f32 %v224_v50, %v196_v25 }
  0xd4   :  { %188 = vst.msk [vmem:[%s385_s3 + $0x60] sm:$0xff] %vm54_vm0, %v162_v49  ;;  %v173_v53 = vadd.f32 %v232_v51, %v196_v25  ;;  %v132_v54 = vpop.f32.mrf.mxu0 }
  0xd5   :  { %v164_v55 = vpop.f32.mrf.mxu1  ;;  %183 = vst.msk [vmem:[%s385_s3 + $0x38] sm:$0xff] %vm54_vm0, %v141_v52  ;;  %v133_v56 = vadd.f32 %v196_v25, %v132_v54 }
  0xd6   :  { %191 = vst.msk [vmem:[%s385_s3 + $0x78] sm:$0xff] %vm54_vm0, %v173_v53  ;;  %v165_v57 = vadd.f32 %v196_v25, %v164_v55 }
  0xd7   :  { %181 = vst.msk [vmem:[%s385_s3 + $0x28] sm:$0xff] %vm54_vm0, %v133_v56 }
  0xd8   :  { %189 = vst.msk [vmem:[%s385_s3 + $0x68] sm:$0xff] %vm54_vm0, %v165_v57 }

// kernel: _lambda_.20
= control target key start
LH: loop header
LB: loop body
LE: loop exit
PB: predicated region body
PF: predicated region fallthrough
CT: control target
= control target key end

     0   :  { %vm39_vm0 = vcmask 130048   ;;  %vm501_vm1 = vcmask 388096   ;;  %s996_s0 = inlined_call_operand.vmem [shape: f32[128,16], index: 0, kind: input, shape index: {}]   ;;  %s997_s3 = inlined_call_operand.vmem [shape: bf16[16,48], index: 3, kind: input, shape index: {}]   ;;  %s998_s1 = inlined_call_operand.vmem [shape: f32[1,16], index: 1, kind: input, shape index: {}]   ;;  %s999_s2 = inlined_call_operand.vmem [shape: f32[1,16], index: 2, kind: input, shape index: {}]   ;;  %s1000_s4 = inlined_call_operand.vmem [shape: f32[1,48], index: 4, kind: input, shape index: {}]   ;;  %s1001_s5 = inlined_call_operand.vmem [shape: bf16[128,48], index: 5, kind: output, shape index: {}]  }
   0x1   :  { %v21_v0 = vld [vmem:[%s996_s0] sm:$0xff]  ;;  %v22_v2 = vld [vmem:[%s996_s0 + $0x8] sm:$0xff]  ;;  %v23_v8 = vld [vmem:[%s996_s0 + $0x10] sm:$0xff] }
   0x2   :  { %v29_v1 = vld [vmem:[%s996_s0 + $0x40] sm:$0xff]  ;;  %v40_v3 = vsel %vm39_vm0, %v21_v0, 0.0  ;;  %v30_v5 = vld [vmem:[%s996_s0 + $0x48] sm:$0xff]  ;;  %v43_v6 = vsel %vm39_vm0, %v22_v2, 0.0  ;;  %v24_v9 = vld [vmem:[%s996_s0 + $0x18] sm:$0xff]  ;;  %v46_v10 = vsel %vm39_vm0, %v23_v8, 0.0 }
   0x3   :  { %v64_v4 = vsel %vm39_vm0, %v29_v1, 0.0  ;;  %41 = vadd.xlane.f32.xlu0 %v40_v3  ;;  %v67_v7 = vsel %vm39_vm0, %v30_v5, 0.0  ;;  %v49_v11 = vsel %vm39_vm0, %v24_v9, 0.0  ;;  %v685_v12 = vld [vmem:[%s996_s0 + $0x50] sm:$0xff]  ;;  %v690_v13 = vld [vmem:[%s996_s0 + $0x58] sm:$0xff]  ;;  %v699_v16 = vld [vmem:[%s996_s0 + $0x20] sm:$0xff] }
   0x4   :  { %65 = vadd.xlane.f32.xlu1 %v64_v4  ;;  %v70_v14 = vsel %vm39_vm0, %v685_v12, 0.0  ;;  %v73_v15 = vsel %vm39_vm0, %v690_v13, 0.0  ;;  %v704_v17 = vld [vmem:[%s996_s0 + $0x28] sm:$0xff]  ;;  %v52_v18 = vsel %vm39_vm0, %v699_v16, 0.0  ;;  %v713_v20 = vld [vmem:[%s996_s0 + $0x60] sm:$0xff]  ;;  %v727_v24 = vld [vmem:[%s996_s0 + $0x30] sm:$0xff] }
   0x5   :  { %v55_v19 = vsel %vm39_vm0, %v704_v17, 0.0  ;;  %v718_v21 = vld [vmem:[%s996_s0 + $0x68] sm:$0xff]  ;;  %v76_v22 = vsel %vm39_vm0, %v713_v20, 0.0  ;;  %v732_v25 = vld [vmem:[%s996_s0 + $0x38] sm:$0xff]  ;;  %v58_v26 = vsel %vm39_vm0, %v727_v24, 0.0  ;;  %v741_v28 = vld [vmem:[%s996_s0 + $0x70] sm:$0xff] }
   0x6   :  { %v79_v23 = vsel %vm39_vm0, %v718_v21, 0.0  ;;  %v61_v27 = vsel %vm39_vm0, %v732_v25, 0.0  ;;  %v746_v29 = vld [vmem:[%s996_s0 + $0x78] sm:$0xff]  ;;  %v82_v30 = vsel %vm39_vm0, %v741_v28, 0.0 }
   0x7   :  { %44 = vadd.xlane.f32.xlu0 %v43_v6  ;;  %v85_v31 = vsel %vm39_vm0, %v746_v29, 0.0 }
   0x8   :  { %68 = vadd.xlane.f32.xlu1 %v67_v7 }
   0xb   :  { %47 = vadd.xlane.f32.xlu0 %v46_v10 }
   0xc   :  { %50 = vadd.xlane.f32.xlu1 %v49_v11 }
   0xf   :  { %71 = vadd.xlane.f32.xlu0 %v70_v14 }
  0x10   :  { %74 = vadd.xlane.f32.xlu1 %v73_v15 }
  0x13   :  { %53 = vadd.xlane.f32.xlu0 %v52_v18 }
  0x14   :  { %56 = vadd.xlane.f32.xlu1 %v55_v19 }
  0x17   :  { %77 = vadd.xlane.f32.xlu0 %v76_v22 }
  0x18   :  { %80 = vadd.xlane.f32.xlu1 %v79_v23 }
  0x1b   :  { %59 = vadd.xlane.f32.xlu0 %v58_v26 }
  0x1c   :  { %62 = vadd.xlane.f32.xlu1 %v61_v27 }
  0x1f   :  { %83 = vadd.xlane.f32.xlu0 %v82_v30 }
  0x20   :  { %86 = vadd.xlane.f32.xlu1 %v85_v31 }
  0x8c   :  { %v42_v32 = vpop.xlane.xlu0 %41 }
  0x8d   :  { %v66_v33 = vpop.xlane.xlu1 %65  ;;  %v89_v34 = vmul.f32 0.0625, %v42_v32 }
  0x8e   :  { %v97_v35 = vmul.f32 0.0625, %v66_v33 }
  0x8f   :  { %v752_v36 = vsub.f32 %v21_v0, %v89_v34 }
  0x90   :  { %v754_v37 = vsub.f32 %v29_v1, %v97_v35  ;;  %v45_v38 = vpop.xlane.xlu0 %44 }
  0x91   :  { %v69_v39 = vpop.xlane.xlu1 %68  ;;  %v90_v40 = vmul.f32 0.0625, %v45_v38  ;;  %v121_v42 = vmul.f32 %v752_v36, %v752_v36 }
  0x92   :  { %v98_v41 = vmul.f32 0.0625, %v69_v39  ;;  %v129_v43 = vmul.f32 %v754_v37, %v754_v37 }
  0x93   :  { %v760_v44 = vsub.f32 %v22_v2, %v90_v40  ;;  %v137_v46 = vsel %vm39_vm0, %v121_v42, 0.0 }
  0x94   :  { %v762_v45 = vsub.f32 %v30_v5, %v98_v41  ;;  %138 = vadd.xlane.f32.xlu0 %v137_v46  ;;  %v48_v47 = vpop.xlane.xlu0 %47  ;;  %v161_v49 = vsel %vm39_vm0, %v129_v43, 0.0 }
  0x95   :  { %v51_v48 = vpop.xlane.xlu1 %50  ;;  %v91_v50 = vmul.f32 0.0625, %v48_v47  ;;  %v122_v52 = vmul.f32 %v760_v44, %v760_v44 }
  0x96   :  { %v92_v51 = vmul.f32 0.0625, %v51_v48  ;;  %v130_v53 = vmul.f32 %v762_v45, %v762_v45 }
  0x97   :  { %v770_v54 = vsub.f32 %v23_v8, %v91_v50  ;;  %v140_v56 = vsel %vm39_vm0, %v122_v52, 0.0 }
  0x98   :  { %v772_v55 = vsub.f32 %v24_v9, %v92_v51  ;;  %162 = vadd.xlane.f32.xlu0 %v161_v49  ;;  %141 = vadd.xlane.f32.xlu1 %v140_v56  ;;  %v72_v57 = vpop.xlane.xlu0 %71  ;;  %v164_v59 = vsel %vm39_vm0, %v130_v53, 0.0 }
  0x99   :  { %v75_v58 = vpop.xlane.xlu1 %74  ;;  %v99_v60 = vmul.f32 0.0625, %v72_v57  ;;  %v123_v62 = vmul.f32 %v770_v54, %v770_v54 }
  0x9a   :  { %v100_v61 = vmul.f32 0.0625, %v75_v58  ;;  %v124_v63 = vmul.f32 %v772_v55, %v772_v55 }
  0x9b   :  { %v781_v0 = vsub.f32 %v685_v12, %v99_v60  ;;  %v143_v2 = vsel %vm39_vm0, %v123_v62, 0.0 }
  0x9c   :  { %v784_v1 = vsub.f32 %v690_v13, %v100_v61  ;;  %165 = vadd.xlane.f32.xlu1 %v164_v59  ;;  %144 = vadd.xlane.f32.xlu0 %v143_v2  ;;  %v54_v3 = vpop.xlane.xlu0 %53  ;;  %v146_v5 = vsel %vm39_vm0, %v124_v63, 0.0 }
  0x9d   :  { %v57_v4 = vpop.xlane.xlu1 %56  ;;  %v93_v6 = vmul.f32 0.0625, %v54_v3  ;;  %v131_v8 = vmul.f32 %v781_v0, %v781_v0 }
  0x9e   :  { %v94_v7 = vmul.f32 0.0625, %v57_v4  ;;  %v132_v9 = vmul.f32 %v784_v1, %v784_v1 }
  0x9f   :  { %v793_v10 = vsub.f32 %v699_v16, %v93_v6  ;;  %v167_v12 = vsel %vm39_vm0, %v131_v8, 0.0 }
  0xa0   :  { %v796_v11 = vsub.f32 %v704_v17, %v94_v7  ;;  %147 = vadd.xlane.f32.xlu1 %v146_v5  ;;  %168 = vadd.xlane.f32.xlu0 %v167_v12  ;;  %v78_v13 = vpop.xlane.xlu0 %77  ;;  %v170_v15 = vsel %vm39_vm0, %v132_v9, 0.0 }
  0xa1   :  { %v81_v14 = vpop.xlane.xlu1 %80  ;;  %v101_v18 = vmul.f32 0.0625, %v78_v13  ;;  %v125_v22 = vmul.f32 %v793_v10, %v793_v10 }
  0xa2   :  { %v102_v19 = vmul.f32 0.0625, %v81_v14  ;;  %v126_v16 = vmul.f32 %v796_v11, %v796_v11 }
  0xa3   :  { %v805_v23 = vsub.f32 %v713_v20, %v101_v18  ;;  %v149_v26 = vsel %vm39_vm0, %v125_v22, 0.0 }
  0xa4   :  { %v808_v17 = vsub.f32 %v718_v21, %v102_v19  ;;  %171 = vadd.xlane.f32.xlu1 %v170_v15  ;;  %150 = vadd.xlane.f32.xlu0 %v149_v26  ;;  %v60_v27 = vpop.xlane.xlu0 %59  ;;  %v152_v31 = vsel %vm39_vm0, %v126_v16, 0.0 }
  0xa5   :  { %v63_v30 = vpop.xlane.xlu1 %62  ;;  %v95_v32 = vmul.f32 0.0625, %v60_v27  ;;  %v133_v34 = vmul.f32 %v805_v23, %v805_v23 }
  0xa6   :  { %v96_v33 = vmul.f32 0.0625, %v63_v30  ;;  %v134_v20 = vmul.f32 %v808_v17, %v808_v17 }
  0xa7   :  { %v817_v35 = vsub.f32 %v727_v24, %v95_v32  ;;  %v173_v38 = vsel %vm39_vm0, %v133_v34, 0.0 }
  0xa8   :  { %v820_v21 = vsub.f32 %v732_v25, %v96_v33  ;;  %153 = vadd.xlane.f32.xlu1 %v152_v31  ;;  %174 = vadd.xlane.f32.xlu0 %v173_v38  ;;  %v84_v39 = vpop.xlane.xlu0 %83  ;;  %v176_v41 = vsel %vm39_vm0, %v134_v20, 0.0  ;;  %v848_v31 = vld [vmem:[%s998_s1] ss:$0 sm:$0xff] }
  0xa9   :  { %v87_v40 = vpop.xlane.xlu1 %86  ;;  %v103_v42 = vmul.f32 0.0625, %v84_v39  ;;  %v127_v46 = vmul.f32 %v817_v35, %v817_v35 }
  0xaa   :  { %v104_v43 = vmul.f32 0.0625, %v87_v40  ;;  %v128_v24 = vmul.f32 %v820_v21, %v820_v21 }
  0xab   :  { %v829_v47 = vsub.f32 %v741_v28, %v103_v42  ;;  %v155_v48 = vsel %vm39_vm0, %v127_v46, 0.0  ;;  %v855_v46 = vld [vmem:[%s999_s2] ss:$0 sm:$0xff] }
  0xac   :  { %v832_v25 = vsub.f32 %v746_v29, %v104_v43  ;;  %177 = vadd.xlane.f32.xlu1 %v176_v41  ;;  %156 = vadd.xlane.f32.xlu0 %v155_v48  ;;  %v158_v49 = vsel %vm39_vm0, %v128_v24, 0.0  ;;  %v595_v29 = vld [vmem:[%s997_s3] sm:$0xff]  }
  0xad   :  { %v135_v50 = vmul.f32 %v829_v47, %v829_v47  ;;  %575 = vmatprep.subr.bf16.mxu0 %v595_v29  ;;  %593 = vmatprep.subr.bf16.mxu1 %v595_v29 }
  0xae   :  { %v136_v51 = vmul.f32 %v832_v25, %v832_v25  ;;  %576 = vmatpush3.bf16.msra.mxu0 %v595_v29  ;;  %594 = vmatpush3.bf16.msra.mxu1 %v595_v29 }
  0xaf   :  { %v179_v52 = vsel %vm39_vm0, %v135_v50, 0.0 }
  0xb0   :  { %159 = vadd.xlane.f32.xlu1 %v158_v49  ;;  %180 = vadd.xlane.f32.xlu0 %v179_v52  ;;  %v182_v28 = vsel %vm39_vm0, %v136_v51, 0.0 }
  0xb4   :  { %183 = vadd.xlane.f32.xlu1 %v182_v28 }
 0x11d   :  { %v139_v53 = vpop.xlane.xlu0 %138 }
 0x11e   :  { %v185_v56 = vmul.f32 0.0625, %v139_v53 }
 0x120   :  { %v201_v57 = vadd.f32 1e-05, %v185_v56 }
 0x121   :  { %v142_v58 = vpop.xlane.xlu1 %141  ;;  %v163_v59 = vpop.xlane.xlu0 %162 }
 0x122   :  { %596 = vrsqrt.f32 %v201_v57  ;;  %v186_v60 = vmul.f32 0.0625, %v142_v58  ;;  %v193_v61 = vmul.f32 0.0625, %v163_v59 }
 0x124   :  { %v202_v62 = vadd.f32 1e-05, %v186_v60  ;;  %v209_v63 = vadd.f32 1e-05, %v193_v61 }
 0x125   :  { %v166_v2 = vpop.xlane.xlu1 %165  ;;  %v145_v3 = vpop.xlane.xlu0 %144 }
 0x126   :  { %598 = vrsqrt.f32 %v202_v62  ;;  %v194_v4 = vmul.f32 0.0625, %v166_v2  ;;  %v187_v5 = vmul.f32 0.0625, %v145_v3 }
 0x127   :  { %600 = vrsqrt.f32 %v209_v63 }
 0x128   :  { %v210_v6 = vadd.f32 1e-05, %v194_v4  ;;  %v203_v7 = vadd.f32 1e-05, %v187_v5 }
 0x129   :  { %v148_v8 = vpop.xlane.xlu1 %147  ;;  %v169_v9 = vpop.xlane.xlu0 %168 }
 0x12a   :  { %602 = vrsqrt.f32 %v210_v6  ;;  %v188_v12 = vmul.f32 0.0625, %v148_v8  ;;  %v195_v13 = vmul.f32 0.0625, %v169_v9 }
 0x12b   :  { %604 = vrsqrt.f32 %v203_v7 }
 0x12c   :  { %v204_v14 = vadd.f32 1e-05, %v188_v12  ;;  %v211_v15 = vadd.f32 1e-05, %v195_v13 }
 0x12d   :  { %v172_v18 = vpop.xlane.xlu1 %171  ;;  %v151_v19 = vpop.xlane.xlu0 %150 }
 0x12e   :  { %606 = vrsqrt.f32 %v204_v14  ;;  %v196_v22 = vmul.f32 0.0625, %v172_v18  ;;  %v189_v16 = vmul.f32 0.0625, %v151_v19 }
 0x12f   :  { %v597_v26 = vpop.eup %596  ;;  %608 = vrsqrt.f32 %v211_v15 }
 0x130   :  { %v212_v27 = vadd.f32 1e-05, %v196_v22  ;;  %v205_v30 = vadd.f32 1e-05, %v189_v16  ;;  %v233_v32 = vmul.f32 %v597_v26, %v752_v36 }
 0x131   :  { %v154_v33 = vpop.xlane.xlu1 %153  ;;  %v175_v34 = vpop.xlane.xlu0 %174 }
 0x132   :  { %610 = vrsqrt.f32 %v212_v27  ;;  %v190_v20 = vmul.f32 0.0625, %v154_v33  ;;  %v197_v38 = vmul.f32 0.0625, %v175_v34  ;;  %v255_v40 = vmul.f32 %v848_v31, %v233_v32 }
 0x133   :  { %v599_v39 = vpop.eup %598  ;;  %612 = vrsqrt.f32 %v205_v30 }
 0x134   :  { %v601_v41 = vpop.eup %600  ;;  %v206_v42 = vadd.f32 1e-05, %v190_v20  ;;  %v213_v43 = vadd.f32 1e-05, %v197_v38  ;;  %v234_v24 = vmul.f32 %v599_v39, %v760_v44  ;;  %v277_v29 = vadd.f32 %v855_v46, %v255_v40 }
 0x135   :  { %v178_v36 = vpop.xlane.xlu1 %177  ;;  %v157_v48 = vpop.xlane.xlu0 %156  ;;  %v241_v49 = vmul.f32 %v601_v41, %v754_v37 }
 0x136   :  { %614 = vrsqrt.f32 %v206_v42  ;;  %v198_v50 = vmul.f32 0.0625, %v178_v36  ;;  %v191_v51 = vmul.f32 0.0625, %v157_v48  ;;  %v256_v52 = vmul.f32 %v848_v31, %v234_v24 }
 0x137   :  { %v603_v28 = vpop.eup %602  ;;  %616 = vrsqrt.f32 %v213_v43  ;;  %v263_v37 = vmul.f32 %v848_v31, %v241_v49 }
 0x138   :  { %v605_v53 = vpop.eup %604  ;;  %v214_v56 = vadd.f32 1e-05, %v198_v50  ;;  %v207_v57 = vadd.f32 1e-05, %v191_v51  ;;  %v278_v58 = vadd.f32 %v855_v46, %v256_v52  ;;  %v242_v44 = vmul.f32 %v603_v28, %v762_v45 }
 0x139   :  { %v160_v59 = vpop.xlane.xlu1 %159  ;;  %v181_v60 = vpop.xlane.xlu0 %180  ;;  %v235_v61 = vmul.f32 %v605_v53, %v770_v54  ;;  %v285_v54 = vadd.f32 %v855_v46, %v263_v37 }
 0x13a   :  { %618 = vrsqrt.f32 %v214_v56  ;;  %v192_v62 = vmul.f32 0.0625, %v160_v59  ;;  %v199_v63 = vmul.f32 0.0625, %v181_v60  ;;  %v293_v2 = vpack.c.bf16 %v278_v58, %v277_v29 }
 0x13b   :  { %v607_v3 = vpop.eup %606  ;;  %620 = vrsqrt.f32 %v207_v57  ;;  %v264_v4 = vmul.f32 %v848_v31, %v242_v44  ;;  %v257_v5 = vmul.f32 %v848_v31, %v235_v61 }
 0x13c   :  { %v609_v6 = vpop.eup %608  ;;  %v208_v7 = vadd.f32 1e-05, %v192_v62  ;;  %v215_v8 = vadd.f32 1e-05, %v199_v63  ;;  %577 = vmatprep.mubr.msk.bf16.mxu0 %vm39_vm0, %v293_v2  ;;  %v236_v45 = vmul.f32 %v607_v3, %v772_v55  ;;  %v914_v3 = vld [vmem:[%s1000_s4] ss:$0 sm:$0xff] }
 0x13d   :  { %v184_v9 = vpop.xlane.xlu1 %183  ;;  %v286_v12 = vadd.f32 %v855_v46, %v264_v4  ;;  %v243_v13 = vmul.f32 %v609_v6, %v781_v0  ;;  %v279_v22 = vadd.f32 %v855_v46, %v257_v5 }
 0x13e   :  { %622 = vrsqrt.f32 %v208_v7  ;;  %v200_v14 = vmul.f32 0.0625, %v184_v9  ;;  %v258_v15 = vmul.f32 %v848_v31, %v236_v45 }
 0x13f   :  { %v611_v18 = vpop.eup %610  ;;  %624 = vrsqrt.f32 %v215_v8  ;;  %v297_v19 = vpack.c.bf16 %v286_v12, %v285_v54  ;;  %v265_v30 = vmul.f32 %v848_v31, %v243_v13 }
 0x140   :  { %v613_v16 = vpop.eup %612  ;;  %v216_v26 = vadd.f32 1e-05, %v200_v14  ;;  %v280_v55 = vadd.f32 %v855_v46, %v258_v15  ;;  %v244_v27 = vmul.f32 %v611_v18, %v784_v1 }
 0x141   :  { %585 = vmatprep.mubr.msk.bf16.mxu1 %vm39_vm0, %v297_v19  ;;  %v237_v0 = vmul.f32 %v613_v16, %v793_v10  ;;  %v287_v38 = vadd.f32 %v855_v46, %v265_v30 }
 0x142   :  { %626 = vrsqrt.f32 %v216_v26  ;;  %v294_v32 = vpack.c.bf16 %v280_v55, %v279_v22  ;;  %v266_v33 = vmul.f32 %v848_v31, %v244_v27 }
 0x143   :  { %v615_v34 = vpop.eup %614  ;;  %v259_v40 = vmul.f32 %v848_v31, %v237_v0 }
 0x144   :  { %v617_v20 = vpop.eup %616  ;;  %578 = vmatmul.mubr.msk.bf16.vlgmr.msra.gmra.mxu0 %vm39_vm0, %v294_v32  ;;  %v288_v39 = vadd.f32 %v855_v46, %v266_v33  ;;  %v238_v1 = vmul.f32 %v615_v34, %v796_v11 }
 0x145   :  { %v245_v41 = vmul.f32 %v617_v20, %v805_v23  ;;  %v281_v36 = vadd.f32 %v855_v46, %v259_v40 }
 0x146   :  { %v298_v42 = vpack.c.bf16 %v288_v39, %v287_v38  ;;  %v260_v10 = vmul.f32 %v848_v31, %v238_v1 }
 0x147   :  { %v619_v43 = vpop.eup %618  ;;  %v267_v50 = vmul.f32 %v848_v31, %v245_v41 }
 0x148   :  { %v621_v24 = vpop.eup %620  ;;  %586 = vmatmul.mubr.msk.bf16.vlgmr.msra.gmra.mxu1 %vm39_vm0, %v298_v42  ;;  %v282_v48 = vadd.f32 %v855_v46, %v260_v10  ;;  %v246_v49 = vmul.f32 %v619_v43, %v808_v17 }
 0x149   :  { %v239_v11 = vmul.f32 %v621_v24, %v817_v35  ;;  %v289_v29 = vadd.f32 %v855_v46, %v267_v50 }
 0x14a   :  { %v295_v51 = vpack.c.bf16 %v282_v48, %v281_v36  ;;  %v268_v23 = vmul.f32 %v848_v31, %v246_v49 }
 0x14b   :  { %v623_v52 = vpop.eup %622  ;;  %v261_v57 = vmul.f32 %v848_v31, %v239_v11 }
 0x14c   :  { %v625_v28 = vpop.eup %624  ;;  %581 = vmatprep.mubr.msk.bf16.mxu0 %vm39_vm0, %v295_v51  ;;  %v290_v53 = vadd.f32 %v855_v46, %v268_v23  ;;  %v240_v56 = vmul.f32 %v623_v52, %v820_v21 }
 0x14d   :  { %v247_v17 = vmul.f32 %v625_v28, %v829_v47  ;;  %v283_v59 = vadd.f32 %v855_v46, %v261_v57 }
 0x14e   :  { %v299_v58 = vpack.c.bf16 %v290_v53, %v289_v29  ;;  %v262_v35 = vmul.f32 %v848_v31, %v240_v56 }
 0x14f   :  { %v627_v44 = vpop.eup %626  ;;  %v269_v61 = vmul.f32 %v848_v31, %v247_v17 }
 0x150   :  { %589 = vmatprep.mubr.msk.bf16.mxu1 %vm39_vm0, %v299_v58  ;;  %v284_v60 = vadd.f32 %v855_v46, %v262_v35  ;;  %v248_v37 = vmul.f32 %v627_v44, %v832_v25 }
 0x151   :  { %v291_v47 = vadd.f32 %v855_v46, %v269_v61 }
 0x152   :  { %v296_v62 = vpack.c.bf16 %v284_v60, %v283_v59  ;;  %v270_v21 = vmul.f32 %v848_v31, %v248_v37 }
 0x154   :  { %582 = vmatmul.mubr.msk.bf16.gmra.mxu0 %vm39_vm0, %v296_v62  ;;  %v292_v63 = vadd.f32 %v855_v46, %v270_v21 }
 0x156   :  { %v300_v2 = vpack.c.bf16 %v292_v63, %v291_v47 }
 0x158   :  { %590 = vmatmul.mubr.msk.bf16.gmra.mxu1 %vm39_vm0, %v300_v2 }
 0x204   :  { %v579_v25 = vpop.f32.mrf.mxu0 }
 0x205   :  { %v383_v4 = vadd.f32 %v579_v25, %v914_v3 }
 0x206   :  { %v374_v5 = vpop.f32.mrf.mxu0 }
 0x207   :  { %v552_v31 = vpack.c.bf16 %v383_v4, %v383_v4  ;;  %v375_v6 = vadd.f32 %v914_v3, %v374_v5 }
 0x208   :  { %v580_v7 = vpop.f32.mrf.mxu0  ;;  %v587_v8 = vpop.f32.mrf.mxu1 }
 0x209   :  { %504 = vst.msk [vmem:[%s1001_s5 + $0x8] sm:$0xf] %vm501_vm1, %v552_v31  ;;  %v550_v46 = vpack.c.bf16 %v375_v6, %v375_v6  ;;  %v386_v45 = vadd.f32 %v580_v7, %v914_v3  ;;  %v415_v9 = vadd.f32 %v587_v8, %v914_v3 }
 0x20a   :  { %v377_v54 = vpop.f32.mrf.mxu0  ;;  %v406_v12 = vpop.f32.mrf.mxu1 }
 0x20b   :  { %502 = vst.msk [vmem:[%s1001_s5] sm:$0xf] %vm501_vm1, %v550_v46  ;;  %v553_v13 = vpack.c.bf16 %v386_v45, %v386_v45  ;;  %v560_v14 = vpack.c.bf16 %v415_v9, %v415_v9  ;;  %v378_v15 = vadd.f32 %v914_v3, %v377_v54  ;;  %v407_v18 = vadd.f32 %v914_v3, %v406_v12 }
 0x20c   :  { %v588_v19 = vpop.f32.mrf.mxu1 }
 0x20d   :  { %505 = vst.msk [vmem:[%s1001_s5 + $0xc] sm:$0xf] %vm501_vm1, %v553_v13  ;;  %512 = vst.msk [vmem:[%s1001_s5 + $0x28] sm:$0xf] %vm501_vm1, %v560_v14  ;;  %v551_v22 = vpack.c.bf16 %v378_v15, %v378_v15  ;;  %v558_v16 = vpack.c.bf16 %v407_v18, %v407_v18  ;;  %v418_v26 = vadd.f32 %v588_v19, %v914_v3 }
 0x20e   :  { %v409_v55 = vpop.f32.mrf.mxu1 }
 0x20f   :  { %503 = vst.msk [vmem:[%s1001_s5 + $0x4] sm:$0xf] %vm501_vm1, %v551_v22  ;;  %510 = vst.msk [vmem:[%s1001_s5 + $0x20] sm:$0xf] %vm501_vm1, %v558_v16  ;;  %v561_v27 = vpack.c.bf16 %v418_v26, %v418_v26  ;;  %v410_v30 = vadd.f32 %v914_v3, %v409_v55 }
 0x211   :  { %513 = vst.msk [vmem:[%s1001_s5 + $0x2c] sm:$0xf] %vm501_vm1, %v561_v27  ;;  %v559_v0 = vpack.c.bf16 %v410_v30, %v410_v30 }
 0x213   :  { %511 = vst.msk [vmem:[%s1001_s5 + $0x24] sm:$0xf] %vm501_vm1, %v559_v0 }
 0x214   :  { %v583_v32 = vpop.f32.mrf.mxu0 }
 0x215   :  { %v399_v33 = vadd.f32 %v583_v32, %v914_v3 }
 0x216   :  { %v390_v34 = vpop.f32.mrf.mxu0 }
 0x217   :  { %v556_v20 = vpack.c.bf16 %v399_v33, %v399_v33  ;;  %v391_v38 = vadd.f32 %v914_v3, %v390_v34 }
 0x218   :  { %v584_v39 = vpop.f32.mrf.mxu0  ;;  %v591_v1 = vpop.f32.mrf.mxu1 }
 0x219   :  { %508 = vst.msk [vmem:[%s1001_s5 + $0x18] sm:$0xf] %vm501_vm1, %v556_v20  ;;  %v554_v40 = vpack.c.bf16 %v391_v38, %v391_v38  ;;  %v402_v41 = vadd.f32 %v584_v39, %v914_v3  ;;  %v431_v42 = vadd.f32 %v591_v1, %v914_v3 }
 0x21a   :  { %v393_v10 = vpop.f32.mrf.mxu0  ;;  %v422_v43 = vpop.f32.mrf.mxu1 }
 0x21b   :  { %506 = vst.msk [vmem:[%s1001_s5 + $0x10] sm:$0xf] %vm501_vm1, %v554_v40  ;;  %v557_v24 = vpack.c.bf16 %v402_v41, %v402_v41  ;;  %v564_v36 = vpack.c.bf16 %v431_v42, %v431_v42  ;;  %v394_v48 = vadd.f32 %v914_v3, %v393_v10  ;;  %v423_v49 = vadd.f32 %v914_v3, %v422_v43 }
 0x21c   :  { %v592_v50 = vpop.f32.mrf.mxu1 }
 0x21d   :  { %509 = vst.msk [vmem:[%s1001_s5 + $0x1c] sm:$0xf] %vm501_vm1, %v557_v24  ;;  %516 = vst.msk [vmem:[%s1001_s5 + $0x38] sm:$0xf] %vm501_vm1, %v564_v36  ;;  %v555_v11 = vpack.c.bf16 %v394_v48, %v394_v48  ;;  %v562_v51 = vpack.c.bf16 %v423_v49, %v423_v49  ;;  %v434_v23 = vadd.f32 %v592_v50, %v914_v3 }
 0x21e   :  { %v425_v52 = vpop.f32.mrf.mxu1 }
 0x21f   :  { %507 = vst.msk [vmem:[%s1001_s5 + $0x14] sm:$0xf] %vm501_vm1, %v555_v11  ;;  %514 = vst.msk [vmem:[%s1001_s5 + $0x30] sm:$0xf] %vm501_vm1, %v562_v51  ;;  %v565_v28 = vpack.c.bf16 %v434_v23, %v434_v23  ;;  %v426_v29 = vadd.f32 %v914_v3, %v425_v52 }
 0x221   :  { %517 = vst.msk [vmem:[%s1001_s5 + $0x3c] sm:$0xf] %vm501_vm1, %v565_v28  ;;  %v563_v53 = vpack.c.bf16 %v426_v29, %v426_v29 }
 0x223   :  { %515 = vst.msk [vmem:[%s1001_s5 + $0x34] sm:$0xf] %vm501_vm1, %v563_v53 }

// kernel: _lambda_.22
= control target key start
LH: loop header
LB: loop body
LE: loop exit
PB: predicated region body
PF: predicated region fallthrough
CT: control target
= control target key end

     0   :  { %vm66_vm0 = vcmask 130048   ;;  %s504_s1 = inlined_call_operand.vmem [shape: bf16[16,16], index: 1, kind: input, shape index: {}]   ;;  %s505_s0 = inlined_call_operand.vmem [shape: f32[128,16], index: 0, kind: input, shape index: {}]   ;;  %s506_s3 = inlined_call_operand.vmem [shape: f32[128,16], index: 3, kind: input, shape index: {}]   ;;  %s507_s2 = inlined_call_operand.vmem [shape: f32[1,16], index: 2, kind: input, shape index: {}]   ;;  %s508_s4 = inlined_call_operand.vmem [shape: f32[128,16], index: 4, kind: output, shape index: {}]  }
   0x1   :  { %v286_v0 = vld [vmem:[%s504_s1] sm:$0xff]   ;;  %v35_v2 = vld [vmem:[%s505_s0 + $0x8] sm:$0xff]  ;;  %v36_v6 = vld [vmem:[%s505_s0 + $0x10] sm:$0xff] }
   0x2   :  { %v34_v1 = vld [vmem:[%s505_s0] sm:$0xff]  ;;  %266 = vmatprep.subr.bf16.mxu0 %v286_v0  ;;  %284 = vmatprep.subr.bf16.mxu1 %v286_v0  ;;  %v43_v5 = vld [vmem:[%s505_s0 + $0x48] sm:$0xff]  ;;  %v37_v7 = vld [vmem:[%s505_s0 + $0x18] sm:$0xff] }
   0x3   :  { %v42_v3 = vld [vmem:[%s505_s0 + $0x40] sm:$0xff]  ;;  %v50_v4 = vpack.c.bf16 %v35_v2, %v34_v1  ;;  %267 = vmatpush3.bf16.msra.mxu0 %v286_v0  ;;  %285 = vmatpush3.bf16.msra.mxu1 %v286_v0  ;;  %v51_v9 = vpack.c.bf16 %v37_v7, %v36_v6  ;;  %v44_v10 = vld [vmem:[%s505_s0 + $0x50] sm:$0xff]  ;;  %v45_v11 = vld [vmem:[%s505_s0 + $0x58] sm:$0xff] }
   0x4   :  { %v54_v8 = vpack.c.bf16 %v43_v5, %v42_v3  ;;  %v38_v12 = vld [vmem:[%s505_s0 + $0x20] sm:$0xff]  ;;  %v55_v13 = vpack.c.bf16 %v45_v11, %v44_v10  ;;  %v39_v14 = vld [vmem:[%s505_s0 + $0x28] sm:$0xff]  ;;  %v40_v19 = vld [vmem:[%s505_s0 + $0x30] sm:$0xff] }
   0x5   :  { %268 = vmatprep.mubr.msk.bf16.mxu0 %vm66_vm0, %v50_v4  ;;  %v46_v15 = vld [vmem:[%s505_s0 + $0x60] sm:$0xff]  ;;  %v47_v16 = vld [vmem:[%s505_s0 + $0x68] sm:$0xff]  ;;  %v52_v17 = vpack.c.bf16 %v39_v14, %v38_v12  ;;  %v41_v20 = vld [vmem:[%s505_s0 + $0x38] sm:$0xff] }
   0x6   :  { %276 = vmatprep.mubr.msk.bf16.mxu1 %vm66_vm0, %v54_v8  ;;  %v56_v18 = vpack.c.bf16 %v47_v16, %v46_v15  ;;  %269 = vmatmul.mubr.msk.bf16.vlgmr.msra.gmra.mxu0 %vm66_vm0, %v51_v9  ;;  %v48_v21 = vld [vmem:[%s505_s0 + $0x70] sm:$0xff]  ;;  %v49_v22 = vld [vmem:[%s505_s0 + $0x78] sm:$0xff]  ;;  %v53_v23 = vpack.c.bf16 %v41_v20, %v40_v19  ;;  %v380_v28 = vld [vmem:[%s507_s2] ss:$0 sm:$0xff] }
   0x7   :  { %277 = vmatmul.mubr.msk.bf16.vlgmr.msra.gmra.mxu1 %vm66_vm0, %v55_v13  ;;  %272 = vmatprep.mubr.msk.bf16.mxu0 %vm66_vm0, %v52_v17  ;;  %v57_v24 = vpack.c.bf16 %v49_v22, %v48_v21  ;;  %v20_v25 = vld [vmem:[%s506_s3 + $0x10] sm:$0xff]  ;;  %v18_v30 = vld [vmem:[%s506_s3] sm:$0xff]  ;;  %v21_v36 = vld [vmem:[%s506_s3 + $0x18] sm:$0xff] }
   0x8   :  { %280 = vmatprep.mubr.msk.bf16.mxu1 %vm66_vm0, %v56_v18  ;;  %v28_v26 = vld [vmem:[%s506_s3 + $0x50] sm:$0xff]  ;;  %v26_v31 = vld [vmem:[%s506_s3 + $0x40] sm:$0xff]  ;;  %v29_v37 = vld [vmem:[%s506_s3 + $0x58] sm:$0xff] }
   0x9   :  { %v19_v44 = vld [vmem:[%s506_s3 + $0x8] sm:$0xff]  ;;  %v24_v52 = vld [vmem:[%s506_s3 + $0x30] sm:$0xff]  ;;  %v22_v60 = vld [vmem:[%s506_s3 + $0x20] sm:$0xff] }
   0xa   :  { %v27_v45 = vld [vmem:[%s506_s3 + $0x48] sm:$0xff]  ;;  %v32_v53 = vld [vmem:[%s506_s3 + $0x70] sm:$0xff]  ;;  %v30_v61 = vld [vmem:[%s506_s3 + $0x60] sm:$0xff] }
   0xb   :  { %v25_v4 = vld [vmem:[%s506_s3 + $0x38] sm:$0xff]  ;;  %v23_v12 = vld [vmem:[%s506_s3 + $0x28] sm:$0xff] }
   0xc   :  { %v33_v5 = vld [vmem:[%s506_s3 + $0x78] sm:$0xff]  ;;  %v31_v13 = vld [vmem:[%s506_s3 + $0x68] sm:$0xff] }
   0xe   :  { %273 = vmatmul.mubr.msk.bf16.gmra.mxu0 %vm66_vm0, %v53_v23 }
   0xf   :  { %281 = vmatmul.mubr.msk.bf16.gmra.mxu1 %vm66_vm0, %v57_v24 }
  0xc6   :  { %v270_v27 = vpop.f32.mrf.mxu0 }
  0xc7   :  { %v278_v29 = vpop.f32.mrf.mxu1  ;;  %v190_v32 = vadd.f32 %v270_v27, %v20_v25 }
  0xc8   :  { %v198_v33 = vadd.f32 %v278_v29, %v28_v26  ;;  %v125_v34 = vpop.f32.mrf.mxu0 }
  0xc9   :  { %v157_v35 = vpop.f32.mrf.mxu1  ;;  %v213_v38 = vadd.f32 %v380_v28, %v190_v32  ;;  %v188_v40 = vadd.f32 %v125_v34, %v18_v30 }
  0xca   :  { %v221_v39 = vadd.f32 %v380_v28, %v198_v33  ;;  %v196_v41 = vadd.f32 %v157_v35, %v26_v31  ;;  %v271_v42 = vpop.f32.mrf.mxu0 }
  0xcb   :  { %v279_v43 = vpop.f32.mrf.mxu1  ;;  %229 = vst.msk [vmem:[%s508_s4 + $0x10] sm:$0xff] %vm66_vm0, %v213_v38  ;;  %v211_v46 = vadd.f32 %v380_v28, %v188_v40  ;;  %v191_v48 = vadd.f32 %v271_v42, %v21_v36 }
  0xcc   :  { %237 = vst.msk [vmem:[%s508_s4 + $0x50] sm:$0xff] %vm66_vm0, %v221_v39  ;;  %v219_v47 = vadd.f32 %v380_v28, %v196_v41  ;;  %v199_v49 = vadd.f32 %v279_v43, %v29_v37  ;;  %v128_v50 = vpop.f32.mrf.mxu0 }
  0xcd   :  { %v160_v51 = vpop.f32.mrf.mxu1  ;;  %227 = vst.msk [vmem:[%s508_s4] sm:$0xff] %vm66_vm0, %v211_v46  ;;  %v214_v54 = vadd.f32 %v380_v28, %v191_v48  ;;  %v189_v56 = vadd.f32 %v128_v50, %v19_v44 }
  0xce   :  { %235 = vst.msk [vmem:[%s508_s4 + $0x40] sm:$0xff] %vm66_vm0, %v219_v47  ;;  %v222_v55 = vadd.f32 %v380_v28, %v199_v49  ;;  %v197_v57 = vadd.f32 %v160_v51, %v27_v45  ;;  %v274_v58 = vpop.f32.mrf.mxu0 }
  0xcf   :  { %v282_v59 = vpop.f32.mrf.mxu1  ;;  %230 = vst.msk [vmem:[%s508_s4 + $0x18] sm:$0xff] %vm66_vm0, %v214_v54  ;;  %v212_v62 = vadd.f32 %v380_v28, %v189_v56  ;;  %v194_v0 = vadd.f32 %v274_v58, %v24_v52 }
  0xd0   :  { %238 = vst.msk [vmem:[%s508_s4 + $0x58] sm:$0xff] %vm66_vm0, %v222_v55  ;;  %v220_v63 = vadd.f32 %v380_v28, %v197_v57  ;;  %v202_v1 = vadd.f32 %v282_v59, %v32_v53  ;;  %v141_v2 = vpop.f32.mrf.mxu0 }
  0xd1   :  { %v173_v3 = vpop.f32.mrf.mxu1  ;;  %228 = vst.msk [vmem:[%s508_s4 + $0x8] sm:$0xff] %vm66_vm0, %v212_v62  ;;  %v217_v6 = vadd.f32 %v380_v28, %v194_v0  ;;  %v192_v8 = vadd.f32 %v141_v2, %v22_v60 }
  0xd2   :  { %236 = vst.msk [vmem:[%s508_s4 + $0x48] sm:$0xff] %vm66_vm0, %v220_v63  ;;  %v225_v7 = vadd.f32 %v380_v28, %v202_v1  ;;  %v200_v9 = vadd.f32 %v173_v3, %v30_v61  ;;  %v275_v10 = vpop.f32.mrf.mxu0 }
  0xd3   :  { %v283_v11 = vpop.f32.mrf.mxu1  ;;  %233 = vst.msk [vmem:[%s508_s4 + $0x30] sm:$0xff] %vm66_vm0, %v217_v6  ;;  %v215_v14 = vadd.f32 %v380_v28, %v192_v8  ;;  %v195_v16 = vadd.f32 %v275_v10, %v25_v4 }
  0xd4   :  { %241 = vst.msk [vmem:[%s508_s4 + $0x70] sm:$0xff] %vm66_vm0, %v225_v7  ;;  %v223_v15 = vadd.f32 %v380_v28, %v200_v9  ;;  %v203_v17 = vadd.f32 %v283_v11, %v33_v5  ;;  %v144_v18 = vpop.f32.mrf.mxu0 }
  0xd5   :  { %v176_v19 = vpop.f32.mrf.mxu1  ;;  %231 = vst.msk [vmem:[%s508_s4 + $0x20] sm:$0xff] %vm66_vm0, %v215_v14  ;;  %v218_v20 = vadd.f32 %v380_v28, %v195_v16  ;;  %v193_v22 = vadd.f32 %v144_v18, %v23_v12 }
  0xd6   :  { %239 = vst.msk [vmem:[%s508_s4 + $0x60] sm:$0xff] %vm66_vm0, %v223_v15  ;;  %v226_v21 = vadd.f32 %v380_v28, %v203_v17  ;;  %v201_v23 = vadd.f32 %v176_v19, %v31_v13 }
  0xd7   :  { %234 = vst.msk [vmem:[%s508_s4 + $0x38] sm:$0xff] %vm66_vm0, %v218_v20  ;;  %v216_v24 = vadd.f32 %v380_v28, %v193_v22 }
  0xd8   :  { %242 = vst.msk [vmem:[%s508_s4 + $0x78] sm:$0xff] %vm66_vm0, %v226_v21  ;;  %v224_v25 = vadd.f32 %v380_v28, %v201_v23 }
  0xd9   :  { %232 = vst.msk [vmem:[%s508_s4 + $0x28] sm:$0xff] %vm66_vm0, %v216_v24 }
  0xda   :  { %240 = vst.msk [vmem:[%s508_s4 + $0x68] sm:$0xff] %vm66_vm0, %v224_v25 }

// kernel: _lambda_.21
= control target key start
LH: loop header
LB: loop body
LE: loop exit
PB: predicated region body
PF: predicated region fallthrough
CT: control target
= control target key end

     0   :  { %s2697_s15 = smov 0   ;;  %s2699_s16 = smov 0   ;;  %s3243_s0 = inlined_call_operand.vmem [shape: bf16[2,16,8,8], index: 0, kind: input, shape index: {}]   ;;  %s3244_s1 = inlined_call_operand.vmem [shape: bf16[2,16,8,8], index: 1, kind: input, shape index: {}]   ;;  %s3245_s2 = inlined_call_operand.vmem [shape: bf16[2,16,8,8], index: 2, kind: input, shape index: {}]   ;;  %s3246_s3 = inlined_call_operand.vmem [shape: f32[16,8,8], index: 3, kind: input, shape index: {}]   ;;  %s3247_s4 = inlined_call_operand.vmem [shape: f32[2,16,8,8], index: 4, kind: output, shape index: {}]  }
   0x1   :  { %s2701_s17 = smov 0  }
   0x2 LB: > { %s26_s18 = sadd.s32 1, %s2664_s16  ;;  %p2253_p0 = scmp.ge.s32.totalorder %s2668_s17, 1  ;;  %s2668_s17 = sphi %s2701_s17, %s14_s17   ;;  %s2664_s16 = sphi %s2699_s16, %s3249_s16   ;;  %s2660_s15 = sphi %s2697_s15, %s3248_s15  }
   0x3   : > { %p28_p1 = scmp.ge.s32.totalorder %s26_s18, 2  ;;  %p228_p2 = scmp.lt.s32.totalorder %s2668_s17, 3 }
   0x5   : > { %s3251_s18 = smov (%p28_p1, %s26_s18), 0  ;;  %p229_p3 = pnand %p2253_p0, %p228_p2 }
   0x6   : > { %p286_p4 = scmp.lt.s32.totalorder (!%p229_p3), %s2660_s15, 1 }
   0x7   : > { %232 = sbr.rel (%p229_p3) target bundleno = 794 (0x31a), region = 36 }
   0xc   : > { %v2670_v0 = vmov 0.0   ;;  %s3253_s15 = smov (!%p286_p4, %s2660_s15), 1  ;;  %vm2671_vm0 = vmmov 0   ;;  %vm380_vm1 = vcmask 64512   ;;  %v1133_v51 = vld [vmem:[%s3246_s3] sm:$0xff]  ;;  %v1134_v52 = vld [vmem:[%s3246_s3 + $0x8] sm:$0xff] }
   0xd   : > { %2364 = vmatprep.subr.bf16.mxu0 %v2670_v0  ;;  %2370 = vmatprep.subr.bf16.mxu1 %v2670_v0  ;;  %s2724_s19 = sshll.u32 %s3253_s15, 6  ;;  %vm1360_vm2 = vcmask 1043456  }
   0xe   : > { %2366 = vmatprep.mubr.msk.bf16.mxu0 %vm2671_vm0, %v2670_v0  ;;  %2372 = vmatprep.mubr.msk.bf16.mxu1 %vm2671_vm0, %v2670_v0  ;;  %s2730_s22 = scalar_lea.vmem %s3244_s1, %s2724_s19  ;;  %s2740_s25 = scalar_lea.vmem %s3243_s0, %s2724_s19 }
   0xf   : > { %v348_v1 = vld [vmem:[%s2730_s22] sm:$0xf]  ;;  %v349_v2 = vld [vmem:[%s2730_s22 + $0x4] sm:$0xf]  ;;  %v350_v5 = vld [vmem:[%s2730_s22 + $0x8] sm:$0xf]  ;;  %s3004_s13 = scalar_lea.vmem %s3245_s2, %s2724_s19 }
  0x10   : > { %v385_v3 = vsel %vm380_vm1, %v348_v1, 0  ;;  %v431_v4 = vsel %vm380_vm1, %v349_v2, 0  ;;  %v351_v6 = vld [vmem:[%s2730_s22 + $0xc] sm:$0xf]  ;;  %v332_v7 = vld [vmem:[%s2740_s25] sm:$0xf] }
  0x11   : > { %2365 = vmatpush3.bf16.xpose.msra.mxu0 %v385_v3  ;;  %2371 = vmatpush3.bf16.xpose.msra.mxu1 %v431_v4  ;;  %v333_v8 = vld [vmem:[%s2740_s25 + $0x4] sm:$0xf]  ;;  %v477_v9 = vsel %vm380_vm1, %v350_v5, 0  ;;  %v523_v10 = vsel %vm380_vm1, %v351_v6, 0  ;;  %v352_v11 = vld [vmem:[%s2730_s22 + $0x10] sm:$0xf] }
  0x12   : > { %2376 = vmatprep.subr.bf16.mxu0 %v2670_v0  ;;  %2382 = vmatprep.subr.bf16.mxu1 %v2670_v0  ;;  %v353_v12 = vld [vmem:[%s2730_s22 + $0x14] sm:$0xf]  ;;  %v334_v13 = vld [vmem:[%s2740_s25 + $0x8] sm:$0xf]  ;;  %v335_v14 = vld [vmem:[%s2740_s25 + $0xc] sm:$0xf] }
  0x13   : > { %v569_v15 = vsel %vm380_vm1, %v352_v11, 0  ;;  %v615_v16 = vsel %vm380_vm1, %v353_v12, 0  ;;  %v354_v17 = vld [vmem:[%s2730_s22 + $0x18] sm:$0xf]  ;;  %v355_v18 = vld [vmem:[%s2730_s22 + $0x1c] sm:$0xf] }
  0x14   : > { %v336_v19 = vld [vmem:[%s2740_s25 + $0x10] sm:$0xf]  ;;  %v337_v20 = vld [vmem:[%s2740_s25 + $0x14] sm:$0xf]  ;;  %v661_v21 = vsel %vm380_vm1, %v354_v17, 0  ;;  %v707_v22 = vsel %vm380_vm1, %v355_v18, 0 }
  0x15   : > { %v356_v23 = vld [vmem:[%s2730_s22 + $0x20] sm:$0xf]  ;;  %v357_v24 = vld [vmem:[%s2730_s22 + $0x24] sm:$0xf]  ;;  %v338_v25 = vld [vmem:[%s2740_s25 + $0x18] sm:$0xf] }
  0x16   : > { %v339_v26 = vld [vmem:[%s2740_s25 + $0x1c] sm:$0xf]  ;;  %v753_v27 = vsel %vm380_vm1, %v356_v23, 0  ;;  %v799_v28 = vsel %vm380_vm1, %v357_v24, 0  ;;  %v358_v29 = vld [vmem:[%s2730_s22 + $0x28] sm:$0xf] }
  0x17   : > { %v359_v30 = vld [vmem:[%s2730_s22 + $0x2c] sm:$0xf]  ;;  %v340_v31 = vld [vmem:[%s2740_s25 + $0x20] sm:$0xf]  ;;  %v341_v32 = vld [vmem:[%s2740_s25 + $0x24] sm:$0xf] }
  0x18   : > { %2367 = vmatmul.mubr.msk.bf16.vlgmr.msra.gmra.mxu0 %vm380_vm1, %v332_v7  ;;  %2373 = vmatmul.mubr.msk.bf16.vlgmr.msra.gmra.mxu1 %vm380_vm1, %v333_v8  ;;  %v845_v33 = vsel %vm380_vm1, %v358_v29, 0  ;;  %v891_v34 = vsel %vm380_vm1, %v359_v30, 0  ;;  %v360_v35 = vld [vmem:[%s2730_s22 + $0x30] sm:$0xf]  ;;  %v361_v36 = vld [vmem:[%s2730_s22 + $0x34] sm:$0xf] }
  0x19   : > { %2377 = vmatpush3.bf16.xpose.msra.mxu0 %v477_v9  ;;  %2383 = vmatpush3.bf16.xpose.msra.mxu1 %v523_v10  ;;  %v342_v37 = vld [vmem:[%s2740_s25 + $0x28] sm:$0xf]  ;;  %v343_v38 = vld [vmem:[%s2740_s25 + $0x2c] sm:$0xf]  ;;  %v937_v39 = vsel %vm380_vm1, %v360_v35, 0  ;;  %v983_v40 = vsel %vm380_vm1, %v361_v36, 0 }
  0x1a   : > { %2378 = vmatprep.mubr.msk.bf16.mxu0 %vm2671_vm0, %v2670_v0  ;;  %2384 = vmatprep.mubr.msk.bf16.mxu1 %vm2671_vm0, %v2670_v0  ;;  %v362_v41 = vld [vmem:[%s2730_s22 + $0x38] sm:$0xf]  ;;  %v363_v42 = vld [vmem:[%s2730_s22 + $0x3c] sm:$0xf]  ;;  %v344_v43 = vld [vmem:[%s2740_s25 + $0x30] sm:$0xf] }
  0x1b   : > { %2388 = vmatprep.subr.bf16.mxu0 %v2670_v0  ;;  %2394 = vmatprep.subr.bf16.mxu1 %v2670_v0  ;;  %v345_v44 = vld [vmem:[%s2740_s25 + $0x34] sm:$0xf]  ;;  %v1029_v45 = vsel %vm380_vm1, %v362_v41, 0  ;;  %v1075_v46 = vsel %vm380_vm1, %v363_v42, 0  ;;  %v346_v47 = vld [vmem:[%s2740_s25 + $0x38] sm:$0xf] }
  0x1c   : > { %v347_v48 = vld [vmem:[%s2740_s25 + $0x3c] sm:$0xf]  ;;  %v1135_v4 = vld [vmem:[%s3246_s3 + $0x10] sm:$0xff]  ;;  %s2299_s19 = sshll.u32 %s3253_s15, 7 }
  0x1d   : > { %v1136_v5 = vld [vmem:[%s3246_s3 + $0x18] sm:$0xff]  ;;  %s3200_s21 = scalar_lea.vmem %s3247_s4, %s2299_s19 }
  0x1e   : > { %v1140_v36 = vld [vmem:[%s3246_s3 + $0x38] sm:$0xff] }
  0x20   : > { %2379 = vmatmul.mubr.msk.bf16.vlgmr.msra.gmra.mxu0 %vm380_vm1, %v334_v13  ;;  %2385 = vmatmul.mubr.msk.bf16.vlgmr.msra.gmra.mxu1 %vm380_vm1, %v335_v14 }
  0x21   : > { %2389 = vmatpush3.bf16.xpose.msra.mxu0 %v569_v15  ;;  %2395 = vmatpush3.bf16.xpose.msra.mxu1 %v615_v16 }
  0x22   : > { %2390 = vmatprep.mubr.msk.bf16.mxu0 %vm2671_vm0, %v2670_v0  ;;  %2396 = vmatprep.mubr.msk.bf16.mxu1 %vm2671_vm0, %v2670_v0 }
  0x23   : > { %2400 = vmatprep.subr.bf16.mxu0 %v2670_v0  ;;  %2406 = vmatprep.subr.bf16.mxu1 %v2670_v0 }
  0x28   : > { %2391 = vmatmul.mubr.msk.bf16.vlgmr.msra.gmra.mxu0 %vm380_vm1, %v336_v19  ;;  %2397 = vmatmul.mubr.msk.bf16.vlgmr.msra.gmra.mxu1 %vm380_vm1, %v337_v20  ;;  %v1138_v20 = vld [vmem:[%s3246_s3 + $0x28] sm:$0xff] }
  0x29   : > { %2401 = vmatpush3.bf16.xpose.msra.mxu0 %v661_v21  ;;  %2407 = vmatpush3.bf16.xpose.msra.mxu1 %v707_v22  ;;  %v1137_v21 = vld [vmem:[%s3246_s3 + $0x20] sm:$0xff] }
  0x2a   : > { %2402 = vmatprep.mubr.msk.bf16.mxu0 %vm2671_vm0, %v2670_v0  ;;  %2408 = vmatprep.mubr.msk.bf16.mxu1 %vm2671_vm0, %v2670_v0 }
  0x2b   : > { %2412 = vmatprep.subr.bf16.mxu0 %v2670_v0  ;;  %2418 = vmatprep.subr.bf16.mxu1 %v2670_v0 }
  0x30   : > { %2403 = vmatmul.mubr.msk.bf16.vlgmr.msra.gmra.mxu0 %vm380_vm1, %v338_v25  ;;  %2409 = vmatmul.mubr.msk.bf16.vlgmr.msra.gmra.mxu1 %vm380_vm1, %v339_v26 }
  0x31   : > { %2413 = vmatpush3.bf16.xpose.msra.mxu0 %v753_v27  ;;  %2419 = vmatpush3.bf16.xpose.msra.mxu1 %v799_v28 }
  0x32   : > { %2414 = vmatprep.mubr.msk.bf16.mxu0 %vm2671_vm0, %v2670_v0  ;;  %2420 = vmatprep.mubr.msk.bf16.mxu1 %vm2671_vm0, %v2670_v0 }
  0x33   : > { %2424 = vmatprep.subr.bf16.mxu0 %v2670_v0  ;;  %2430 = vmatprep.subr.bf16.mxu1 %v2670_v0 }
  0x38   : > { %2415 = vmatmul.mubr.msk.bf16.vlgmr.msra.gmra.mxu0 %vm380_vm1, %v340_v31  ;;  %2421 = vmatmul.mubr.msk.bf16.vlgmr.msra.gmra.mxu1 %vm380_vm1, %v341_v32 }
  0x39   : > { %2425 = vmatpush3.bf16.xpose.msra.mxu0 %v845_v33  ;;  %2431 = vmatpush3.bf16.xpose.msra.mxu1 %v891_v34 }
  0x3a   : > { %2426 = vmatprep.mubr.msk.bf16.mxu0 %vm2671_vm0, %v2670_v0  ;;  %2432 = vmatprep.mubr.msk.bf16.mxu1 %vm2671_vm0, %v2670_v0 }
  0x3b   : > { %2436 = vmatprep.subr.bf16.mxu0 %v2670_v0  ;;  %2442 = vmatprep.subr.bf16.mxu1 %v2670_v0 }
  0x40   : > { %2427 = vmatmul.mubr.msk.bf16.vlgmr.msra.gmra.mxu0 %vm380_vm1, %v342_v37  ;;  %2433 = vmatmul.mubr.msk.bf16.vlgmr.msra.gmra.mxu1 %vm380_vm1, %v343_v38  ;;  %v1139_v37 = vld [vmem:[%s3246_s3 + $0x30] sm:$0xff] }
  0x41   : > { %2437 = vmatpush3.bf16.xpose.msra.mxu0 %v937_v39  ;;  %2443 = vmatpush3.bf16.xpose.msra.mxu1 %v983_v40 }
  0x42   : > { %2438 = vmatprep.mubr.msk.bf16.mxu0 %vm2671_vm0, %v2670_v0  ;;  %2444 = vmatprep.mubr.msk.bf16.mxu1 %vm2671_vm0, %v2670_v0 }
  0x43   : > { %2448 = vmatprep.subr.bf16.mxu0 %v2670_v0  ;;  %2454 = vmatprep.subr.bf16.mxu1 %v2670_v0 }
  0x48   : > { %2439 = vmatmul.mubr.msk.bf16.vlgmr.msra.gmra.mxu0 %vm380_vm1, %v344_v43  ;;  %2445 = vmatmul.mubr.msk.bf16.vlgmr.msra.gmra.mxu1 %vm380_vm1, %v345_v44 }
  0x49   : > { %2449 = vmatpush3.bf16.xpose.msra.mxu0 %v1029_v45  ;;  %2455 = vmatpush3.bf16.xpose.msra.mxu1 %v1075_v46 }
  0x4a   : > { %2450 = vmatprep.mubr.msk.bf16.mxu0 %vm2671_vm0, %v2670_v0  ;;  %2456 = vmatprep.mubr.msk.bf16.mxu1 %vm2671_vm0, %v2670_v0 }
  0x4b   : > { %2460 = vmatprep.subr.bf16.mxu0 %v2670_v0  ;;  %2466 = vmatprep.subr.bf16.mxu1 %v2670_v0 }
  0x50   : > { %2451 = vmatmul.mubr.msk.bf16.vlgmr.msra.gmra.mxu0 %vm380_vm1, %v346_v47  ;;  %2457 = vmatmul.mubr.msk.bf16.vlgmr.msra.gmra.mxu1 %vm380_vm1, %v347_v48 }
  0x51   : > { %2462 = vmatprep.mubr.msk.bf16.mxu0 %vm2671_vm0, %v2670_v0  ;;  %2468 = vmatprep.mubr.msk.bf16.mxu1 %vm2671_vm0, %v2670_v0 }
  0xd8   : > { %v421_v49 = vpop.f32.mrf.mxu0  ;;  %v467_v50 = vpop.f32.mrf.mxu1 }
  0xd9   : > { %v1117_v53 = vmul.f32 0.35355338, %v421_v49  ;;  %v1118_v54 = vmul.f32 0.35355338, %v467_v50 }
  0xda   : > { %v2368_v55 = vpop.f32.mrf.mxu0  ;;  %v2374_v56 = vpop.f32.mrf.mxu1 }
  0xdb   : > { %v2856_v57 = vadd.f32 %v1133_v51, %v1117_v53  ;;  %v2858_v58 = vadd.f32 %v1134_v52, %v1118_v54  ;;  %v1142_v52 = vld [vmem:[%s3246_s3 + $0x48] sm:$0xff]  ;;  %v1141_v53 = vld [vmem:[%s3246_s3 + $0x40] sm:$0xff] }
  0xdc   : > { %v424_v59 = vpop.f32.mrf.mxu0  ;;  %v470_v60 = vpop.f32.mrf.mxu1 }
  0xdd   : > { %v1165_v61 = vsel %vm380_vm1, %v2856_v57, -inf  ;;  %v1168_v1 = vsel %vm380_vm1, %v2858_v58, -inf }
  0xde   : > { %v2375_v62 = vpop.f32.mrf.mxu1  ;;  %1166 = vmax.xlane.f32.xlu0 %v1165_v61  ;;  %v2369_v63 = vpop.f32.mrf.mxu0 }
  0xe0   : > { %v513_v2 = vpop.f32.mrf.mxu0  ;;  %v559_v3 = vpop.f32.mrf.mxu1 }
  0xe1   : > { %v1119_v6 = vmul.f32 0.35355338, %v513_v2  ;;  %v1120_v7 = vmul.f32 0.35355338, %v559_v3 }
  0xe2   : > { %v2386_v8 = vpop.f32.mrf.mxu1  ;;  %1169 = vmax.xlane.f32.xlu0 %v1168_v1  ;;  %v2380_v9 = vpop.f32.mrf.mxu0 }
  0xe3   : > { %v2870_v10 = vadd.f32 %v1135_v4, %v1119_v6  ;;  %v2872_v11 = vadd.f32 %v1136_v5, %v1120_v7  ;;  %v1144_v7 = vld [vmem:[%s3246_s3 + $0x58] sm:$0xff]  ;;  %v1143_v8 = vld [vmem:[%s3246_s3 + $0x50] sm:$0xff] }
  0xe4   : > { %v516_v12 = vpop.f32.mrf.mxu0  ;;  %v562_v13 = vpop.f32.mrf.mxu1 }
  0xe5   : > { %v1171_v14 = vsel %vm380_vm1, %v2870_v10, -inf  ;;  %v1174_v17 = vsel %vm380_vm1, %v2872_v11, -inf }
  0xe6   : > { %v2387_v15 = vpop.f32.mrf.mxu1  ;;  %1172 = vmax.xlane.f32.xlu1 %v1171_v14  ;;  %v2381_v16 = vpop.f32.mrf.mxu0 }
  0xe8   : > { %v605_v18 = vpop.f32.mrf.mxu0  ;;  %v651_v19 = vpop.f32.mrf.mxu1 }
  0xe9   : > { %v1121_v22 = vmul.f32 0.35355338, %v605_v18  ;;  %v1122_v23 = vmul.f32 0.35355338, %v651_v19 }
  0xea   : > { %v2398_v24 = vpop.f32.mrf.mxu1  ;;  %1175 = vmax.xlane.f32.xlu1 %v1174_v17  ;;  %v2392_v25 = vpop.f32.mrf.mxu0 }
  0xeb   : > { %v2884_v26 = vadd.f32 %v1138_v20, %v1122_v23  ;;  %v2886_v27 = vadd.f32 %v1137_v21, %v1121_v22  ;;  %v1146_v25 = vld [vmem:[%s3246_s3 + $0x68] sm:$0xff] }
  0xec   : > { %v608_v28 = vpop.f32.mrf.mxu0  ;;  %v654_v29 = vpop.f32.mrf.mxu1 }
  0xed   : > { %v1180_v30 = vsel %vm380_vm1, %v2884_v26, -inf  ;;  %v1177_v31 = vsel %vm380_vm1, %v2886_v27, -inf  ;;  %v1145_v28 = vld [vmem:[%s3246_s3 + $0x60] sm:$0xff] }
  0xee   : > { %v2399_v32 = vpop.f32.mrf.mxu1  ;;  %1181 = vmax.xlane.f32.xlu1 %v1180_v30  ;;  %1178 = vmax.xlane.f32.xlu0 %v1177_v31  ;;  %v2393_v33 = vpop.f32.mrf.mxu0 }
  0xf0   : > { %v697_v34 = vpop.f32.mrf.mxu0  ;;  %v743_v35 = vpop.f32.mrf.mxu1 }
  0xf1   : > { %v1123_v38 = vmul.f32 0.35355338, %v697_v34  ;;  %v1124_v39 = vmul.f32 0.35355338, %v743_v35 }
  0xf2   : > { %v2404_v40 = vpop.f32.mrf.mxu0  ;;  %v2410_v41 = vpop.f32.mrf.mxu1 }
  0xf3   : > { %v2898_v42 = vadd.f32 %v1140_v36, %v1124_v39  ;;  %v2900_v43 = vadd.f32 %v1139_v37, %v1123_v38 }
  0xf4   : > { %v700_v44 = vpop.f32.mrf.mxu0  ;;  %v746_v45 = vpop.f32.mrf.mxu1 }
  0xf5   : > { %v1186_v46 = vsel %vm380_vm1, %v2898_v42, -inf  ;;  %v1183_v47 = vsel %vm380_vm1, %v2900_v43, -inf  ;;  %v1148_v45 = vld [vmem:[%s3246_s3 + $0x78] sm:$0xff] }
  0xf6   : > { %v2411_v48 = vpop.f32.mrf.mxu1  ;;  %1187 = vmax.xlane.f32.xlu1 %v1186_v46  ;;  %1184 = vmax.xlane.f32.xlu0 %v1183_v47  ;;  %v2405_v49 = vpop.f32.mrf.mxu0  ;;  %v1147_v46 = vld [vmem:[%s3246_s3 + $0x70] sm:$0xff] }
  0xf8   : > { %v789_v50 = vpop.f32.mrf.mxu0  ;;  %v835_v51 = vpop.f32.mrf.mxu1 }
  0xf9   : > { %v1125_v54 = vmul.f32 0.35355338, %v789_v50  ;;  %v1126_v55 = vmul.f32 0.35355338, %v835_v51 }
  0xfa   : > { %v2416_v56 = vpop.f32.mrf.mxu0  ;;  %v2422_v59 = vpop.f32.mrf.mxu1 }
  0xfb   : > { %v2912_v60 = vadd.f32 %v1142_v52, %v1126_v55  ;;  %v2914_v61 = vadd.f32 %v1141_v53, %v1125_v54 }
  0xfc   : > { %v792_v62 = vpop.f32.mrf.mxu0  ;;  %v838_v63 = vpop.f32.mrf.mxu1 }
  0xfd   : > { %v1192_v1 = vsel %vm380_vm1, %v2912_v60, -inf  ;;  %v1189_v2 = vsel %vm380_vm1, %v2914_v61, -inf }
  0xfe   : > { %v2423_v3 = vpop.f32.mrf.mxu1  ;;  %1193 = vmax.xlane.f32.xlu1 %v1192_v1  ;;  %1190 = vmax.xlane.f32.xlu0 %v1189_v2  ;;  %v2417_v4 = vpop.f32.mrf.mxu0 }
 0x100   : > { %v881_v5 = vpop.f32.mrf.mxu0  ;;  %v927_v6 = vpop.f32.mrf.mxu1 }
 0x101   : > { %v1127_v9 = vmul.f32 0.35355338, %v881_v5  ;;  %v1128_v12 = vmul.f32 0.35355338, %v927_v6 }
 0x102   : > { %v2428_v13 = vpop.f32.mrf.mxu0  ;;  %v2434_v14 = vpop.f32.mrf.mxu1 }
 0x103   : > { %v2926_v15 = vadd.f32 %v1144_v7, %v1128_v12  ;;  %v2928_v16 = vadd.f32 %v1143_v8, %v1127_v9 }
 0x104   : > { %v884_v17 = vpop.f32.mrf.mxu0  ;;  %v930_v18 = vpop.f32.mrf.mxu1 }
 0x105   : > { %v1198_v19 = vsel %vm380_vm1, %v2926_v15, -inf  ;;  %v1195_v20 = vsel %vm380_vm1, %v2928_v16, -inf }
 0x106   : > { %v2435_v21 = vpop.f32.mrf.mxu1  ;;  %1199 = vmax.xlane.f32.xlu1 %v1198_v19  ;;  %1196 = vmax.xlane.f32.xlu0 %v1195_v20  ;;  %v2429_v22 = vpop.f32.mrf.mxu0 }
 0x108   : > { %v973_v23 = vpop.f32.mrf.mxu0  ;;  %v1019_v24 = vpop.f32.mrf.mxu1 }
 0x109   : > { %v1129_v29 = vmul.f32 0.35355338, %v973_v23  ;;  %v1130_v30 = vmul.f32 0.35355338, %v1019_v24 }
 0x10a   : > { %v2440_v31 = vpop.f32.mrf.mxu0  ;;  %v2446_v32 = vpop.f32.mrf.mxu1 }
 0x10b   : > { %v2940_v33 = vadd.f32 %v1146_v25, %v1130_v30  ;;  %v2942_v34 = vadd.f32 %v1145_v28, %v1129_v29 }
 0x10c   : > { %v976_v35 = vpop.f32.mrf.mxu0  ;;  %v1022_v36 = vpop.f32.mrf.mxu1 }
 0x10d   : > { %v1204_v37 = vsel %vm380_vm1, %v2940_v33, -inf  ;;  %v1201_v38 = vsel %vm380_vm1, %v2942_v34, -inf }
 0x10e   : > { %v2447_v39 = vpop.f32.mrf.mxu1  ;;  %1205 = vmax.xlane.f32.xlu1 %v1204_v37  ;;  %1202 = vmax.xlane.f32.xlu0 %v1201_v38  ;;  %v2441_v40 = vpop.f32.mrf.mxu0 }
 0x110   : > { %v1065_v41 = vpop.f32.mrf.mxu0  ;;  %v1111_v44 = vpop.f32.mrf.mxu1 }
 0x111   : > { %v1131_v47 = vmul.f32 0.35355338, %v1065_v41  ;;  %v1132_v48 = vmul.f32 0.35355338, %v1111_v44 }
 0x112   : > { %v2452_v49 = vpop.f32.mrf.mxu0  ;;  %v2458_v50 = vpop.f32.mrf.mxu1 }
 0x113   : > { %v2954_v51 = vadd.f32 %v1148_v45, %v1132_v48  ;;  %v2956_v52 = vadd.f32 %v1147_v46, %v1131_v47 }
 0x114   : > { %v1068_v53 = vpop.f32.mrf.mxu0  ;;  %v1114_v54 = vpop.f32.mrf.mxu1 }
 0x115   : > { %v1210_v55 = vsel %vm380_vm1, %v2954_v51, -inf  ;;  %v1207_v56 = vsel %vm380_vm1, %v2956_v52, -inf  ;;  %v365_v53 = vld [vmem:[%s3004_s13 + $0x4] sm:$0xf] }
 0x116   : > { %v2459_v59 = vpop.f32.mrf.mxu1  ;;  %1211 = vmax.xlane.f32.xlu1 %v1210_v55  ;;  %1208 = vmax.xlane.f32.xlu0 %v1207_v56  ;;  %v2453_v62 = vpop.f32.mrf.mxu0  ;;  %v1408_v55 = vsel %vm1360_vm2, %v365_v53, 0  ;;  %v378_v53 = vld [vmem:[%s3004_s13 + $0x38] sm:$0xf] }
 0x117   : > { %2467 = vmatpush3.bf16.msra.mxu1 %v1408_v55  ;;  %v3105_v55 = vsel %vm1360_vm2, %v378_v53, 0 }
 0x118   : > { %2478 = vmatprep.subr.bf16.mxu1 %v2670_v0 }
 0x167   : > { %v1167_v63 = vpop.xlane.xlu0 %1166 }
 0x168   : > { %v1213_v1 = vsub.f32 %v2856_v57, %v1167_v63 }
 0x16a   : > { %v1229_v2 = vmul.f32 1.442695, %v1213_v1 }
 0x16b   : > { %v1170_v3 = vpop.xlane.xlu0 %1169 }
 0x16c   : > { %2582 = vpow2.f32 %v1229_v2  ;;  %v1214_v4 = vsub.f32 %v2858_v58, %v1170_v3 }
 0x16e   : > { %v1231_v5 = vmul.f32 1.442695, %v1214_v4 }
 0x16f   : > { %v1173_v6 = vpop.xlane.xlu1 %1172 }
 0x170   : > { %2584 = vpow2.f32 %v1231_v5  ;;  %v1215_v7 = vsub.f32 %v2870_v10, %v1173_v6 }
 0x172   : > { %v1233_v8 = vmul.f32 1.442695, %v1215_v7  ;;  %v367_v7 = vld [vmem:[%s3004_s13 + $0xc] sm:$0xf] }
 0x173   : > { %v1176_v9 = vpop.xlane.xlu1 %1175 }
 0x174   : > { %2586 = vpow2.f32 %v1233_v8  ;;  %v1216_v12 = vsub.f32 %v2872_v11, %v1176_v9  ;;  %v366_v8 = vld [vmem:[%s3004_s13 + $0x8] sm:$0xf] }
 0x176   : > { %v1235_v13 = vmul.f32 1.442695, %v1216_v12 }
 0x177   : > { %v1182_v14 = vpop.xlane.xlu1 %1181  ;;  %v1179_v17 = vpop.xlane.xlu0 %1178 }
 0x178   : > { %2588 = vpow2.f32 %v1235_v13  ;;  %v1218_v57 = vsub.f32 %v2884_v26, %v1182_v14  ;;  %v1217_v18 = vsub.f32 %v2886_v27, %v1179_v17 }
 0x179   : > { %v2968_v19 = vpop.eup %2582 }
 0x17a   : > { %v1239_v58 = vmul.f32 1.442695, %v1218_v57  ;;  %v1237_v20 = vmul.f32 1.442695, %v1217_v18  ;;  %v1261_v10 = vsel %vm380_vm1, %v2968_v19, 0.0 }
 0x17b   : > { %1262 = vadd.xlane.f32.xlu0 %v1261_v10 }
 0x17c   : > { %2590 = vpow2.f32 %v1239_v58 }
 0x17d   : > { %v2972_v21 = vpop.eup %2584  ;;  %2592 = vpow2.f32 %v1237_v20 }
 0x17e   : > { %v1264_v11 = vsel %vm380_vm1, %v2972_v21, 0.0 }
 0x17f   : > { %1265 = vadd.xlane.f32.xlu1 %v1264_v11  ;;  %v1188_v22 = vpop.xlane.xlu1 %1187  ;;  %v1185_v26 = vpop.xlane.xlu0 %1184  ;;  %v369_v11 = vld [vmem:[%s3004_s13 + $0x14] sm:$0xf] }
 0x180   : > { %v1220_v27 = vsub.f32 %v2898_v42, %v1188_v22  ;;  %v1219_v23 = vsub.f32 %v2900_v43, %v1185_v26  ;;  %v368_v22 = vld [vmem:[%s3004_s13 + $0x10] sm:$0xf] }
 0x181   : > { %v2978_v24 = vpop.eup %2586 }
 0x182   : > { %v1243_v25 = vmul.f32 1.442695, %v1220_v27  ;;  %v1241_v28 = vmul.f32 1.442695, %v1219_v23  ;;  %v1267_v29 = vsel %vm380_vm1, %v2978_v24, 0.0 }
 0x183   : > { %1268 = vadd.xlane.f32.xlu0 %v1267_v29  ;;  %v370_v29 = vld [vmem:[%s3004_s13 + $0x18] sm:$0xf] }
 0x184   : > { %2594 = vpow2.f32 %v1243_v25 }
 0x185   : > { %v2982_v30 = vpop.eup %2588  ;;  %2596 = vpow2.f32 %v1241_v28  ;;  %v371_v28 = vld [vmem:[%s3004_s13 + $0x1c] sm:$0xf] }
 0x186   : > { %v1270_v31 = vsel %vm380_vm1, %v2982_v30, 0.0 }
 0x187   : > { %1271 = vadd.xlane.f32.xlu1 %v1270_v31  ;;  %v1194_v32 = vpop.xlane.xlu1 %1193  ;;  %v1191_v42 = vpop.xlane.xlu0 %1190  ;;  %v3065_v31 = vsel %vm1360_vm2, %v371_v28, 0 }
 0x188   : > { %v1222_v43 = vsub.f32 %v2912_v60, %v1194_v32  ;;  %v1221_v35 = vsub.f32 %v2914_v61, %v1191_v42  ;;  %v3068_v32 = vsel %vm1360_vm2, %v370_v29, 0 }
 0x189   : > { %v2988_v36 = vpop.eup %2590 }
 0x18a   : > { %v2990_v37 = vpop.eup %2592  ;;  %v1247_v38 = vmul.f32 1.442695, %v1222_v43  ;;  %v1245_v39 = vmul.f32 1.442695, %v1221_v35  ;;  %v1276_v40 = vsel %vm380_vm1, %v2988_v36, 0.0 }
 0x18b   : > { %1277 = vadd.xlane.f32.xlu1 %v1276_v40  ;;  %v1273_v41 = vsel %vm380_vm1, %v2990_v37, 0.0  ;;  %v372_v40 = vld [vmem:[%s3004_s13 + $0x20] sm:$0xf] }
 0x18c   : > { %2598 = vpow2.f32 %v1247_v38  ;;  %1274 = vadd.xlane.f32.xlu0 %v1273_v41 }
 0x18d   : > { %2600 = vpow2.f32 %v1245_v39  ;;  %v373_v39 = vld [vmem:[%s3004_s13 + $0x24] sm:$0xf] }
 0x18e   : > { %v3081_v41 = vsel %vm1360_vm2, %v373_v39, 0 }
 0x18f   : > { %v1200_v60 = vpop.xlane.xlu1 %1199  ;;  %v1197_v44 = vpop.xlane.xlu0 %1196 }
 0x190   : > { %v1224_v61 = vsub.f32 %v2926_v15, %v1200_v60  ;;  %v1223_v45 = vsub.f32 %v2928_v16, %v1197_v44  ;;  %v364_v16 = vld [vmem:[%s3004_s13] sm:$0xf]  ;;  %v3084_v60 = vsel %vm1360_vm2, %v372_v40, 0  ;;  %v375_v44 = vld [vmem:[%s3004_s13 + $0x2c] sm:$0xf] }
 0x191   : > { %v2998_v46 = vpop.eup %2594  ;;  %v1362_v54 = vsel %vm1360_vm2, %v364_v16, 0 }
 0x192   : > { %v3006_v47 = vpop.eup %2596  ;;  %v1251_v48 = vmul.f32 1.442695, %v1224_v61  ;;  %v1249_v49 = vmul.f32 1.442695, %v1223_v45  ;;  %v1282_v50 = vsel %vm380_vm1, %v2998_v46, 0.0  ;;  %2461 = vmatpush3.bf16.msra.mxu0 %v1362_v54  ;;  %v3089_v45 = vsel %vm1360_vm2, %v375_v44, 0 }
 0x193   : > { %1283 = vadd.xlane.f32.xlu1 %v1282_v50  ;;  %v1279_v15 = vsel %vm380_vm1, %v3006_v47, 0.0  ;;  %2472 = vmatprep.subr.bf16.mxu0 %v2670_v0  ;;  %v374_v61 = vld [vmem:[%s3004_s13 + $0x28] sm:$0xf]  ;;  %v377_v50 = vld [vmem:[%s3004_s13 + $0x34] sm:$0xf] }
 0x194   : > { %2602 = vpow2.f32 %v1251_v48  ;;  %1280 = vadd.xlane.f32.xlu0 %v1279_v15  ;;  %v3092_v48 = vsel %vm1360_vm2, %v374_v61, 0  ;;  %v3100_v16 = vsel %vm1360_vm2, %v377_v50, 0  ;;  %v379_v54 = vld [vmem:[%s3004_s13 + $0x3c] sm:$0xf] }
 0x195   : > { %2604 = vpow2.f32 %v1249_v49  ;;  %v376_v49 = vld [vmem:[%s3004_s13 + $0x30] sm:$0xf] }
 0x196   : > { %v3097_v15 = vsel %vm1360_vm2, %v376_v49, 0 }
 0x197   : > { %v1206_v56 = vpop.xlane.xlu1 %1205  ;;  %v1203_v59 = vpop.xlane.xlu0 %1202 }
 0x198   : > { %v1226_v62 = vsub.f32 %v2940_v33, %v1206_v56  ;;  %v1225_v63 = vsub.f32 %v2942_v34, %v1203_v59  ;;  %v3031_v33 = vsel %vm1360_vm2, %v367_v7, 0  ;;  %v3034_v34 = vsel %vm1360_vm2, %v366_v8, 0 }
 0x199   : > { %v3020_v1 = vpop.eup %2598  ;;  %v3108_v56 = vsel %vm1360_vm2, %v379_v54, 0 }
 0x19a   : > { %v3022_v2 = vpop.eup %2600  ;;  %v1255_v3 = vmul.f32 1.442695, %v1226_v62  ;;  %v1253_v4 = vmul.f32 1.442695, %v1225_v63  ;;  %v1288_v5 = vsel %vm380_vm1, %v3020_v1, 0.0 }
 0x19b   : > { %1289 = vadd.xlane.f32.xlu1 %v1288_v5  ;;  %v1285_v6 = vsel %vm380_vm1, %v3022_v2, 0.0 }
 0x19c   : > { %2606 = vpow2.f32 %v1255_v3  ;;  %1286 = vadd.xlane.f32.xlu0 %v1285_v6 }
 0x19d   : > { %2608 = vpow2.f32 %v1253_v4 }
 0x19f   : > { %v1212_v9 = vpop.xlane.xlu1 %1211  ;;  %v1209_v12 = vpop.xlane.xlu0 %1208 }
 0x1a0   : > { %v1228_v13 = vsub.f32 %v2954_v51, %v1212_v9  ;;  %v1227_v14 = vsub.f32 %v2956_v52, %v1209_v12  ;;  %v3049_v51 = vsel %vm1360_vm2, %v369_v11, 0  ;;  %v3052_v52 = vsel %vm1360_vm2, %v368_v22, 0 }
 0x1a1   : > { %v3038_v17 = vpop.eup %2602 }
 0x1a2   : > { %v3040_v57 = vpop.eup %2604  ;;  %v1259_v18 = vmul.f32 1.442695, %v1228_v13  ;;  %v1257_v58 = vmul.f32 1.442695, %v1227_v14  ;;  %v1294_v20 = vsel %vm380_vm1, %v3038_v17, 0.0 }
 0x1a3   : > { %1295 = vadd.xlane.f32.xlu1 %v1294_v20  ;;  %v1291_v10 = vsel %vm380_vm1, %v3040_v57, 0.0 }
 0x1a4   : > { %2610 = vpow2.f32 %v1259_v18  ;;  %1292 = vadd.xlane.f32.xlu0 %v1291_v10 }
 0x1a5   : > { %2612 = vpow2.f32 %v1257_v58 }
 0x1a9   : > { %v3054_v26 = vpop.eup %2606 }
 0x1aa   : > { %v3056_v27 = vpop.eup %2608  ;;  %v1300_v23 = vsel %vm380_vm1, %v3054_v26, 0.0 }
 0x1ab   : > { %1301 = vadd.xlane.f32.xlu1 %v1300_v23  ;;  %v1297_v25 = vsel %vm380_vm1, %v3056_v27, 0.0 }
 0x1ac   : > { %1298 = vadd.xlane.f32.xlu0 %v1297_v25 }
 0x1b1   : > { %v3070_v42 = vpop.eup %2610 }
 0x1b2   : > { %v3072_v43 = vpop.eup %2612  ;;  %v1306_v35 = vsel %vm380_vm1, %v3070_v42, 0.0 }
 0x1b3   : > { %1307 = vadd.xlane.f32.xlu1 %v1306_v35  ;;  %v1303_v38 = vsel %vm380_vm1, %v3072_v43, 0.0 }
 0x1b4   : > { %1304 = vadd.xlane.f32.xlu0 %v1303_v38 }
 0x204   : > { %v1263_v59 = vpop.xlane.xlu0 %1262 }
 0x205   : > { %2614 = vrcp.f32 %v1263_v59 }
 0x208   : > { %v1266_v62 = vpop.xlane.xlu1 %1265 }
 0x209   : > { %2616 = vrcp.f32 %v1266_v62 }
 0x20c   : > { %v1269_v63 = vpop.xlane.xlu0 %1268 }
 0x20d   : > { %2618 = vrcp.f32 %v1269_v63 }
 0x210   : > { %v1272_v3 = vpop.xlane.xlu1 %1271 }
 0x211   : > { %2620 = vrcp.f32 %v1272_v3 }
 0x212   : > { %v2615_v4 = vpop.eup %2614 }
 0x213   : > { %v1325_v5 = vmul.f32 %v2615_v4, %v2968_v19 }
 0x214   : > { %v1278_v6 = vpop.xlane.xlu1 %1277 }
 0x215   : > { %2622 = vrcp.f32 %v1278_v6  ;;  %v1275_v7 = vpop.xlane.xlu0 %1274  ;;  %v1341_v8 = vpack.c.bf16 %v1325_v5, %v1325_v5 }
 0x216   : > { %v2617_v9 = vpop.eup %2616  ;;  %2624 = vrcp.f32 %v1275_v7 }
 0x217   : > { %2463 = vmatmul.mubr.msk.bf16.vlgmr.msra.gmra.mxu0 %vm380_vm1, %v1341_v8  ;;  %v1326_v12 = vmul.f32 %v2617_v9, %v2972_v21 }
 0x218   : > { %2473 = vmatpush3.bf16.msra.mxu0 %v3034_v34  ;;  %2474 = vmatprep.mubr.msk.bf16.mxu0 %vm2671_vm0, %v2670_v0 }
 0x219   : > { %v1342_v13 = vpack.c.bf16 %v1326_v12, %v1326_v12  ;;  %2484 = vmatprep.subr.bf16.mxu0 %v2670_v0 }
 0x21a   : > { %v2619_v14 = vpop.eup %2618 }
 0x21b   : > { %2469 = vmatmul.mubr.msk.bf16.vlgmr.msra.gmra.mxu1 %vm380_vm1, %v1342_v13  ;;  %v1327_v19 = vmul.f32 %v2619_v14, %v2978_v24 }
 0x21c   : > { %2479 = vmatpush3.bf16.msra.mxu1 %v3031_v33  ;;  %v1284_v18 = vpop.xlane.xlu1 %1283  ;;  %2480 = vmatprep.mubr.msk.bf16.mxu1 %vm2671_vm0, %v2670_v0 }
 0x21d   : > { %2626 = vrcp.f32 %v1284_v18  ;;  %v1281_v21 = vpop.xlane.xlu0 %1280  ;;  %v1343_v34 = vpack.c.bf16 %v1327_v19, %v1327_v19  ;;  %2490 = vmatprep.subr.bf16.mxu1 %v2670_v0 }
 0x21e   : > { %v2621_v58 = vpop.eup %2620  ;;  %2628 = vrcp.f32 %v1281_v21 }
 0x21f   : > { %2475 = vmatmul.mubr.msk.bf16.vlgmr.msra.gmra.mxu0 %vm380_vm1, %v1343_v34  ;;  %v1328_v20 = vmul.f32 %v2621_v58, %v2982_v30 }
 0x220   : > { %2485 = vmatpush3.bf16.msra.mxu0 %v3052_v52  ;;  %2486 = vmatprep.mubr.msk.bf16.mxu0 %vm2671_vm0, %v2670_v0 }
 0x221   : > { %v1344_v24 = vpack.c.bf16 %v1328_v20, %v1328_v20  ;;  %2496 = vmatprep.subr.bf16.mxu0 %v2670_v0 }
 0x222   : > { %v2623_v33 = vpop.eup %2622 }
 0x223   : > { %v2625_v10 = vpop.eup %2624  ;;  %2481 = vmatmul.mubr.msk.bf16.vlgmr.msra.gmra.mxu1 %vm380_vm1, %v1344_v24  ;;  %v1330_v52 = vmul.f32 %v2623_v33, %v2988_v36 }
 0x224   : > { %2491 = vmatpush3.bf16.msra.mxu1 %v3049_v51  ;;  %v1290_v11 = vpop.xlane.xlu1 %1289  ;;  %v1329_v22 = vmul.f32 %v2625_v10, %v2990_v37  ;;  %2492 = vmatprep.mubr.msk.bf16.mxu1 %vm2671_vm0, %v2670_v0 }
 0x225   : > { %2630 = vrcp.f32 %v1290_v11  ;;  %v1287_v30 = vpop.xlane.xlu0 %1286  ;;  %2502 = vmatprep.subr.bf16.mxu1 %v2670_v0  ;;  %v1346_v25 = vpack.c.bf16 %v1330_v52, %v1330_v52 }
 0x226   : > { %2632 = vrcp.f32 %v1287_v30  ;;  %v1345_v23 = vpack.c.bf16 %v1329_v22, %v1329_v22 }
 0x228   : > { %2487 = vmatmul.mubr.msk.bf16.vlgmr.msra.gmra.mxu0 %vm380_vm1, %v1345_v23 }
 0x229   : > { %2497 = vmatpush3.bf16.msra.mxu0 %v3068_v32  ;;  %2498 = vmatprep.mubr.msk.bf16.mxu0 %vm2671_vm0, %v2670_v0 }
 0x22a   : > { %v2627_v37 = vpop.eup %2626  ;;  %2508 = vmatprep.subr.bf16.mxu0 %v2670_v0 }
 0x22b   : > { %v2629_v51 = vpop.eup %2628  ;;  %2493 = vmatmul.mubr.msk.bf16.vlgmr.msra.gmra.mxu1 %vm380_vm1, %v1346_v25  ;;  %v1332_v32 = vmul.f32 %v2627_v37, %v2998_v46 }
 0x22c   : > { %2503 = vmatpush3.bf16.msra.mxu1 %v3065_v31  ;;  %v1296_v36 = vpop.xlane.xlu1 %1295  ;;  %v1331_v28 = vmul.f32 %v2629_v51, %v3006_v47  ;;  %2504 = vmatprep.mubr.msk.bf16.mxu1 %vm2671_vm0, %v2670_v0 }
 0x22d   : > { %2634 = vrcp.f32 %v1296_v36  ;;  %v1293_v29 = vpop.xlane.xlu0 %1292  ;;  %2514 = vmatprep.subr.bf16.mxu1 %v2670_v0  ;;  %v1348_v38 = vpack.c.bf16 %v1332_v32, %v1332_v32 }
 0x22e   : > { %2636 = vrcp.f32 %v1293_v29  ;;  %v1347_v35 = vpack.c.bf16 %v1331_v28, %v1331_v28 }
 0x230   : > { %2499 = vmatmul.mubr.msk.bf16.vlgmr.msra.gmra.mxu0 %vm380_vm1, %v1347_v35 }
 0x231   : > { %2509 = vmatpush3.bf16.msra.mxu0 %v3084_v60  ;;  %2510 = vmatprep.mubr.msk.bf16.mxu0 %vm2671_vm0, %v2670_v0 }
 0x232   : > { %v2631_v47 = vpop.eup %2630  ;;  %2520 = vmatprep.subr.bf16.mxu0 %v2670_v0 }
 0x233   : > { %v2633_v31 = vpop.eup %2632  ;;  %2505 = vmatmul.mubr.msk.bf16.vlgmr.msra.gmra.mxu1 %vm380_vm1, %v1348_v38  ;;  %v1334_v60 = vmul.f32 %v2631_v47, %v3020_v1 }
 0x234   : > { %2515 = vmatpush3.bf16.msra.mxu1 %v3081_v41  ;;  %v1302_v46 = vpop.xlane.xlu1 %1301  ;;  %v1333_v39 = vmul.f32 %v2633_v31, %v3022_v2  ;;  %2516 = vmatprep.mubr.msk.bf16.mxu1 %vm2671_vm0, %v2670_v0 }
 0x235   : > { %2638 = vrcp.f32 %v1302_v46  ;;  %v1299_v40 = vpop.xlane.xlu0 %1298  ;;  %2526 = vmatprep.subr.bf16.mxu1 %v2670_v0  ;;  %v1350_v61 = vpack.c.bf16 %v1334_v60, %v1334_v60 }
 0x236   : > { %2640 = vrcp.f32 %v1299_v40  ;;  %v1349_v44 = vpack.c.bf16 %v1333_v39, %v1333_v39 }
 0x238   : > { %2511 = vmatmul.mubr.msk.bf16.vlgmr.msra.gmra.mxu0 %vm380_vm1, %v1349_v44 }
 0x239   : > { %2521 = vmatpush3.bf16.msra.mxu0 %v3092_v48  ;;  %2522 = vmatprep.mubr.msk.bf16.mxu0 %vm2671_vm0, %v2670_v0 }
 0x23a   : > { %v2635_v2 = vpop.eup %2634  ;;  %2532 = vmatprep.subr.bf16.mxu0 %v2670_v0 }
 0x23b   : > { %v2637_v41 = vpop.eup %2636  ;;  %2517 = vmatmul.mubr.msk.bf16.vlgmr.msra.gmra.mxu1 %vm380_vm1, %v1350_v61  ;;  %v1336_v48 = vmul.f32 %v2635_v2, %v3038_v17 }
 0x23c   : > { %2527 = vmatpush3.bf16.msra.mxu1 %v3089_v45  ;;  %v1308_v1 = vpop.xlane.xlu1 %1307  ;;  %v1335_v49 = vmul.f32 %v2637_v41, %v3040_v57  ;;  %2528 = vmatprep.mubr.msk.bf16.mxu1 %vm2671_vm0, %v2670_v0 }
 0x23d   : > { %2642 = vrcp.f32 %v1308_v1  ;;  %v1305_v50 = vpop.xlane.xlu0 %1304  ;;  %2538 = vmatprep.subr.bf16.mxu1 %v2670_v0  ;;  %v1352_v54 = vpack.c.bf16 %v1336_v48, %v1336_v48 }
 0x23e   : > { %2644 = vrcp.f32 %v1305_v50  ;;  %v1351_v53 = vpack.c.bf16 %v1335_v49, %v1335_v49 }
 0x240   : > { %2523 = vmatmul.mubr.msk.bf16.vlgmr.msra.gmra.mxu0 %vm380_vm1, %v1351_v53 }
 0x241   : > { %2533 = vmatpush3.bf16.msra.mxu0 %v3097_v15  ;;  %2534 = vmatprep.mubr.msk.bf16.mxu0 %vm2671_vm0, %v2670_v0 }
 0x242   : > { %v2639_v57 = vpop.eup %2638  ;;  %2544 = vmatprep.subr.bf16.mxu0 %v2670_v0 }
 0x243   : > { %v2641_v45 = vpop.eup %2640  ;;  %2529 = vmatmul.mubr.msk.bf16.vlgmr.msra.gmra.mxu1 %vm380_vm1, %v1352_v54  ;;  %v1338_v59 = vmul.f32 %v2639_v57, %v3054_v26 }
 0x244   : > { %2539 = vmatpush3.bf16.msra.mxu1 %v3100_v16  ;;  %v1337_v17 = vmul.f32 %v2641_v45, %v3056_v27  ;;  %2540 = vmatprep.mubr.msk.bf16.mxu1 %vm2671_vm0, %v2670_v0 }
 0x245   : > { %2550 = vmatprep.subr.bf16.mxu1 %v2670_v0  ;;  %v1354_v62 = vpack.c.bf16 %v1338_v59, %v1338_v59 }
 0x246   : > { %v1353_v15 = vpack.c.bf16 %v1337_v17, %v1337_v17 }
 0x248   : > { %2535 = vmatmul.mubr.msk.bf16.vlgmr.msra.gmra.mxu0 %vm380_vm1, %v1353_v15 }
 0x249   : > { %2545 = vmatpush3.bf16.msra.mxu0 %v3105_v55  ;;  %2546 = vmatprep.mubr.msk.bf16.mxu0 %vm2671_vm0, %v2670_v0 }
 0x24a   : > { %v2643_v16 = vpop.eup %2642 }
 0x24b   : > { %v2645_v63 = vpop.eup %2644  ;;  %2541 = vmatmul.mubr.msk.bf16.vlgmr.msra.gmra.mxu1 %vm380_vm1, %v1354_v62  ;;  %v1340_v27 = vmul.f32 %v2643_v16, %v3070_v42 }
 0x24c   : > { %2551 = vmatpush3.bf16.msra.mxu1 %v3108_v56  ;;  %v1339_v26 = vmul.f32 %v2645_v63, %v3072_v43  ;;  %2552 = vmatprep.mubr.msk.bf16.mxu1 %vm2671_vm0, %v2670_v0 }
 0x24d   : > { %v1356_v55 = vpack.c.bf16 %v1340_v27, %v1340_v27 }
 0x24e   : > { %v1355_v3 = vpack.c.bf16 %v1339_v26, %v1339_v26 }
 0x250   : > { %2547 = vmatmul.mubr.msk.bf16.vlgmr.msra.gmra.mxu0 %vm380_vm1, %v1355_v3 }
 0x253   : > { %2553 = vmatmul.mubr.msk.bf16.vlgmr.msra.gmra.mxu1 %vm380_vm1, %v1356_v55 }
 0x2d7   : > { %v1398_v43 = vpop.f32.mrf.mxu0 }
 0x2d8   : > { %2094 = vst.msk [vmem:[%s3200_s21] sm:$0xff] %vm380_vm1, %v1398_v43 }
 0x2d9   : > { %v2464_v0 = vpop.f32.mrf.mxu0 }
 0x2db   : > { %v1401_v42 = vpop.f32.mrf.mxu0  ;;  %v1444_v56 = vpop.f32.mrf.mxu1 }
 0x2dc   : > { %2095 = vst.msk [vmem:[%s3200_s21 + $0x8] sm:$0xff] %vm380_vm1, %v1444_v56 }
 0x2dd   : > { %v2465_v4 = vpop.f32.mrf.mxu0  ;;  %v2470_v5 = vpop.f32.mrf.mxu1 }
 0x2df   : > { %v1447_v6 = vpop.f32.mrf.mxu1  ;;  %v1490_v7 = vpop.f32.mrf.mxu0 }
 0x2e0   : > { %2096 = vst.msk [vmem:[%s3200_s21 + $0x10] sm:$0xff] %vm380_vm1, %v1490_v7 }
 0x2e1   : > { %v2471_v8 = vpop.f32.mrf.mxu1  ;;  %v2476_v9 = vpop.f32.mrf.mxu0 }
 0x2e3   : > { %v1493_v12 = vpop.f32.mrf.mxu0  ;;  %v1536_v13 = vpop.f32.mrf.mxu1 }
 0x2e4   : > { %2097 = vst.msk [vmem:[%s3200_s21 + $0x18] sm:$0xff] %vm380_vm1, %v1536_v13 }
 0x2e5   : > { %v2477_v14 = vpop.f32.mrf.mxu0  ;;  %v2482_v19 = vpop.f32.mrf.mxu1 }
 0x2e7   : > { %v1539_v18 = vpop.f32.mrf.mxu1 }
 0x2e8   : > { %v1582_v21 = vpop.f32.mrf.mxu0 }
 0x2e9   : > { %2098 = vst.msk [vmem:[%s3200_s21 + $0x20] sm:$0xff] %vm380_vm1, %v1582_v21  ;;  %v2483_v34 = vpop.f32.mrf.mxu1 }
 0x2ea   : > { %v2488_v58 = vpop.f32.mrf.mxu0 }
 0x2eb   : > { %v1628_v20 = vpop.f32.mrf.mxu1 }
 0x2ec   : > { %v1585_v24 = vpop.f32.mrf.mxu0  ;;  %2099 = vst.msk [vmem:[%s3200_s21 + $0x28] sm:$0xff] %vm380_vm1, %v1628_v20 }
 0x2ed   : > { %v2494_v33 = vpop.f32.mrf.mxu1 }
 0x2ee   : > { %v2489_v10 = vpop.f32.mrf.mxu0 }
 0x2ef   : > { %v1631_v11 = vpop.f32.mrf.mxu1 }
 0x2f0   : > { %v1674_v22 = vpop.f32.mrf.mxu0 }
 0x2f1   : > { %2100 = vst.msk [vmem:[%s3200_s21 + $0x30] sm:$0xff] %vm380_vm1, %v1674_v22  ;;  %v2495_v30 = vpop.f32.mrf.mxu1 }
 0x2f2   : > { %v2500_v52 = vpop.f32.mrf.mxu0 }
 0x2f3   : > { %v1720_v23 = vpop.f32.mrf.mxu1 }
 0x2f4   : > { %v1677_v25 = vpop.f32.mrf.mxu0  ;;  %2101 = vst.msk [vmem:[%s3200_s21 + $0x38] sm:$0xff] %vm380_vm1, %v1720_v23 }
 0x2f5   : > { %v2506_v37 = vpop.f32.mrf.mxu1 }
 0x2f6   : > { %v2501_v51 = vpop.f32.mrf.mxu0 }
 0x2f7   : > { %v1723_v36 = vpop.f32.mrf.mxu1 }
 0x2f8   : > { %v1766_v28 = vpop.f32.mrf.mxu0 }
 0x2f9   : > { %2102 = vst.msk [vmem:[%s3200_s21 + $0x40] sm:$0xff] %vm380_vm1, %v1766_v28  ;;  %v2507_v29 = vpop.f32.mrf.mxu1 }
 0x2fa   : > { %v2512_v32 = vpop.f32.mrf.mxu0 }
 0x2fb   : > { %v1812_v35 = vpop.f32.mrf.mxu1 }
 0x2fc   : > { %v1769_v38 = vpop.f32.mrf.mxu0  ;;  %2103 = vst.msk [vmem:[%s3200_s21 + $0x48] sm:$0xff] %vm380_vm1, %v1812_v35 }
 0x2fd   : > { %v2518_v47 = vpop.f32.mrf.mxu1 }
 0x2fe   : > { %v2513_v31 = vpop.f32.mrf.mxu0 }
 0x2ff   : > { %v1815_v46 = vpop.f32.mrf.mxu1 }
 0x300   : > { %v1858_v39 = vpop.f32.mrf.mxu0 }
 0x301   : > { %2104 = vst.msk [vmem:[%s3200_s21 + $0x50] sm:$0xff] %vm380_vm1, %v1858_v39  ;;  %v2519_v40 = vpop.f32.mrf.mxu1 }
 0x302   : > { %v2524_v60 = vpop.f32.mrf.mxu0 }
 0x303   : > { %v1904_v44 = vpop.f32.mrf.mxu1 }
 0x304   : > { %v1861_v61 = vpop.f32.mrf.mxu0  ;;  %2105 = vst.msk [vmem:[%s3200_s21 + $0x58] sm:$0xff] %vm380_vm1, %v1904_v44 }
 0x305   : > { %v2530_v2 = vpop.f32.mrf.mxu1 }
 0x306   : > { %v2525_v41 = vpop.f32.mrf.mxu0 }
 0x307   : > { %v1907_v1 = vpop.f32.mrf.mxu1 }
 0x308   : > { %v1950_v49 = vpop.f32.mrf.mxu0 }
 0x309   : > { %2106 = vst.msk [vmem:[%s3200_s21 + $0x60] sm:$0xff] %vm380_vm1, %v1950_v49  ;;  %v2531_v50 = vpop.f32.mrf.mxu1 }
 0x30a   : > { %v2536_v48 = vpop.f32.mrf.mxu0 }
 0x30b   : > { %v1996_v53 = vpop.f32.mrf.mxu1 }
 0x30c   : > { %v1953_v54 = vpop.f32.mrf.mxu0  ;;  %2107 = vst.msk [vmem:[%s3200_s21 + $0x68] sm:$0xff] %vm380_vm1, %v1996_v53 }
 0x30d   : > { %v2542_v57 = vpop.f32.mrf.mxu1 }
 0x30e   : > { %v2537_v45 = vpop.f32.mrf.mxu0 }
 0x30f   : > { %v1999_v17 = vpop.f32.mrf.mxu1 }
 0x310   : > { %v2042_v59 = vpop.f32.mrf.mxu0 }
 0x311   : > { %2108 = vst.msk [vmem:[%s3200_s21 + $0x70] sm:$0xff] %vm380_vm1, %v2042_v59  ;;  %v2543_v15 = vpop.f32.mrf.mxu1 }
 0x312   : > { %v2548_v62 = vpop.f32.mrf.mxu0 }
 0x313   : > { %v2088_v16 = vpop.f32.mrf.mxu1 }
 0x314   : > { %v2045_v63 = vpop.f32.mrf.mxu0  ;;  %2109 = vst.msk [vmem:[%s3200_s21 + $0x78] sm:$0xff] %vm380_vm1, %v2088_v16 }
 0x315   : > { %v2554_v26 = vpop.f32.mrf.mxu1 }
 0x316   : > { %v2549_v27 = vpop.f32.mrf.mxu0 }
 0x317   : > { %v2091_v3 = vpop.f32.mrf.mxu1 }
 0x319   : > { %v2555_v55 = vpop.f32.mrf.mxu1 }
 0x31a PF: > { %s14_s17 = sadd.s32 1, %s2668_s17   ;;  %s3248_s15 = smov %s2664_s16 }
 0x31b   : > { %p11_p5 = scmp.ge.s32.totalorder %s14_s17, 4   ;;  %s3249_s16 = smov %s3251_s18 }
 0x31d   :  { %13 = sbr.rel (!%p11_p5) target bundleno = 2 (0x2), region = 75 }

// kernel: _lambda_.23
= control target key start
LH: loop header
LB: loop body
LE: loop exit
PB: predicated region body
PF: predicated region fallthrough
CT: control target
= control target key end

     0   :  { %vm45_vm0 = vcmask 130048   ;;  %vm906_vm11 = vcmask 261120   ;;  %s2130_s0 = inlined_call_operand.vmem [shape: f32[128,16], index: 0, kind: input, shape index: {}]   ;;  %s2131_s3 = inlined_call_operand.vmem [shape: bf16[16,32], index: 3, kind: input, shape index: {}]   ;;  %s2132_s1 = inlined_call_operand.vmem [shape: f32[1,16], index: 1, kind: input, shape index: {}]   ;;  %s2133_s2 = inlined_call_operand.vmem [shape: f32[1,16], index: 2, kind: input, shape index: {}]   ;;  %s2134_s5 = inlined_call_operand.vmem [shape: bf16[32,16], index: 5, kind: input, shape index: {}]   ;;  %s2135_s4 = inlined_call_operand.vmem [shape: f32[1,32], index: 4, kind: input, shape index: {}]   ;;  %s2136_s6 = inlined_call_operand.vmem [shape: f32[1,16], index: 6, kind: input, shape index: {}]   ;;  %s2137_s7 = inlined_call_operand.vmem [shape: f32[128,16], index: 7, kind: output, shape index: {}]  }
   0x1   :  { %v27_v0 = vld [vmem:[%s2130_s0] sm:$0xff]  ;;  %v29_v1 = vld [vmem:[%s2130_s0 + $0x10] sm:$0xff]  ;;  %v28_v2 = vld [vmem:[%s2130_s0 + $0x8] sm:$0xff] }
   0x2   :  { %v46_v3 = vsel %vm45_vm0, %v27_v0, 0.0  ;;  %v52_v4 = vsel %vm45_vm0, %v29_v1, 0.0  ;;  %v30_v5 = vld [vmem:[%s2130_s0 + $0x18] sm:$0xff]  ;;  %v49_v6 = vsel %vm45_vm0, %v28_v2, 0.0  ;;  %v31_v8 = vld [vmem:[%s2130_s0 + $0x20] sm:$0xff]  ;;  %v32_v9 = vld [vmem:[%s2130_s0 + $0x28] sm:$0xff] }
   0x3   :  { %47 = vadd.xlane.f32.xlu0 %v46_v3  ;;  %53 = vadd.xlane.f32.xlu1 %v52_v4  ;;  %v55_v7 = vsel %vm45_vm0, %v30_v5, 0.0  ;;  %v58_v10 = vsel %vm45_vm0, %v31_v8, 0.0  ;;  %v61_v11 = vsel %vm45_vm0, %v32_v9, 0.0  ;;  %v1328_v12 = vld [vmem:[%s2130_s0 + $0x30] sm:$0xff]  ;;  %v1333_v13 = vld [vmem:[%s2130_s0 + $0x38] sm:$0xff]  ;;  %v1342_v16 = vld [vmem:[%s2130_s0 + $0x40] sm:$0xff] }
   0x4   :  { %v64_v14 = vsel %vm45_vm0, %v1328_v12, 0.0  ;;  %v67_v15 = vsel %vm45_vm0, %v1333_v13, 0.0  ;;  %v1347_v17 = vld [vmem:[%s2130_s0 + $0x48] sm:$0xff]  ;;  %v70_v18 = vsel %vm45_vm0, %v1342_v16, 0.0  ;;  %v1356_v20 = vld [vmem:[%s2130_s0 + $0x50] sm:$0xff]  ;;  %v1361_v21 = vld [vmem:[%s2130_s0 + $0x58] sm:$0xff] }
   0x5   :  { %v73_v19 = vsel %vm45_vm0, %v1347_v17, 0.0  ;;  %v76_v22 = vsel %vm45_vm0, %v1356_v20, 0.0  ;;  %v79_v23 = vsel %vm45_vm0, %v1361_v21, 0.0  ;;  %v1370_v24 = vld [vmem:[%s2130_s0 + $0x60] sm:$0xff]  ;;  %v1375_v25 = vld [vmem:[%s2130_s0 + $0x68] sm:$0xff]  ;;  %v1384_v28 = vld [vmem:[%s2130_s0 + $0x70] sm:$0xff] }
   0x6   :  { %v82_v26 = vsel %vm45_vm0, %v1370_v24, 0.0  ;;  %v85_v27 = vsel %vm45_vm0, %v1375_v25, 0.0  ;;  %v1389_v29 = vld [vmem:[%s2130_s0 + $0x78] sm:$0xff]  ;;  %v88_v30 = vsel %vm45_vm0, %v1384_v28, 0.0 }
   0x7   :  { %50 = vadd.xlane.f32.xlu0 %v49_v6  ;;  %56 = vadd.xlane.f32.xlu1 %v55_v7  ;;  %v91_v31 = vsel %vm45_vm0, %v1389_v29, 0.0 }
   0xb   :  { %59 = vadd.xlane.f32.xlu0 %v58_v10  ;;  %62 = vadd.xlane.f32.xlu1 %v61_v11 }
   0xf   :  { %65 = vadd.xlane.f32.xlu0 %v64_v14  ;;  %68 = vadd.xlane.f32.xlu1 %v67_v15 }
  0x13   :  { %71 = vadd.xlane.f32.xlu0 %v70_v18  ;;  %74 = vadd.xlane.f32.xlu1 %v73_v19 }
  0x17   :  { %77 = vadd.xlane.f32.xlu0 %v76_v22  ;;  %80 = vadd.xlane.f32.xlu1 %v79_v23 }
  0x1b   :  { %83 = vadd.xlane.f32.xlu0 %v82_v26  ;;  %86 = vadd.xlane.f32.xlu1 %v85_v27 }
  0x1f   :  { %89 = vadd.xlane.f32.xlu0 %v88_v30  ;;  %92 = vadd.xlane.f32.xlu1 %v91_v31 }
  0x8c   :  { %v48_v32 = vpop.xlane.xlu0 %47  ;;  %v54_v33 = vpop.xlane.xlu1 %53 }
  0x8d   :  { %v95_v34 = vmul.f32 0.0625, %v48_v32  ;;  %v97_v35 = vmul.f32 0.0625, %v54_v33 }
  0x8f   :  { %v1395_v36 = vsub.f32 %v27_v0, %v95_v34  ;;  %v1397_v37 = vsub.f32 %v29_v1, %v97_v35 }
  0x90   :  { %v51_v38 = vpop.xlane.xlu0 %50  ;;  %v57_v39 = vpop.xlane.xlu1 %56 }
  0x91   :  { %v96_v40 = vmul.f32 0.0625, %v51_v38  ;;  %v98_v41 = vmul.f32 0.0625, %v57_v39  ;;  %v127_v42 = vmul.f32 %v1395_v36, %v1395_v36  ;;  %v129_v43 = vmul.f32 %v1397_v37, %v1397_v37 }
  0x93   :  { %v1403_v44 = vsub.f32 %v28_v2, %v96_v40  ;;  %v1405_v45 = vsub.f32 %v30_v5, %v98_v41  ;;  %v143_v46 = vsel %vm45_vm0, %v127_v42, 0.0  ;;  %v149_v49 = vsel %vm45_vm0, %v129_v43, 0.0 }
  0x94   :  { %144 = vadd.xlane.f32.xlu0 %v143_v46  ;;  %v60_v47 = vpop.xlane.xlu0 %59  ;;  %v63_v48 = vpop.xlane.xlu1 %62 }
  0x95   :  { %v99_v50 = vmul.f32 0.0625, %v60_v47  ;;  %v100_v51 = vmul.f32 0.0625, %v63_v48  ;;  %v128_v52 = vmul.f32 %v1403_v44, %v1403_v44  ;;  %v130_v53 = vmul.f32 %v1405_v45, %v1405_v45 }
  0x97   :  { %v1413_v54 = vsub.f32 %v31_v8, %v99_v50  ;;  %v1415_v55 = vsub.f32 %v32_v9, %v100_v51  ;;  %v146_v56 = vsel %vm45_vm0, %v128_v52, 0.0  ;;  %v152_v59 = vsel %vm45_vm0, %v130_v53, 0.0 }
  0x98   :  { %150 = vadd.xlane.f32.xlu0 %v149_v49  ;;  %147 = vadd.xlane.f32.xlu1 %v146_v56  ;;  %v66_v57 = vpop.xlane.xlu0 %65  ;;  %v69_v58 = vpop.xlane.xlu1 %68 }
  0x99   :  { %v101_v60 = vmul.f32 0.0625, %v66_v57  ;;  %v102_v61 = vmul.f32 0.0625, %v69_v58  ;;  %v131_v62 = vmul.f32 %v1413_v54, %v1413_v54  ;;  %v132_v63 = vmul.f32 %v1415_v55, %v1415_v55 }
  0x9b   :  { %v1424_v0 = vsub.f32 %v1328_v12, %v101_v60  ;;  %v1427_v1 = vsub.f32 %v1333_v13, %v102_v61  ;;  %v155_v2 = vsel %vm45_vm0, %v131_v62, 0.0  ;;  %v158_v5 = vsel %vm45_vm0, %v132_v63, 0.0 }
  0x9c   :  { %153 = vadd.xlane.f32.xlu1 %v152_v59  ;;  %156 = vadd.xlane.f32.xlu0 %v155_v2  ;;  %v72_v3 = vpop.xlane.xlu0 %71  ;;  %v75_v4 = vpop.xlane.xlu1 %74 }
  0x9d   :  { %v103_v6 = vmul.f32 0.0625, %v72_v3  ;;  %v104_v7 = vmul.f32 0.0625, %v75_v4  ;;  %v133_v8 = vmul.f32 %v1424_v0, %v1424_v0  ;;  %v134_v9 = vmul.f32 %v1427_v1, %v1427_v1 }
  0x9f   :  { %v1436_v10 = vsub.f32 %v1342_v16, %v103_v6  ;;  %v1439_v11 = vsub.f32 %v1347_v17, %v104_v7  ;;  %v161_v12 = vsel %vm45_vm0, %v133_v8, 0.0  ;;  %v164_v15 = vsel %vm45_vm0, %v134_v9, 0.0 }
  0xa0   :  { %159 = vadd.xlane.f32.xlu1 %v158_v5  ;;  %162 = vadd.xlane.f32.xlu0 %v161_v12  ;;  %v78_v13 = vpop.xlane.xlu0 %77  ;;  %v81_v14 = vpop.xlane.xlu1 %80 }
  0xa1   :  { %v105_v18 = vmul.f32 0.0625, %v78_v13  ;;  %v106_v19 = vmul.f32 0.0625, %v81_v14  ;;  %v135_v22 = vmul.f32 %v1436_v10, %v1436_v10  ;;  %v136_v16 = vmul.f32 %v1439_v11, %v1439_v11 }
  0xa3   :  { %v1448_v23 = vsub.f32 %v1356_v20, %v105_v18  ;;  %v1451_v17 = vsub.f32 %v1361_v21, %v106_v19  ;;  %v167_v26 = vsel %vm45_vm0, %v135_v22, 0.0  ;;  %v170_v31 = vsel %vm45_vm0, %v136_v16, 0.0 }
  0xa4   :  { %165 = vadd.xlane.f32.xlu1 %v164_v15  ;;  %168 = vadd.xlane.f32.xlu0 %v167_v26  ;;  %v84_v27 = vpop.xlane.xlu0 %83  ;;  %v87_v30 = vpop.xlane.xlu1 %86 }
  0xa5   :  { %v107_v32 = vmul.f32 0.0625, %v84_v27  ;;  %v108_v33 = vmul.f32 0.0625, %v87_v30  ;;  %v137_v34 = vmul.f32 %v1448_v23, %v1448_v23  ;;  %v138_v20 = vmul.f32 %v1451_v17, %v1451_v17 }
  0xa7   :  { %v1460_v35 = vsub.f32 %v1370_v24, %v107_v32  ;;  %v1463_v21 = vsub.f32 %v1375_v25, %v108_v33  ;;  %v173_v38 = vsel %vm45_vm0, %v137_v34, 0.0  ;;  %v176_v41 = vsel %vm45_vm0, %v138_v20, 0.0 }
  0xa8   :  { %171 = vadd.xlane.f32.xlu1 %v170_v31  ;;  %174 = vadd.xlane.f32.xlu0 %v173_v38  ;;  %v90_v39 = vpop.xlane.xlu0 %89  ;;  %v93_v40 = vpop.xlane.xlu1 %92  ;;  %v1491_v31 = vld [vmem:[%s2132_s1] ss:$0 sm:$0xff] }
  0xa9   :  { %v109_v42 = vmul.f32 0.0625, %v90_v39  ;;  %v110_v43 = vmul.f32 0.0625, %v93_v40  ;;  %v139_v46 = vmul.f32 %v1460_v35, %v1460_v35  ;;  %v140_v24 = vmul.f32 %v1463_v21, %v1463_v21 }
  0xab   :  { %v1472_v47 = vsub.f32 %v1384_v28, %v109_v42  ;;  %v1475_v25 = vsub.f32 %v1389_v29, %v110_v43  ;;  %v179_v48 = vsel %vm45_vm0, %v139_v46, 0.0  ;;  %v182_v49 = vsel %vm45_vm0, %v140_v24, 0.0  ;;  %v1145_v29 = vld [vmem:[%s2131_s3] sm:$0xff]  }
  0xac   :  { %177 = vadd.xlane.f32.xlu1 %v176_v41  ;;  %180 = vadd.xlane.f32.xlu0 %v179_v48  ;;  %v1498_v46 = vld [vmem:[%s2133_s2] ss:$0 sm:$0xff] }
  0xad   :  { %v141_v50 = vmul.f32 %v1472_v47, %v1472_v47  ;;  %v142_v51 = vmul.f32 %v1475_v25, %v1475_v25  ;;  %1106 = vmatprep.subr.bf16.mxu0 %v1145_v29 }
  0xae   :  { %1107 = vmatpush3.bf16.msra.mxu0 %v1145_v29 }
  0xaf   :  { %v185_v52 = vsel %vm45_vm0, %v141_v50, 0.0  ;;  %v188_v28 = vsel %vm45_vm0, %v142_v51, 0.0 }
  0xb0   :  { %183 = vadd.xlane.f32.xlu1 %v182_v49  ;;  %186 = vadd.xlane.f32.xlu0 %v185_v52 }
  0xb4   :  { %189 = vadd.xlane.f32.xlu1 %v188_v28 }
 0x11d   :  { %v145_v53 = vpop.xlane.xlu0 %144 }
 0x11e   :  { %v191_v56 = vmul.f32 0.0625, %v145_v53 }
 0x120   :  { %v207_v57 = vadd.f32 1e-05, %v191_v56 }
 0x121   :  { %v148_v58 = vpop.xlane.xlu1 %147  ;;  %v151_v59 = vpop.xlane.xlu0 %150 }
 0x122   :  { %1148 = vrsqrt.f32 %v207_v57  ;;  %v192_v60 = vmul.f32 0.0625, %v148_v58  ;;  %v193_v61 = vmul.f32 0.0625, %v151_v59 }
 0x124   :  { %v208_v62 = vadd.f32 1e-05, %v192_v60  ;;  %v209_v63 = vadd.f32 1e-05, %v193_v61 }
 0x125   :  { %v154_v2 = vpop.xlane.xlu1 %153  ;;  %v157_v3 = vpop.xlane.xlu0 %156 }
 0x126   :  { %1150 = vrsqrt.f32 %v208_v62  ;;  %v194_v4 = vmul.f32 0.0625, %v154_v2  ;;  %v195_v5 = vmul.f32 0.0625, %v157_v3 }
 0x127   :  { %1152 = vrsqrt.f32 %v209_v63 }
 0x128   :  { %v210_v6 = vadd.f32 1e-05, %v194_v4  ;;  %v211_v7 = vadd.f32 1e-05, %v195_v5 }
 0x129   :  { %v160_v8 = vpop.xlane.xlu1 %159  ;;  %v163_v9 = vpop.xlane.xlu0 %162 }
 0x12a   :  { %1154 = vrsqrt.f32 %v210_v6  ;;  %v196_v12 = vmul.f32 0.0625, %v160_v8  ;;  %v197_v13 = vmul.f32 0.0625, %v163_v9 }
 0x12b   :  { %1156 = vrsqrt.f32 %v211_v7 }
 0x12c   :  { %v212_v14 = vadd.f32 1e-05, %v196_v12  ;;  %v213_v15 = vadd.f32 1e-05, %v197_v13 }
 0x12d   :  { %v166_v18 = vpop.xlane.xlu1 %165  ;;  %v169_v19 = vpop.xlane.xlu0 %168 }
 0x12e   :  { %1158 = vrsqrt.f32 %v212_v14  ;;  %v198_v22 = vmul.f32 0.0625, %v166_v18  ;;  %v199_v16 = vmul.f32 0.0625, %v169_v19 }
 0x12f   :  { %v1149_v26 = vpop.eup %1148  ;;  %1160 = vrsqrt.f32 %v213_v15 }
 0x130   :  { %v214_v27 = vadd.f32 1e-05, %v198_v22  ;;  %v215_v30 = vadd.f32 1e-05, %v199_v16  ;;  %v239_v32 = vmul.f32 %v1149_v26, %v1395_v36 }
 0x131   :  { %v172_v33 = vpop.xlane.xlu1 %171  ;;  %v175_v34 = vpop.xlane.xlu0 %174 }
 0x132   :  { %1162 = vrsqrt.f32 %v214_v27  ;;  %v200_v20 = vmul.f32 0.0625, %v172_v33  ;;  %v201_v38 = vmul.f32 0.0625, %v175_v34  ;;  %v261_v40 = vmul.f32 %v1491_v31, %v239_v32 }
 0x133   :  { %v1151_v39 = vpop.eup %1150  ;;  %1164 = vrsqrt.f32 %v215_v30 }
 0x134   :  { %v1153_v41 = vpop.eup %1152  ;;  %v216_v42 = vadd.f32 1e-05, %v200_v20  ;;  %v217_v43 = vadd.f32 1e-05, %v201_v38  ;;  %v240_v24 = vmul.f32 %v1151_v39, %v1403_v44  ;;  %v283_v29 = vadd.f32 %v1498_v46, %v261_v40 }
 0x135   :  { %v178_v36 = vpop.xlane.xlu1 %177  ;;  %v181_v48 = vpop.xlane.xlu0 %180  ;;  %v241_v49 = vmul.f32 %v1153_v41, %v1397_v37 }
 0x136   :  { %1166 = vrsqrt.f32 %v216_v42  ;;  %v202_v50 = vmul.f32 0.0625, %v178_v36  ;;  %v203_v51 = vmul.f32 0.0625, %v181_v48  ;;  %v262_v52 = vmul.f32 %v1491_v31, %v240_v24 }
 0x137   :  { %v1155_v28 = vpop.eup %1154  ;;  %1168 = vrsqrt.f32 %v217_v43  ;;  %v263_v37 = vmul.f32 %v1491_v31, %v241_v49 }
 0x138   :  { %v1157_v53 = vpop.eup %1156  ;;  %v218_v56 = vadd.f32 1e-05, %v202_v50  ;;  %v219_v57 = vadd.f32 1e-05, %v203_v51  ;;  %v284_v58 = vadd.f32 %v1498_v46, %v262_v52  ;;  %v242_v44 = vmul.f32 %v1155_v28, %v1405_v45 }
 0x139   :  { %v184_v59 = vpop.xlane.xlu1 %183  ;;  %v187_v60 = vpop.xlane.xlu0 %186  ;;  %v243_v61 = vmul.f32 %v1157_v53, %v1413_v54  ;;  %v285_v54 = vadd.f32 %v1498_v46, %v263_v37 }
 0x13a   :  { %1170 = vrsqrt.f32 %v218_v56  ;;  %v204_v62 = vmul.f32 0.0625, %v184_v59  ;;  %v205_v63 = vmul.f32 0.0625, %v187_v60  ;;  %v299_v2 = vpack.c.bf16 %v284_v58, %v283_v29 }
 0x13b   :  { %v1159_v3 = vpop.eup %1158  ;;  %1172 = vrsqrt.f32 %v219_v57  ;;  %v264_v4 = vmul.f32 %v1491_v31, %v242_v44  ;;  %v265_v5 = vmul.f32 %v1491_v31, %v243_v61 }
 0x13c   :  { %v1161_v6 = vpop.eup %1160  ;;  %v220_v7 = vadd.f32 1e-05, %v204_v62  ;;  %v221_v8 = vadd.f32 1e-05, %v205_v63  ;;  %1108 = vmatprep.mubr.msk.bf16.mxu0 %vm45_vm0, %v299_v2  ;;  %v244_v45 = vmul.f32 %v1159_v3, %v1415_v55  ;;  %v1147_v3 = vld [vmem:[%s2134_s5] sm:$0xff]  }
 0x13d   :  { %v190_v9 = vpop.xlane.xlu1 %189  ;;  %v286_v12 = vadd.f32 %v1498_v46, %v264_v4  ;;  %v245_v13 = vmul.f32 %v1161_v6, %v1424_v0  ;;  %v287_v22 = vadd.f32 %v1498_v46, %v265_v5 }
 0x13e   :  { %1174 = vrsqrt.f32 %v220_v7  ;;  %v206_v14 = vmul.f32 0.0625, %v190_v9  ;;  %v266_v15 = vmul.f32 %v1491_v31, %v244_v45 }
 0x13f   :  { %v1163_v18 = vpop.eup %1162  ;;  %1176 = vrsqrt.f32 %v221_v8  ;;  %v300_v19 = vpack.c.bf16 %v286_v12, %v285_v54  ;;  %v267_v30 = vmul.f32 %v1491_v31, %v245_v13 }
 0x140   :  { %v1165_v16 = vpop.eup %1164  ;;  %v222_v26 = vadd.f32 1e-05, %v206_v14  ;;  %v288_v55 = vadd.f32 %v1498_v46, %v266_v15  ;;  %v246_v27 = vmul.f32 %v1163_v18, %v1427_v1 }
 0x141   :  { %1109 = vmatmul.mubr.msk.bf16.vlgmr.msra.gmra.mxu0 %vm45_vm0, %v300_v19  ;;  %v247_v0 = vmul.f32 %v1165_v16, %v1436_v10  ;;  %v289_v38 = vadd.f32 %v1498_v46, %v267_v30 }
 0x142   :  { %1178 = vrsqrt.f32 %v222_v26  ;;  %v301_v32 = vpack.c.bf16 %v288_v55, %v287_v22  ;;  %v268_v33 = vmul.f32 %v1491_v31, %v246_v27 }
 0x143   :  { %v1167_v34 = vpop.eup %1166  ;;  %v269_v40 = vmul.f32 %v1491_v31, %v247_v0 }
 0x144   :  { %v1169_v20 = vpop.eup %1168  ;;  %1112 = vmatprep.mubr.msk.bf16.mxu0 %vm45_vm0, %v301_v32  ;;  %v290_v39 = vadd.f32 %v1498_v46, %v268_v33  ;;  %v248_v1 = vmul.f32 %v1167_v34, %v1439_v11 }
 0x145   :  { %v249_v41 = vmul.f32 %v1169_v20, %v1448_v23  ;;  %v291_v36 = vadd.f32 %v1498_v46, %v269_v40 }
 0x146   :  { %v302_v42 = vpack.c.bf16 %v290_v39, %v289_v38  ;;  %v270_v10 = vmul.f32 %v1491_v31, %v248_v1 }
 0x147   :  { %v1171_v43 = vpop.eup %1170  ;;  %v271_v50 = vmul.f32 %v1491_v31, %v249_v41 }
 0x148   :  { %v1173_v24 = vpop.eup %1172  ;;  %v292_v48 = vadd.f32 %v1498_v46, %v270_v10  ;;  %v250_v49 = vmul.f32 %v1171_v43, %v1451_v17 }
 0x149   :  { %1113 = vmatmul.mubr.msk.bf16.gmra.mxu0 %vm45_vm0, %v302_v42  ;;  %v251_v11 = vmul.f32 %v1173_v24, %v1460_v35  ;;  %v293_v29 = vadd.f32 %v1498_v46, %v271_v50 }
 0x14a   :  { %v303_v51 = vpack.c.bf16 %v292_v48, %v291_v36  ;;  %v272_v23 = vmul.f32 %v1491_v31, %v250_v49 }
 0x14b   :  { %v1175_v52 = vpop.eup %1174  ;;  %v273_v17 = vmul.f32 %v1491_v31, %v251_v11 }
 0x14c   :  { %v1177_v28 = vpop.eup %1176  ;;  %1116 = vmatprep.mubr.msk.bf16.mxu0 %vm45_vm0, %v303_v51  ;;  %v294_v53 = vadd.f32 %v1498_v46, %v272_v23  ;;  %v252_v56 = vmul.f32 %v1175_v52, %v1463_v21 }
 0x14d   :  { %v253_v57 = vmul.f32 %v1177_v28, %v1472_v47  ;;  %v295_v59 = vadd.f32 %v1498_v46, %v273_v17 }
 0x14e   :  { %v304_v58 = vpack.c.bf16 %v294_v53, %v293_v29  ;;  %v274_v35 = vmul.f32 %v1491_v31, %v252_v56 }
 0x14f   :  { %v1179_v44 = vpop.eup %1178  ;;  %v275_v61 = vmul.f32 %v1491_v31, %v253_v57 }
 0x150   :  { %v296_v60 = vadd.f32 %v1498_v46, %v274_v35  ;;  %v254_v37 = vmul.f32 %v1179_v44, %v1475_v25  ;;  %v1146_v25 = vld [vmem:[%s2134_s5 + $0x8] sm:$0xff]  }
 0x151   :  { %1117 = vmatmul.mubr.msk.bf16.gmra.mxu0 %vm45_vm0, %v304_v58  ;;  %v297_v47 = vadd.f32 %v1498_v46, %v275_v61  ;;  %1124 = vmatprep.subr.bf16.mxu1 %v1146_v25 }
 0x152   :  { %v305_v62 = vpack.c.bf16 %v296_v60, %v295_v59  ;;  %v276_v21 = vmul.f32 %v1491_v31, %v254_v37  ;;  %1125 = vmatpush3.bf16.msra.mxu1 %v1146_v25  ;;  %v1563_v31 = vld [vmem:[%s2135_s4] ss:$0 sm:$0xff] }
 0x153   :  { %1126 = vmatprep.subr.bf16.mxu1 %v1147_v3 }
 0x154   :  { %1120 = vmatprep.mubr.msk.bf16.mxu0 %vm45_vm0, %v305_v62  ;;  %v298_v63 = vadd.f32 %v1498_v46, %v276_v21 }
 0x156   :  { %v306_v2 = vpack.c.bf16 %v298_v63, %v297_v47  ;;  %1127 = vmatpush3.bf16.msra.mxu1 %v1147_v3 }
 0x159   :  { %1121 = vmatmul.mubr.msk.bf16.gmra.mxu0 %vm45_vm0, %v306_v2 }
 0x201   :  { %v1110_v46 = vpop.f32.mrf.mxu0 }
 0x202   :  { %v1566_v4 = vadd.f32 %v1110_v46, %v1563_v31  ;;  %v2138_v46 = vmov 1.0  }
 0x203   :  { %v380_v5 = vpop.f32.mrf.mxu0 }
 0x204   :  { %v1569_v6 = vmul.f32 0.70710677, %v1566_v4  ;;  %v381_v38 = vadd.f32 %v1563_v31, %v380_v5  ;;  %v1646_v63 = vmul.f32 0.5, %v1566_v4 }
 0x205   :  { %v1111_v7 = vpop.f32.mrf.mxu0 }
 0x206   :  { %v1572_v8 = vand.u32 2147483647, %v1569_v6  ;;  %v1575_v45 = vadd.f32 %v1111_v7, %v1563_v31  ;;  %v459_v49 = vmul.f32 0.70710677, %v381_v38  ;;  %vm477_vm1 = vcmp.lt.f32.partialorder %v1569_v6, 0.0 }
 0x207   :  { %v383_v9 = vpop.f32.mrf.mxu0  ;;  %v1649_v25 = vmul.f32 0.5, %v381_v38  ;;  %v1655_v5 = vsel %vm477_vm1, -1.0, %v2138_v46 }
 0x208   :  { %v525_v54 = vmul.f32 0.3275911, %v1572_v8  ;;  %v1579_v12 = vmul.f32 0.70710677, %v1575_v45  ;;  %v507_v53 = vand.u32 2147483647, %v459_v49  ;;  %v384_v56 = vadd.f32 %v1563_v31, %v383_v9 }
 0x209   :  { %v1114_v13 = vpop.f32.mrf.mxu0  ;;  %v733_v44 = vsub.f32 0.0, %v1572_v8  ;;  %vm475_vm2 = vcmp.lt.f32.partialorder %v459_v49, 0.0 }
 0x20a   :  { %v541_v14 = vadd.f32 1.0, %v525_v54  ;;  %v1582_v15 = vand.u32 2147483647, %v1579_v12  ;;  %v1586_v16 = vadd.f32 %v1114_v13, %v1563_v31  ;;  %v731_v37 = vsub.f32 0.0, %v507_v53 }
 0x20b   :  { %v396_v18 = vpop.f32.mrf.mxu0  ;;  %v460_v47 = vmul.f32 0.70710677, %v384_v56  ;;  %v749_v2 = vmul.f32 %v733_v44, %v1572_v8  ;;  %v523_v6 = vmul.f32 0.3275911, %v507_v53  ;;  %v1664_v4 = vsel %vm475_vm2, -1.0, %v2138_v46 }
 0x20c   :  { %1180 = vrcp.f32 %v541_v14  ;;  %v526_v19 = vmul.f32 0.3275911, %v1582_v15  ;;  %v1589_v55 = vadd.f32 %v1563_v31, %v396_v18  ;;  %v1592_v27 = vmul.f32 0.70710677, %v1586_v16 }
 0x20d   :  { %v1115_v26 = vpop.f32.mrf.mxu0  ;;  %v747_v8 = vmul.f32 %v731_v37, %v507_v53  ;;  %v1667_v13 = vmul.f32 0.5, %v1575_v45  ;;  %vm478_vm3 = vcmp.lt.f32.partialorder %v1579_v12, 0.0  ;;  %v539_v45 = vadd.f32 1.0, %v523_v6 }
 0x20e   :  { %v542_v22 = vadd.f32 1.0, %v526_v19  ;;  %v1595_v30 = vmul.f32 0.70710677, %v1589_v55  ;;  %v1598_v0 = vand.u32 2147483647, %v1592_v27  ;;  %v1601_v32 = vadd.f32 %v1115_v26, %v1563_v31 }
 0x20f   :  { %v399_v33 = vpop.f32.mrf.mxu0  ;;  %v734_v19 = vsub.f32 0.0, %v1582_v15  ;;  %v767_v26 = vmul.f32 1.442695, %v749_v2  ;;  %vm476_vm4 = vcmp.lt.f32.partialorder %v460_v47, 0.0  ;;  %vm481_vm5 = vcmp.lt.f32.partialorder %v1592_v27, 0.0 }
 0x210   :  { %1182 = vrcp.f32 %v542_v22  ;;  %v529_v34 = vmul.f32 0.3275911, %v1598_v0  ;;  %v1605_v20 = vand.u32 2147483647, %v1595_v30  ;;  %v1609_v39 = vmul.f32 0.70710677, %v1601_v32 }
 0x211   :  { %v1612_v1 = vadd.f32 %v1563_v31, %v399_v33  ;;  %v1118_v36 = vpop.f32.mrf.mxu0  ;;  %v508_v22 = vand.u32 2147483647, %v460_v47  ;;  %vm479_vm6 = vcmp.lt.f32.partialorder %v1595_v30, 0.0 }
 0x212   :  { %v545_v40 = vadd.f32 1.0, %v529_v34  ;;  %v527_v41 = vmul.f32 0.3275911, %v1605_v20  ;;  %v1616_v42 = vand.u32 2147483647, %v1609_v39  ;;  %v1633_v17 = vadd.f32 %v1118_v36, %v1563_v31 }
 0x213   :  { %v1619_v10 = vmul.f32 0.70710677, %v1612_v1  ;;  %v412_v28 = vpop.f32.mrf.mxu0  ;;  %v763_v36 = vmul.f32 1.442695, %v747_v8  ;;  %vm482_vm7 = vcmp.lt.f32.partialorder %v1609_v39, 0.0 }
 0x214   :  { %1184 = vrcp.f32 %v545_v40  ;;  %v543_v24 = vadd.f32 1.0, %v527_v41  ;;  %v530_v50 = vmul.f32 0.3275911, %v1616_v42  ;;  %2148 = vst [vmem:[#allocation2_spill] sm:$0xff] %v1633_v17  ;;  %v1639_v59 = vadd.f32 %v1563_v31, %v412_v28 }
 0x215   :  { %v1626_v11 = vand.u32 2147483647, %v1619_v10  ;;  %v1643_v61 = vmul.f32 0.70710677, %v1633_v17  ;;  %v1119_v62 = vpop.f32.mrf.mxu0  ;;  %v1681_v41 = vmul.f32 0.5, %v384_v56  ;;  %v732_v28 = vsub.f32 0.0, %v508_v22 }
 0x216   :  { %1186 = vrcp.f32 %v543_v24  ;;  %v546_v23 = vadd.f32 1.0, %v530_v50  ;;  %v1652_v3 = vmul.f32 0.70710677, %v1639_v59  ;;  %v1659_v9 = vadd.f32 %v1119_v62, %v1563_v31 }
 0x217   :  { %v528_v52 = vmul.f32 0.3275911, %v1626_v11  ;;  %v1670_v14 = vand.u32 2147483647, %v1643_v61  ;;  %v748_v6 = vmul.f32 %v732_v28, %v508_v22  ;;  %vm480_vm8 = vcmp.lt.f32.partialorder %v1619_v10, 0.0 }
 0x218   :  { %1188 = vrcp.f32 %v546_v23  ;;  %2149 = vst [vmem:[#allocation3_spill] sm:$0xff] %v1659_v9  ;;  %v1677_v34 = vand.u32 2147483647, %v1652_v3  ;;  %v1684_v24 = vmul.f32 0.70710677, %v1659_v9  ;;  %vm483_vm9 = vcmp.lt.f32.partialorder %v1652_v3, 0.0 }
 0x219   :  { %v1621_v43 = vpop.eup %1180  ;;  %v544_v35 = vadd.f32 1.0, %v528_v52  ;;  %v533_v49 = vmul.f32 0.3275911, %v1670_v14  ;;  %v524_v23 = vmul.f32 0.3275911, %v508_v22  ;;  %vm485_vm13 = vcmp.lt.f32.partialorder %v1643_v61, 0.0 }
 0x21a   :  { %v589_v48 = vmul.f32 1.0614054, %v1621_v43  ;;  %v531_v56 = vmul.f32 0.3275911, %v1677_v34  ;;  %vm486_vm12 = vcmp.lt.f32.partialorder %v1684_v24, 0.0 }
 0x21b   :  { %1190 = vrcp.f32 %v544_v35  ;;  %v1699_v35 = vand.u32 2147483647, %v1684_v24  ;;  %v540_v2 = vadd.f32 1.0, %v524_v23  ;;  %v1724_v23 = vmul.f32 0.5, %v1589_v55 }
 0x21c   :  { %v605_v51 = vadd.f32 -1.4531521, %v589_v48  ;;  %1192 = vpow2.f32 %v767_v26  ;;  %v547_v8 = vadd.f32 1.0, %v531_v56  ;;  %v415_v26 = vpop.f32.mrf.mxu0 }
 0x21d   :  { %v1629_v29 = vpop.eup %1182  ;;  %1194 = vrcp.f32 %v539_v45  ;;  %v735_v45 = vsub.f32 0.0, %v1605_v20 }
 0x21e   :  { %v621_v57 = vmul.f32 %v1621_v43, %v605_v51  ;;  %v590_v58 = vmul.f32 1.0614054, %v1629_v29  ;;  %v750_v51 = vmul.f32 %v734_v19, %v1582_v15  ;;  %1196 = vpow2.f32 %v763_v36 }
 0x21f   :  { %v1702_v15 = vsel %vm476_vm4, -1.0, %v2138_v46  ;;  %v534_v19 = vmul.f32 0.3275911, %v1699_v35 }
 0x220   :  { %v606_v60 = vadd.f32 -1.4531521, %v590_v58  ;;  %v637_v21 = vadd.f32 1.4214138, %v621_v57  ;;  %v1695_v57 = vsel %vm478_vm3, -1.0, %v2138_v46 }
 0x221   :  { %v1661_v54 = vpop.eup %1184  ;;  %v769_v62 = vmul.f32 1.442695, %v750_v51  ;;  %v550_v28 = vadd.f32 1.0, %v534_v19 }
 0x222   :  { %v622_v7 = vmul.f32 %v1629_v29, %v606_v60  ;;  %v653_v18 = vmul.f32 %v1621_v43, %v637_v21  ;;  %v593_v33 = vmul.f32 1.0614054, %v1661_v54  ;;  %v549_v60 = vadd.f32 1.0, %v533_v49 }
 0x223   :  { %v1679_v38 = vpop.eup %1186  ;;  %v1706_v21 = vmul.f32 0.5, %v1586_v16  ;;  %v737_v16 = vsub.f32 0.0, %v1598_v0 }
 0x224   :  { %v638_v40 = vadd.f32 1.4214138, %v622_v7  ;;  %v591_v48 = vmul.f32 1.0614054, %v1679_v38  ;;  %v669_v50 = vadd.f32 -0.28449672, %v653_v18  ;;  %1198 = vrcp.f32 %v549_v60 }
 0x225   :  { %v1689_v52 = vpop.eup %1188  ;;  %v609_v53 = vadd.f32 -1.4531521, %v593_v33  ;;  %1200 = vpow2.f32 %v769_v62  ;;  %v753_v56 = vmul.f32 %v737_v16, %v1598_v0 }
 0x226   :  { %v654_v58 = vmul.f32 %v1629_v29, %v638_v40  ;;  %v607_v44 = vadd.f32 -1.4531521, %v591_v48  ;;  %v685_v37 = vmul.f32 %v1621_v43, %v669_v50  ;;  %v594_v12 = vmul.f32 1.0614054, %v1689_v52 }
 0x227   :  { %v625_v7 = vmul.f32 %v1661_v54, %v609_v53  ;;  %v765_v48 = vmul.f32 1.442695, %v748_v6  ;;  %1202 = vrcp.f32 %v547_v8  ;;  %v1720_v50 = vadd.f32 %v1563_v31, %v415_v26 }
 0x228   :  { %v1709_v47 = vpop.eup %1190  ;;  %v670_v18 = vadd.f32 -0.28449672, %v654_v58  ;;  %v623_v33 = vmul.f32 %v1679_v38, %v607_v44  ;;  %v701_v40 = vadd.f32 0.2548296, %v685_v37  ;;  %v610_v22 = vadd.f32 -1.4531521, %v594_v12 }
 0x229   :  { %v592_v36 = vmul.f32 1.0614054, %v1709_v47  ;;  %v641_v49 = vadd.f32 1.4214138, %v625_v7  ;;  %1204 = vrcp.f32 %v540_v2  ;;  %v1729_v53 = vsel %vm481_vm5, -1.0, %v2138_v46  ;;  %v1193_v2 = vpop.eup %1192 }
 0x22a   :  { %v686_v51 = vmul.f32 %v1629_v29, %v670_v18  ;;  %v1735_v58 = vsel %vm479_vm6, -1.0, %v2138_v46  ;;  %v639_v44 = vadd.f32 1.4214138, %v623_v33  ;;  %v717_v60 = vmul.f32 %v1621_v43, %v701_v40 }
 0x22b   :  { %v751_v37 = vmul.f32 %v735_v45, %v1605_v20  ;;  %v626_v55 = vmul.f32 %v1689_v52, %v610_v22  ;;  %v608_v62 = vadd.f32 -1.4531521, %v592_v36  ;;  %1206 = vpow2.f32 %v765_v48  ;;  %v1749_v20 = vpop.eup %1194 }
 0x22c   :  { %v657_v27 = vmul.f32 %v1661_v54, %v641_v49  ;;  %v738_v12 = vsub.f32 0.0, %v1616_v42  ;;  %v1743_v0 = vmul.f32 0.70710677, %v1720_v50  ;;  %v702_v30 = vadd.f32 0.2548296, %v686_v51  ;;  %v1756_v19 = vpop.eup %1196 }
 0x22d   :  { %v1746_v6 = vmul.f32 0.5, %v1601_v32  ;;  %1208 = vrcp.f32 %v550_v28  ;;  %v775_v43 = vmul.f32 1.442695, %v753_v56  ;;  %v655_v7 = vmul.f32 %v1679_v38, %v639_v44  ;;  %v1122_v56 = vpop.f32.mrf.mxu0 }
 0x22e   :  { %v1753_v8 = vmul.f32 0.5, %v1612_v1  ;;  %v736_v18 = vsub.f32 0.0, %v1626_v11  ;;  %v797_v26 = vmul.f32 %v1193_v2, %v717_v60  ;;  %v771_v16 = vmul.f32 1.442695, %v751_v37 }
 0x22f   :  { %v642_v33 = vadd.f32 1.4214138, %v626_v55  ;;  %v624_v32 = vmul.f32 %v1709_v47, %v608_v62  ;;  %v673_v45 = vadd.f32 -0.28449672, %v657_v27  ;;  %v754_v40 = vmul.f32 %v738_v12, %v1616_v42 }
 0x230   :  { %v741_v22 = vsub.f32 0.0, %v1670_v14  ;;  %v1762_v36 = vand.u32 2147483647, %v1743_v0  ;;  %v718_v1 = vmul.f32 %v1629_v29, %v702_v30  ;;  %v1768_v48 = vsel %vm482_vm7, -1.0, %v2138_v46 }
 0x231   :  { %v739_v49 = vsub.f32 0.0, %v1677_v34  ;;  %1210 = vpow2.f32 %v775_v43  ;;  %v671_v51 = vadd.f32 -0.28449672, %v655_v7  ;;  %v752_v42 = vmul.f32 %v736_v18, %v1626_v11  ;;  %v1774_v44 = vpop.eup %1198 }
 0x232   :  { %v532_v28 = vmul.f32 0.3275911, %v1762_v36  ;;  %v813_v60 = vsub.f32 1.0, %v797_v26  ;;  %1212 = vpow2.f32 %v771_v16  ;;  %v658_v29 = vmul.f32 %v1689_v52, %v642_v33  ;;  %v1201_v37 = vpop.eup %1200 }
 0x233   :  { %v640_v39 = vadd.f32 1.4214138, %v624_v32  ;;  %v689_v55 = vmul.f32 %v1661_v54, %v673_v45  ;;  %v777_v10 = vmul.f32 1.442695, %v754_v40  ;;  %v1779_v62 = vsel %vm480_vm8, -1.0, %v2138_v46 }
 0x234   :  { %v757_v27 = vmul.f32 %v741_v22, %v1670_v14  ;;  %v1782_v11 = vpop.eup %1202  ;;  %v798_v12 = vmul.f32 %v1201_v37, %v718_v1  ;;  %v755_v2 = vmul.f32 %v739_v49, %v1677_v34  ;;  %v548_v30 = vadd.f32 1.0, %v532_v28  ;;  %v428_v34 = vpop.f32.mrf.mxu0 }
 0x235   :  { %v1786_v43 = vadd.f32 %v1122_v56, %v1563_v31  ;;  %v687_v18 = vmul.f32 %v1679_v38, %v671_v51  ;;  %v773_v26 = vmul.f32 1.442695, %v752_v42  ;;  %v597_v16 = vmul.f32 1.0614054, %v1774_v44 }
 0x236   :  { %v1788_v7 = vpop.eup %1204  ;;  %v742_v33 = vsub.f32 0.0, %v1699_v35  ;;  %v829_v14 = vmul.f32 %v813_v60, %v1655_v5  ;;  %v674_v32 = vadd.f32 -0.28449672, %v658_v29  ;;  %v656_v45 = vmul.f32 %v1709_v47, %v640_v39 }
 0x237   :  { %2150 = vst [vmem:[#allocation4_spill] sm:$0xff] %v1786_v43  ;;  %1214 = vrcp.f32 %v548_v30  ;;  %v705_v40 = vadd.f32 0.2548296, %v689_v55  ;;  %v783_v22 = vmul.f32 1.442695, %v757_v27  ;;  %v814_v51 = vsub.f32 1.0, %v798_v12 }
 0x238   :  { %1216 = vpow2.f32 %v777_v10  ;;  %v595_v1 = vmul.f32 1.0614054, %v1782_v11  ;;  %v1796_v49 = vpop.eup %1206  ;;  %v779_v42 = vmul.f32 1.442695, %v755_v2  ;;  %v1800_v28 = vmul.f32 0.70710677, %v1786_v43 }
 0x239   :  { %v703_v56 = vadd.f32 0.2548296, %v687_v18  ;;  %v613_v60 = vadd.f32 -1.4531521, %v597_v16  ;;  %v758_v29 = vmul.f32 %v742_v33, %v1699_v35  ;;  %v1806_v39 = vadd.f32 %v1563_v31, %v428_v34  ;;  %v1123_v33 = vpop.f32.mrf.mxu0 }
 0x23a   :  { %2151 = vst [vmem:[#allocation5_spill] sm:$0xff] %v1800_v28  ;;  %v1802_v5 = vpop.eup %1208  ;;  %v845_v37 = vadd.f32 1.0, %v829_v14  ;;  %v690_v55 = vmul.f32 %v1689_v52, %v674_v32  ;;  %v672_v10 = vadd.f32 -0.28449672, %v656_v45  ;;  %1218 = vpow2.f32 %v773_v26 }
 0x23b   :  { %2152 = vst [vmem:[#allocation6_spill] sm:$0xff] %v1806_v39  ;;  %v721_v3 = vmul.f32 %v1661_v54, %v705_v40  ;;  %1220 = vpow2.f32 %v783_v22  ;;  %v1811_v27 = vsel %vm483_vm9, -1.0, %v2138_v46  ;;  %v611_v12 = vadd.f32 -1.4531521, %v595_v1 }
 0x23c   :  { %v830_v2 = vmul.f32 %v814_v51, %v1695_v57  ;;  %1222 = vpow2.f32 %v779_v42  ;;  %v598_v35 = vmul.f32 1.0614054, %v1802_v5  ;;  %v1816_v30 = vand.u32 2147483647, %v1800_v28 }
 0x23d   :  { %v719_v18 = vmul.f32 %v1679_v38, %v703_v56  ;;  %v629_v16 = vmul.f32 %v1774_v44, %v613_v60  ;;  %v785_v26 = vmul.f32 1.442695, %v758_v29  ;;  %v1821_v54 = vmul.f32 0.70710677, %v1806_v39 }
 0x23e   :  { %v1211_v14 = vpop.eup %1210  ;;  %v1824_v32 = vmul.f32 %v845_v37, %v1646_v63  ;;  %v706_v57 = vadd.f32 0.2548296, %v690_v55  ;;  %v688_v45 = vmul.f32 %v1709_v47, %v672_v10  ;;  %v537_v34 = vmul.f32 0.3275911, %v1816_v30 }
 0x23f   :  { %v1213_v40 = vpop.eup %1212  ;;  %v801_v22 = vmul.f32 %v1211_v14, %v721_v3  ;;  %v627_v38 = vmul.f32 %v1782_v11, %v611_v12  ;;  %v740_v1 = vsub.f32 0.0, %v1762_v36  ;;  %v1831_v51 = vand.u32 2147483647, %v1821_v54  ;;  %v431_v12 = vpop.f32.mrf.mxu0 }
 0x240   :  { %v846_v42 = vadd.f32 1.0, %v830_v2  ;;  %v614_v56 = vadd.f32 -1.4531521, %v598_v35  ;;  %v553_v60 = vadd.f32 1.0, %v537_v34  ;;  %v1834_v63 = vadd.f32 %v1123_v33, %v1563_v31 }
 0x241   :  { %v799_v29 = vmul.f32 %v1213_v40, %v719_v18  ;;  %v645_v37 = vadd.f32 1.4214138, %v629_v16  ;;  %1224 = vpow2.f32 %v785_v26  ;;  %v535_v55 = vmul.f32 0.3275911, %v1831_v51 }
 0x242   :  { %2153 = vst [vmem:[#allocation7_spill] sm:$0xff] %v1834_v63  ;;  %v722_v10 = vmul.f32 %v1689_v52, %v706_v57  ;;  %v704_v3 = vadd.f32 0.2548296, %v688_v45  ;;  %vm484_vm10 = vcmp.lt.f32.partialorder %v1743_v0, 0.0  ;;  %1226 = vrcp.f32 %v553_v60 }
 0x243   :  { %v817_v2 = vsub.f32 1.0, %v801_v22  ;;  %v643_v35 = vadd.f32 1.4214138, %v627_v38  ;;  %v756_v34 = vmul.f32 %v740_v1, %v1762_v36  ;;  %v551_v33 = vadd.f32 1.0, %v535_v55 }
 0x244   :  { %v1839_v14 = vpop.eup %1214  ;;  %v1843_v18 = vmul.f32 %v846_v42, %v1667_v13  ;;  %v630_v16 = vmul.f32 %v1802_v5, %v614_v56  ;;  %v1848_v26 = vmul.f32 0.70710677, %v1834_v63  ;;  %v815_v57 = vsub.f32 1.0, %v799_v29 }
 0x245   :  { %v1217_v46 = vpop.eup %1216  ;;  %v596_v52 = vmul.f32 1.0614054, %v1839_v14  ;;  %v661_v45 = vmul.f32 %v1774_v44, %v645_v37  ;;  %1228 = vrcp.f32 %v551_v33  ;;  %v1852_v40 = vadd.f32 %v1563_v31, %v431_v12 }
 0x246   :  { %v802_v36 = vmul.f32 %v1217_v46, %v722_v10  ;;  %v720_v22 = vmul.f32 %v1709_v47, %v704_v3  ;;  %v1856_v13 = vand.u32 2147483647, %v1848_v26  ;;  %v1859_v42 = vmul.f32 %v817_v2, %v1729_v53 }
 0x247   :  { %2154 = vst [vmem:[#allocation8_spill] sm:$0xff] %v1852_v40  ;;  %v612_v38 = vadd.f32 -1.4531521, %v596_v52  ;;  %v1219_v1 = vpop.eup %1218  ;;  %v659_v56 = vmul.f32 %v1782_v11, %v643_v35  ;;  %v2155_v60 = vmov 1.0   ;;  %v781_v31 = vmul.f32 1.442695, %v756_v34 }
 0x248   :  { %v1865_v29 = vsel %vm484_vm10, -1.0, %v2155_v60  ;;  %v1867_v37 = vpop.eup %1220  ;;  %v646_v46 = vadd.f32 1.4214138, %v630_v16  ;;  %v538_v55 = vmul.f32 0.3275911, %v1856_v13  ;;  %v831_v3 = vmul.f32 %v815_v57, %v1735_v58 }
 0x249   :  { %v628_v47 = vmul.f32 %v1839_v14, %v612_v38  ;;  %v1872_v10 = vmul.f32 0.70710677, %v1852_v40  ;;  %v1874_v53 = vpop.eup %1222  ;;  %v677_v12 = vadd.f32 -0.28449672, %v661_v45  ;;  %v587_v0 = vmul.f32 1.0614054, %v1749_v20 }
 0x24a   :  { %v588_v2 = vmul.f32 1.0614054, %v1788_v7  ;;  %v818_v35 = vsub.f32 1.0, %v802_v36  ;;  %v800_v34 = vmul.f32 %v1219_v1, %v720_v22  ;;  %v554_v16 = vadd.f32 1.0, %v538_v55 }
 0x24b   :  { %2156 = vst [vmem:[#allocation9_spill] sm:$0xff] %v1872_v10  ;;  %v644_v33 = vadd.f32 1.4214138, %v628_v47  ;;  %v675_v52 = vadd.f32 -0.28449672, %v659_v56  ;;  %1230 = vpow2.f32 %v781_v31  ;;  %v662_v63 = vmul.f32 %v1802_v5, %v646_v46 }
 0x24c   :  { %v1880_v38 = vand.u32 2147483647, %v1872_v10  ;;  %v603_v43 = vadd.f32 -1.4531521, %v587_v0  ;;  %1232 = vrcp.f32 %v554_v16  ;;  %v604_v58 = vadd.f32 -1.4531521, %v588_v2 }
 0x24d   :  { %v660_v40 = vmul.f32 %v1839_v14, %v644_v33  ;;  %v1884_v57 = vadd.f32 1.0, %v831_v3  ;;  %v693_v45 = vmul.f32 %v1774_v44, %v677_v12  ;;  %v1892_v56 = vmul.f32 %v818_v35, %v1768_v48 }
 0x24e   :  { %v536_v36 = vmul.f32 0.3275911, %v1880_v38  ;;  %v619_v22 = vmul.f32 %v1749_v20, %v603_v43  ;;  %v1889_v1 = vpop.eup %1224  ;;  %v816_v31 = vsub.f32 1.0, %v800_v34  ;;  %v620_v46 = vmul.f32 %v1788_v7, %v604_v58 }
 0x24f   :  { %v676_v47 = vadd.f32 -0.28449672, %v660_v40  ;;  %v1895_v55 = vpop.eup %1226  ;;  %v691_v3 = vmul.f32 %v1782_v11, %v675_v52  ;;  %v743_v0 = vsub.f32 0.0, %v1831_v51  ;;  %v678_v33 = vadd.f32 -0.28449672, %v662_v63 }
 0x250   :  { %v552_v12 = vadd.f32 1.0, %v536_v36  ;;  %v635_v2 = vadd.f32 1.4214138, %v619_v22  ;;  %v601_v16 = vmul.f32 1.0614054, %v1895_v55  ;;  %v745_v35 = vsub.f32 0.0, %v1816_v30 }
 0x251   :  { %v692_v43 = vmul.f32 %v1839_v14, %v676_v47  ;;  %v636_v39 = vadd.f32 1.4214138, %v620_v46  ;;  %v709_v48 = vadd.f32 0.2548296, %v693_v45  ;;  %v746_v17 = vsub.f32 0.0, %v1856_v13 }
 0x252   :  { %1234 = vrcp.f32 %v552_v12  ;;  %v651_v40 = vmul.f32 %v1749_v20, %v635_v2  ;;  %v1903_v34 = vpop.eup %1228  ;;  %v617_v52 = vadd.f32 -1.4531521, %v601_v16  ;;  %v832_v63 = vmul.f32 %v816_v31, %v1779_v62 }
 0x253   :  { %v708_v58 = vadd.f32 0.2548296, %v692_v43  ;;  %v652_v36 = vmul.f32 %v1788_v7, %v636_v39  ;;  %v599_v22 = vmul.f32 1.0614054, %v1903_v34  ;;  %v759_v47 = vmul.f32 %v743_v0, %v1831_v51 }
 0x254   :  { %v667_v45 = vadd.f32 -0.28449672, %v651_v40  ;;  %v707_v46 = vadd.f32 0.2548296, %v691_v3  ;;  %v694_v12 = vmul.f32 %v1802_v5, %v678_v33  ;;  %v633_v2 = vmul.f32 %v1895_v55, %v617_v52 }
 0x255   :  { %v668_v10 = vadd.f32 -0.28449672, %v652_v36  ;;  %v725_v43 = vmul.f32 %v1774_v44, %v709_v48  ;;  %v761_v16 = vmul.f32 %v745_v35, %v1816_v30  ;;  %v615_v28 = vadd.f32 -1.4531521, %v599_v22 }
 0x256   :  { %v683_v39 = vmul.f32 %v1749_v20, %v667_v45  ;;  %v724_v62 = vmul.f32 %v1839_v14, %v708_v58  ;;  %v649_v31 = vadd.f32 1.4214138, %v633_v2  ;;  %v762_v9 = vmul.f32 %v746_v17, %v1856_v13 }
 0x257   :  { %v684_v51 = vmul.f32 %v1788_v7, %v668_v10  ;;  %v631_v3 = vmul.f32 %v1903_v34, %v615_v28  ;;  %v787_v0 = vmul.f32 1.442695, %v759_v47  ;;  %v744_v33 = vsub.f32 0.0, %v1880_v38 }
 0x258   :  { %v699_v40 = vadd.f32 0.2548296, %v683_v39  ;;  %v1231_v52 = vpop.eup %1230  ;;  %v848_v44 = vadd.f32 1.0, %v832_v63  ;;  %v723_v30 = vmul.f32 %v1782_v11, %v707_v46  ;;  %v710_v48 = vadd.f32 0.2548296, %v694_v12 }
 0x259   :  { %v700_v35 = vadd.f32 0.2548296, %v684_v51  ;;  %v1921_v36 = vpop.eup %1232  ;;  %v665_v14 = vmul.f32 %v1895_v55, %v649_v31  ;;  %v791_v58 = vmul.f32 1.442695, %v761_v16  ;;  %v647_v17 = vadd.f32 1.4214138, %v631_v3 }
 0x25a   :  { %v715_v13 = vmul.f32 %v1749_v20, %v699_v40  ;;  %v804_v10 = vmul.f32 %v1231_v52, %v724_v62  ;;  %v602_v28 = vmul.f32 1.0614054, %v1921_v36  ;;  %v793_v22 = vmul.f32 1.442695, %v762_v9 }
 0x25b   :  { %v716_v47 = vmul.f32 %v1788_v7, %v700_v35  ;;  %v663_v63 = vmul.f32 %v1903_v34, %v647_v17  ;;  %1236 = vpow2.f32 %v787_v0  ;;  %v760_v11 = vmul.f32 %v744_v33, %v1880_v38 }
 0x25c   :  { %v795_v45 = vmul.f32 %v1756_v19, %v715_v13  ;;  %v803_v46 = vmul.f32 %v1874_v53, %v723_v30  ;;  %v726_v12 = vmul.f32 %v1802_v5, %v710_v48  ;;  %v618_v2 = vadd.f32 -1.4531521, %v602_v28 }
 0x25d   :  { %v796_v20 = vmul.f32 %v1796_v49, %v716_v47  ;;  %v681_v16 = vadd.f32 -0.28449672, %v665_v14  ;;  %1238 = vpow2.f32 %v791_v58  ;;  %v679_v39 = vadd.f32 -0.28449672, %v663_v63 }
 0x25e   :  { %v811_v9 = vsub.f32 1.0, %v795_v45  ;;  %v820_v62 = vsub.f32 1.0, %v804_v10  ;;  %v634_v31 = vmul.f32 %v1921_v36, %v618_v2  ;;  %1240 = vpow2.f32 %v793_v22 }
 0x25f   :  { %v1933_v7 = vpop.eup %1234  ;;  %v812_v38 = vsub.f32 1.0, %v796_v20  ;;  %v695_v19 = vmul.f32 %v1903_v34, %v679_v39  ;;  %v789_v53 = vmul.f32 1.442695, %v760_v11  ;;  %v863_v51 = vmul.f32 %v1884_v57, %v1724_v23 }
 0x260   :  { %v600_v5 = vmul.f32 1.0614054, %v1933_v7  ;;  %v827_v49 = vmul.f32 %v811_v9, %v1664_v4  ;;  %v819_v3 = vsub.f32 1.0, %v803_v46  ;;  %v650_v0 = vadd.f32 1.4214138, %v634_v31 }
 0x261   :  { %v828_v33 = vmul.f32 %v812_v38, %v1702_v15  ;;  %v697_v40 = vmul.f32 %v1895_v55, %v681_v16  ;;  %v711_v52 = vadd.f32 0.2548296, %v695_v19  ;;  %v864_v35 = vmul.f32 %v848_v44, %v1753_v8 }
 0x262   :  { %v616_v30 = vadd.f32 -1.4531521, %v600_v5  ;;  %v843_v48 = vadd.f32 1.0, %v827_v49  ;;  %v836_v14 = vmul.f32 %v820_v62, %v1865_v29  ;;  %v666_v4 = vmul.f32 %v1921_v36, %v650_v0 }
 0x263   :  { %v844_v58 = vadd.f32 1.0, %v828_v33  ;;  %v805_v23 = vmul.f32 %v1867_v37, %v725_v43  ;;  %v806_v57 = vmul.f32 %v1889_v1, %v726_v12  ;;  %1242 = vpow2.f32 %v789_v53 }
 0x264   :  { %v632_v17 = vmul.f32 %v1933_v7, %v616_v30  ;;  %v835_v15 = vmul.f32 %v819_v3, %v1811_v27  ;;  %v682_v13 = vadd.f32 -0.28449672, %v666_v4  ;;  %v859_v10 = vmul.f32 %v843_v48, %v1649_v25 }
 0x265   :  { %v860_v28 = vmul.f32 %v844_v58, %v1681_v41  ;;  %v850_v8 = vadd.f32 1.0, %v1892_v56  ;;  %v713_v29 = vadd.f32 0.2548296, %v697_v40  ;;  %v727_v44 = vmul.f32 %v1903_v34, %v711_v52  ;;  %v2157_v40 = vld [vmem:[#allocation3_spill] sm:$0xff]  ;;  %v2158_v52 = vld [vmem:[#allocation5_spill] sm:$0xff] }
 0x266   :  { %v648_v22 = vadd.f32 1.4214138, %v632_v17  ;;  %v877_v47 = vpack.c.bf16 %v864_v35, %v863_v51  ;;  %v852_v37 = vadd.f32 1.0, %v836_v14  ;;  %v698_v1 = vmul.f32 %v1921_v36, %v682_v13  ;;  %v2159_v35 = vld [vmem:[#allocation9_spill] sm:$0xff] }
 0x267   :  { %v875_v43 = vpack.c.bf16 %v860_v28, %v859_v10  ;;  %v876_v63 = vpack.c.bf16 %v1843_v18, %v1824_v32  ;;  %v822_v27 = vsub.f32 1.0, %v806_v57  ;;  %v452_v11 = vmul.f32 0.5, %v1720_v50 }
 0x268   :  { %v664_v25 = vmul.f32 %v1933_v7, %v648_v22  ;;  %v1237_v41 = vpop.eup %1236  ;;  %v849_v56 = vadd.f32 1.0, %v1859_v42  ;;  %v821_v45 = vsub.f32 1.0, %v805_v23  ;;  %v851_v46 = vadd.f32 1.0, %v835_v15 }
 0x269   :  { %v714_v34 = vadd.f32 0.2548296, %v698_v1  ;;  %1128 = vmatprep.mubr.msk.bf16.mxu1 %vm906_vm11, %v875_v43  ;;  %v451_v12 = vmul.f32 0.5, %v1639_v59  ;;  %v729_v2 = vmul.f32 %v1895_v55, %v713_v29  ;;  %v807_v20 = vmul.f32 %v1237_v41, %v727_v44  ;;  %v2161_v29 = vld [vmem:[#allocation6_spill] sm:$0xff] }
 0x26a   :  { %v680_v16 = vadd.f32 -0.28449672, %v664_v25  ;;  %1129 = vmatmul.mubr.msk.bf16.vlgmr.msra.gmra.mxu1 %vm906_vm11, %v876_v63  ;;  %v1239_v32 = vpop.eup %1238  ;;  %v866_v50 = vmul.f32 %v850_v8, %v1746_v6  ;;  %v502_v18 = vsel %vm486_vm12, -1.0, %v2155_v60  ;;  %v868_v42 = vmul.f32 %v852_v37, %v452_v11  ;;  %v2162_v37 = vld [vmem:[#allocation8_spill] sm:$0xff]  ;;  %v2163_v11 = vld [vmem:[#allocation7_spill] sm:$0xff] }
 0x26b   :  { %v730_v39 = vmul.f32 %v1921_v36, %v714_v34  ;;  %1132 = vmatprep.mubr.msk.bf16.mxu1 %vm906_vm11, %v877_v47  ;;  %v1241_v9 = vpop.eup %1240  ;;  %v501_v59 = vsel %vm485_vm13, -1.0, %v2155_v60  ;;  %v838_v55 = vmul.f32 %v822_v27, %v502_v18  ;;  %v865_v31 = vmul.f32 %v849_v56, %v1706_v21  ;;  %v2164_v56 = vld [vmem:[#allocation4_spill] sm:$0xff] }
 0x26c   :  { %v696_v62 = vmul.f32 %v1933_v7, %v680_v16  ;;  %v837_v6 = vmul.f32 %v821_v45, %v501_v59  ;;  %v867_v38 = vmul.f32 %v851_v46, %v451_v12  ;;  %v809_v24 = vmul.f32 %v1239_v32, %v729_v2  ;;  %v2000_v2 = vld [vmem:[%s2136_s6] ss:$0 sm:$0xff] }
 0x26d   :  { %v810_v19 = vmul.f32 %v1241_v9, %v730_v39  ;;  %vm487_vm14 = vcmp.lt.f32.partialorder %v1821_v54, 0.0  ;;  %v823_v5 = vsub.f32 1.0, %v807_v20  ;;  %v878_v53 = vpack.c.bf16 %v866_v50, %v865_v31  ;;  %v1244_v50 = vld [vmem:[%s2130_s0 + $0x10] sm:$0xff]  ;;  %v1245_v9 = vld [vmem:[%s2130_s0] sm:$0xff]  ;;  %v1246_v31 = vld [vmem:[%s2130_s0 + $0x18] sm:$0xff] }
 0x26e   :  { %v712_v36 = vadd.f32 0.2548296, %v696_v62  ;;  %v879_v49 = vpack.c.bf16 %v868_v42, %v867_v38  ;;  %v854_v51 = vadd.f32 1.0, %v838_v55  ;;  %vm490_vm15 = vcmp.lt.f32.partialorder %v1848_v26, 0.0 }
 0x26f   :  { %v826_v61 = vsub.f32 1.0, %v810_v19  ;;  %v853_v33 = vadd.f32 1.0, %v837_v6  ;;  %v454_v21 = vmul.f32 0.5, %v2157_v40  ;;  %vm489_vm1 = vcmp.lt.f32.partialorder %v2158_v52, 0.0  ;;  %v1250_v52 = vld [vmem:[%s2130_s0 + $0x38] sm:$0xff] }
 0x270   :  { %v728_v3 = vmul.f32 %v1933_v7, %v712_v36  ;;  %v1243_v0 = vpop.eup %1242  ;;  %v503_v30 = vsel %vm487_vm14, -1.0, %v2155_v60  ;;  %v825_v48 = vsub.f32 1.0, %v809_v24  ;;  %vm488_vm2 = vcmp.lt.f32.partialorder %v2159_v35, 0.0  ;;  %v2160_v7 = vld [vmem:[#allocation2_spill] sm:$0xff]  ;;  %v1247_v24 = vld [vmem:[%s2130_s0 + $0x8] sm:$0xff] }
 0x271   :  { %v839_v54 = vmul.f32 %v823_v5, %v503_v30  ;;  %v506_v26 = vsel %vm490_vm15, -1.0, %v2155_v60  ;;  %v453_v4 = vmul.f32 0.5, %v2160_v7  ;;  %v870_v58 = vmul.f32 %v854_v51, %v454_v21  ;;  %v1251_v35 = vld [vmem:[%s2130_s0 + $0x28] sm:$0xff] }
 0x272   :  { %v808_v14 = vmul.f32 %v1243_v0, %v728_v3  ;;  %1133 = vmatmul.mubr.msk.bf16.gmra.mxu1 %vm906_vm11, %v878_v53  ;;  %v842_v23 = vmul.f32 %v826_v61, %v506_v26  ;;  %v505_v17 = vsel %vm489_vm1, -1.0, %v2155_v60  ;;  %v504_v15 = vsel %vm488_vm2, -1.0, %v2155_v60  ;;  %v1249_v0 = vld [vmem:[%s2130_s0 + $0x20] sm:$0xff] }
 0x273   :  { %1136 = vmatprep.mubr.msk.bf16.mxu1 %vm906_vm11, %v879_v49  ;;  %v869_v13 = vmul.f32 %v853_v33, %v453_v4  ;;  %v841_v10 = vmul.f32 %v825_v48, %v505_v17  ;;  %v855_v28 = vadd.f32 1.0, %v839_v54  ;;  %v455_v44 = vmul.f32 0.5, %v2161_v29  ;;  %v1248_v49 = vld [vmem:[%s2130_s0 + $0x30] sm:$0xff]  ;;  %v1253_v17 = vld [vmem:[%s2130_s0 + $0x40] sm:$0xff] }
 0x274   :  { %v824_v57 = vsub.f32 1.0, %v808_v14  ;;  %v858_v47 = vadd.f32 1.0, %v842_v23  ;;  %v456_v1 = vmul.f32 0.5, %v2162_v37  ;;  %v458_v25 = vmul.f32 0.5, %v2163_v11  ;;  %v1252_v4 = vld [vmem:[%s2130_s0 + $0x50] sm:$0xff] }
 0x275   :  { %v880_v22 = vpack.c.bf16 %v870_v58, %v869_v13  ;;  %v857_v63 = vadd.f32 1.0, %v841_v10  ;;  %v871_v27 = vmul.f32 %v855_v28, %v455_v44  ;;  %v457_v60 = vmul.f32 0.5, %v2164_v56  ;;  %v1254_v28 = vld [vmem:[%s2130_s0 + $0x58] sm:$0xff] }
 0x276   :  { %v840_v8 = vmul.f32 %v824_v57, %v504_v15  ;;  %v874_v45 = vmul.f32 %v858_v47, %v458_v25  ;;  %v1257_v25 = vld [vmem:[%s2130_s0 + $0x60] sm:$0xff] }
 0x277   :  { %v873_v34 = vmul.f32 %v857_v63, %v457_v60 }
 0x278   :  { %v856_v43 = vadd.f32 1.0, %v840_v8 }
 0x279   :  { %v882_v12 = vpack.c.bf16 %v874_v45, %v873_v34  ;;  %v1258_v45 = vld [vmem:[%s2130_s0 + $0x78] sm:$0xff] }
 0x27a   :  { %v872_v41 = vmul.f32 %v856_v43, %v456_v1  ;;  %1137 = vmatmul.mubr.msk.bf16.gmra.mxu1 %vm906_vm11, %v880_v22  ;;  %v1255_v22 = vld [vmem:[%s2130_s0 + $0x48] sm:$0xff]  ;;  %v1256_v43 = vld [vmem:[%s2130_s0 + $0x70] sm:$0xff] }
 0x27c   :  { %v881_v46 = vpack.c.bf16 %v872_v41, %v871_v27 }
 0x27e   :  { %1140 = vmatprep.mubr.msk.bf16.mxu1 %vm906_vm11, %v881_v46 }
 0x282   :  { %1141 = vmatmul.mubr.msk.bf16.gmra.mxu1 %vm906_vm11, %v882_v12  ;;  %v1259_v12 = vld [vmem:[%s2130_s0 + $0x68] sm:$0xff] }
 0x32a   :  { %v1130_v20 = vpop.f32.mrf.mxu1 }
 0x32b   :  { %v974_v16 = vadd.f32 %v1130_v20, %v2000_v2 }
 0x32c   :  { %v965_v32 = vpop.f32.mrf.mxu1 }
 0x32d   :  { %v1030_v18 = vadd.f32 %v1244_v50, %v974_v16  ;;  %v966_v42 = vadd.f32 %v2000_v2, %v965_v32 }
 0x32e   :  { %v1131_v39 = vpop.f32.mrf.mxu1 }
 0x32f   :  { %1046 = vst.msk [vmem:[%s2137_s7 + $0x10] sm:$0xff] %vm45_vm0, %v1030_v18  ;;  %v1028_v59 = vadd.f32 %v1245_v9, %v966_v42  ;;  %v977_v55 = vadd.f32 %v1131_v39, %v2000_v2 }
 0x330   :  { %v968_v62 = vpop.f32.mrf.mxu1 }
 0x331   :  { %1044 = vst.msk [vmem:[%s2137_s7] sm:$0xff] %vm45_vm0, %v1028_v59  ;;  %v1031_v6 = vadd.f32 %v1246_v31, %v977_v55  ;;  %v969_v38 = vadd.f32 %v2000_v2, %v968_v62 }
 0x332   :  { %v1134_v19 = vpop.f32.mrf.mxu1 }
 0x333   :  { %1047 = vst.msk [vmem:[%s2137_s7 + $0x18] sm:$0xff] %vm45_vm0, %v1031_v6  ;;  %v1029_v5 = vadd.f32 %v1247_v24, %v969_v38  ;;  %v990_v36 = vadd.f32 %v1134_v19, %v2000_v2 }
 0x334   :  { %v981_v53 = vpop.f32.mrf.mxu1 }
 0x335   :  { %1045 = vst.msk [vmem:[%s2137_s7 + $0x8] sm:$0xff] %vm45_vm0, %v1029_v5  ;;  %v1034_v51 = vadd.f32 %v1248_v49, %v990_v36  ;;  %v982_v61 = vadd.f32 %v2000_v2, %v981_v53 }
 0x336   :  { %v1135_v3 = vpop.f32.mrf.mxu1 }
 0x337   :  { %1050 = vst.msk [vmem:[%s2137_s7 + $0x30] sm:$0xff] %vm45_vm0, %v1034_v51  ;;  %v1032_v33 = vadd.f32 %v1249_v0, %v982_v61  ;;  %v993_v40 = vadd.f32 %v1135_v3, %v2000_v2 }
 0x338   :  { %v984_v21 = vpop.f32.mrf.mxu1 }
 0x339   :  { %1048 = vst.msk [vmem:[%s2137_s7 + $0x20] sm:$0xff] %vm45_vm0, %v1032_v33  ;;  %v1035_v30 = vadd.f32 %v1250_v52, %v993_v40  ;;  %v985_v48 = vadd.f32 %v2000_v2, %v984_v21 }
 0x33a   :  { %v1138_v54 = vpop.f32.mrf.mxu1 }
 0x33b   :  { %1051 = vst.msk [vmem:[%s2137_s7 + $0x38] sm:$0xff] %vm45_vm0, %v1035_v30  ;;  %v1033_v14 = vadd.f32 %v1251_v35, %v985_v48  ;;  %v1006_v26 = vadd.f32 %v1138_v54, %v2000_v2 }
 0x33c   :  { %v997_v7 = vpop.f32.mrf.mxu1 }
 0x33d   :  { %1049 = vst.msk [vmem:[%s2137_s7 + $0x28] sm:$0xff] %vm45_vm0, %v1033_v14  ;;  %v1038_v58 = vadd.f32 %v1252_v4, %v1006_v26  ;;  %v998_v23 = vadd.f32 %v2000_v2, %v997_v7 }
 0x33e   :  { %v1139_v57 = vpop.f32.mrf.mxu1 }
 0x33f   :  { %1054 = vst.msk [vmem:[%s2137_s7 + $0x50] sm:$0xff] %vm45_vm0, %v1038_v58  ;;  %v1036_v15 = vadd.f32 %v1253_v17, %v998_v23  ;;  %v1009_v13 = vadd.f32 %v1139_v57, %v2000_v2 }
 0x340   :  { %v1000_v10 = vpop.f32.mrf.mxu1 }
 0x341   :  { %1052 = vst.msk [vmem:[%s2137_s7 + $0x40] sm:$0xff] %vm45_vm0, %v1036_v15  ;;  %v1039_v8 = vadd.f32 %v1254_v28, %v1009_v13  ;;  %v1001_v29 = vadd.f32 %v2000_v2, %v1000_v10 }
 0x342   :  { %v1142_v44 = vpop.f32.mrf.mxu1 }
 0x343   :  { %1055 = vst.msk [vmem:[%s2137_s7 + $0x58] sm:$0xff] %vm45_vm0, %v1039_v8  ;;  %v1037_v47 = vadd.f32 %v1255_v22, %v1001_v29  ;;  %v1022_v37 = vadd.f32 %v1142_v44, %v2000_v2 }
 0x344   :  { %v1013_v1 = vpop.f32.mrf.mxu1 }
 0x345   :  { %1053 = vst.msk [vmem:[%s2137_s7 + $0x48] sm:$0xff] %vm45_vm0, %v1037_v47  ;;  %v1042_v63 = vadd.f32 %v1256_v43, %v1022_v37  ;;  %v1014_v27 = vadd.f32 %v2000_v2, %v1013_v1 }
 0x346   :  { %v1143_v11 = vpop.f32.mrf.mxu1 }
 0x347   :  { %1058 = vst.msk [vmem:[%s2137_s7 + $0x70] sm:$0xff] %vm45_vm0, %v1042_v63  ;;  %v1040_v41 = vadd.f32 %v1257_v25, %v1014_v27  ;;  %v1025_v56 = vadd.f32 %v1143_v11, %v2000_v2 }
 0x348   :  { %v1016_v60 = vpop.f32.mrf.mxu1 }
 0x349   :  { %1056 = vst.msk [vmem:[%s2137_s7 + $0x60] sm:$0xff] %vm45_vm0, %v1040_v41  ;;  %v1043_v46 = vadd.f32 %v1258_v45, %v1025_v56  ;;  %v1017_v34 = vadd.f32 %v2000_v2, %v1016_v60 }
 0x34b   :  { %1059 = vst.msk [vmem:[%s2137_s7 + $0x78] sm:$0xff] %vm45_vm0, %v1043_v46  ;;  %v1041_v20 = vadd.f32 %v1259_v12, %v1017_v34 }
 0x34d   :  { %1057 = vst.msk [vmem:[%s2137_s7 + $0x68] sm:$0xff] %vm45_vm0, %v1041_v20 }

// kernel: _lambda_.28
= control target key start
LH: loop header
LB: loop body
LE: loop exit
PB: predicated region body
PF: predicated region fallthrough
CT: control target
= control target key end

     0   :  { %vm31_vm0 = vcmask 261120   ;;  %s491_s0 = inlined_call_operand.vmem [shape: f32[64,32], index: 0, kind: input, shape index: {}]   ;;  %s492_s3 = inlined_call_operand.vmem [shape: bf16[32,32], index: 3, kind: input, shape index: {}]   ;;  %s493_s1 = inlined_call_operand.vmem [shape: f32[1,32], index: 1, kind: input, shape index: {}]   ;;  %s494_s2 = inlined_call_operand.vmem [shape: f32[1,32], index: 2, kind: input, shape index: {}]   ;;  %s495_s4 = inlined_call_operand.vmem [shape: f32[1,32], index: 4, kind: input, shape index: {}]   ;;  %s496_s5 = inlined_call_operand.vmem [shape: f32[64,32], index: 5, kind: output, shape index: {}]  }
   0x1   :  { %v21_v0 = vld [vmem:[%s491_s0] sm:$0xff]  ;;  %v22_v2 = vld [vmem:[%s491_s0 + $0x8] sm:$0xff]  ;;  %v23_v8 = vld [vmem:[%s491_s0 + $0x10] sm:$0xff] }
   0x2   :  { %v25_v1 = vld [vmem:[%s491_s0 + $0x20] sm:$0xff]  ;;  %v32_v3 = vsel %vm31_vm0, %v21_v0, 0.0  ;;  %v26_v5 = vld [vmem:[%s491_s0 + $0x28] sm:$0xff]  ;;  %v35_v6 = vsel %vm31_vm0, %v22_v2, 0.0  ;;  %v24_v9 = vld [vmem:[%s491_s0 + $0x18] sm:$0xff]  ;;  %v38_v10 = vsel %vm31_vm0, %v23_v8, 0.0 }
   0x3   :  { %v44_v4 = vsel %vm31_vm0, %v25_v1, 0.0  ;;  %33 = vadd.xlane.f32.xlu0 %v32_v3  ;;  %v47_v7 = vsel %vm31_vm0, %v26_v5, 0.0  ;;  %v41_v11 = vsel %vm31_vm0, %v24_v9, 0.0  ;;  %v27_v12 = vld [vmem:[%s491_s0 + $0x30] sm:$0xff]  ;;  %v28_v13 = vld [vmem:[%s491_s0 + $0x38] sm:$0xff]  ;;  %v312_v56 = vld [vmem:[%s492_s3 + $0x8] sm:$0xff]  }
   0x4   :  { %45 = vadd.xlane.f32.xlu1 %v44_v4  ;;  %v50_v14 = vsel %vm31_vm0, %v27_v12, 0.0  ;;  %v53_v15 = vsel %vm31_vm0, %v28_v13, 0.0  ;;  %296 = vmatprep.subr.bf16.mxu0 %v312_v56  ;;  %v313_v57 = vld [vmem:[%s492_s3] sm:$0xff]  }
   0x5   :  { %308 = vmatprep.subr.bf16.mxu1 %v312_v56  ;;  %297 = vmatpush3.bf16.msra.mxu0 %v312_v56 }
   0x6   :  { %310 = vmatpush3.bf16.msra.mxu1 %v312_v56  ;;  %298 = vmatprep.subr.bf16.mxu0 %v313_v57 }
   0x7   :  { %36 = vadd.xlane.f32.xlu0 %v35_v6  ;;  %309 = vmatprep.subr.bf16.mxu1 %v313_v57 }
   0x8   :  { %48 = vadd.xlane.f32.xlu1 %v47_v7 }
   0x9   :  { %299 = vmatpush3.bf16.msra.mxu0 %v313_v57 }
   0xa   :  { %311 = vmatpush3.bf16.msra.mxu1 %v313_v57 }
   0xb   :  { %39 = vadd.xlane.f32.xlu0 %v38_v10 }
   0xc   :  { %42 = vadd.xlane.f32.xlu1 %v41_v11 }
   0xf   :  { %51 = vadd.xlane.f32.xlu0 %v50_v14 }
  0x10   :  { %54 = vadd.xlane.f32.xlu1 %v53_v15 }
  0x8c   :  { %v34_v16 = vpop.xlane.xlu0 %33 }
  0x8d   :  { %v46_v17 = vpop.xlane.xlu1 %45  ;;  %v57_v18 = vmul.f32 0.03125, %v34_v16 }
  0x8e   :  { %v61_v19 = vmul.f32 0.03125, %v46_v17 }
  0x8f   :  { %v392_v20 = vsub.f32 %v21_v0, %v57_v18 }
  0x90   :  { %v394_v21 = vsub.f32 %v25_v1, %v61_v19  ;;  %v37_v22 = vpop.xlane.xlu0 %36 }
  0x91   :  { %v49_v23 = vpop.xlane.xlu1 %48  ;;  %v58_v24 = vmul.f32 0.03125, %v37_v22  ;;  %v73_v26 = vmul.f32 %v392_v20, %v392_v20  ;;  %v281_v22 = vld [vmem:[%s493_s1] ss:$0 sm:$0xff] }
  0x92   :  { %v62_v25 = vmul.f32 0.03125, %v49_v23  ;;  %v77_v27 = vmul.f32 %v394_v21, %v394_v21 }
  0x93   :  { %v400_v28 = vsub.f32 %v22_v2, %v58_v24  ;;  %v81_v30 = vsel %vm31_vm0, %v73_v26, 0.0 }
  0x94   :  { %v402_v29 = vsub.f32 %v26_v5, %v62_v25  ;;  %82 = vadd.xlane.f32.xlu0 %v81_v30  ;;  %v40_v31 = vpop.xlane.xlu0 %39  ;;  %v93_v33 = vsel %vm31_vm0, %v77_v27, 0.0  ;;  %v282_v27 = vld [vmem:[%s494_s2] ss:$0 sm:$0xff] }
  0x95   :  { %v43_v32 = vpop.xlane.xlu1 %42  ;;  %v59_v34 = vmul.f32 0.03125, %v40_v31  ;;  %v74_v36 = vmul.f32 %v400_v28, %v400_v28 }
  0x96   :  { %v60_v35 = vmul.f32 0.03125, %v43_v32  ;;  %v78_v37 = vmul.f32 %v402_v29, %v402_v29 }
  0x97   :  { %v410_v38 = vsub.f32 %v23_v8, %v59_v34  ;;  %v84_v40 = vsel %vm31_vm0, %v74_v36, 0.0 }
  0x98   :  { %v412_v39 = vsub.f32 %v24_v9, %v60_v35  ;;  %94 = vadd.xlane.f32.xlu0 %v93_v33  ;;  %85 = vadd.xlane.f32.xlu1 %v84_v40  ;;  %v52_v41 = vpop.xlane.xlu0 %51  ;;  %v96_v43 = vsel %vm31_vm0, %v78_v37, 0.0 }
  0x99   :  { %v55_v42 = vpop.xlane.xlu1 %54  ;;  %v63_v44 = vmul.f32 0.03125, %v52_v41  ;;  %v75_v46 = vmul.f32 %v410_v38, %v410_v38 }
  0x9a   :  { %v64_v45 = vmul.f32 0.03125, %v55_v42  ;;  %v76_v47 = vmul.f32 %v412_v39, %v412_v39 }
  0x9b   :  { %v420_v48 = vsub.f32 %v27_v12, %v63_v44  ;;  %v87_v50 = vsel %vm31_vm0, %v75_v46, 0.0 }
  0x9c   :  { %v422_v49 = vsub.f32 %v28_v13, %v64_v45  ;;  %97 = vadd.xlane.f32.xlu1 %v96_v43  ;;  %88 = vadd.xlane.f32.xlu0 %v87_v50  ;;  %v90_v51 = vsel %vm31_vm0, %v76_v47, 0.0 }
  0x9d   :  { %v79_v52 = vmul.f32 %v420_v48, %v420_v48 }
  0x9e   :  { %v80_v53 = vmul.f32 %v422_v49, %v422_v49 }
  0x9f   :  { %v99_v54 = vsel %vm31_vm0, %v79_v52, 0.0 }
  0xa0   :  { %91 = vadd.xlane.f32.xlu1 %v90_v51  ;;  %100 = vadd.xlane.f32.xlu0 %v99_v54  ;;  %v102_v55 = vsel %vm31_vm0, %v80_v53, 0.0 }
  0xa4   :  { %103 = vadd.xlane.f32.xlu1 %v102_v55 }
 0x11d   :  { %v83_v58 = vpop.xlane.xlu0 %82 }
 0x11e   :  { %v105_v59 = vmul.f32 0.03125, %v83_v58 }
 0x120   :  { %v113_v60 = vadd.f32 1e-05, %v105_v59 }
 0x121   :  { %v86_v61 = vpop.xlane.xlu1 %85  ;;  %v95_v62 = vpop.xlane.xlu0 %94 }
 0x122   :  { %314 = vrsqrt.f32 %v113_v60  ;;  %v106_v63 = vmul.f32 0.03125, %v86_v61  ;;  %v109_v0 = vmul.f32 0.03125, %v95_v62 }
 0x124   :  { %v114_v1 = vadd.f32 1e-05, %v106_v63  ;;  %v117_v2 = vadd.f32 1e-05, %v109_v0 }
 0x125   :  { %v98_v3 = vpop.xlane.xlu1 %97  ;;  %v89_v4 = vpop.xlane.xlu0 %88 }
 0x126   :  { %316 = vrsqrt.f32 %v114_v1  ;;  %v110_v5 = vmul.f32 0.03125, %v98_v3  ;;  %v107_v6 = vmul.f32 0.03125, %v89_v4 }
 0x127   :  { %318 = vrsqrt.f32 %v117_v2 }
 0x128   :  { %v118_v7 = vadd.f32 1e-05, %v110_v5  ;;  %v115_v8 = vadd.f32 1e-05, %v107_v6 }
 0x129   :  { %v92_v9 = vpop.xlane.xlu1 %91  ;;  %v101_v10 = vpop.xlane.xlu0 %100 }
 0x12a   :  { %320 = vrsqrt.f32 %v118_v7  ;;  %v108_v11 = vmul.f32 0.03125, %v92_v9  ;;  %v111_v12 = vmul.f32 0.03125, %v101_v10 }
 0x12b   :  { %322 = vrsqrt.f32 %v115_v8 }
 0x12c   :  { %v116_v13 = vadd.f32 1e-05, %v108_v11  ;;  %v119_v14 = vadd.f32 1e-05, %v111_v12 }
 0x12d   :  { %v104_v15 = vpop.xlane.xlu1 %103 }
 0x12e   :  { %324 = vrsqrt.f32 %v116_v13  ;;  %v112_v16 = vmul.f32 0.03125, %v104_v15 }
 0x12f   :  { %v315_v17 = vpop.eup %314  ;;  %326 = vrsqrt.f32 %v119_v14 }
 0x130   :  { %v120_v18 = vadd.f32 1e-05, %v112_v16  ;;  %v129_v19 = vmul.f32 %v315_v17, %v392_v20 }
 0x132   :  { %328 = vrsqrt.f32 %v120_v18  ;;  %v143_v26 = vmul.f32 %v281_v22, %v129_v19 }
 0x133   :  { %v317_v23 = vpop.eup %316 }
 0x134   :  { %v319_v24 = vpop.eup %318  ;;  %v130_v25 = vmul.f32 %v317_v23, %v400_v28  ;;  %v157_v20 = vadd.f32 %v282_v27, %v143_v26 }
 0x135   :  { %v133_v30 = vmul.f32 %v319_v24, %v394_v21 }
 0x136   :  { %v144_v31 = vmul.f32 %v281_v22, %v130_v25 }
 0x137   :  { %v321_v32 = vpop.eup %320  ;;  %v147_v36 = vmul.f32 %v281_v22, %v133_v30 }
 0x138   :  { %v323_v33 = vpop.eup %322  ;;  %v158_v34 = vadd.f32 %v282_v27, %v144_v31  ;;  %v134_v35 = vmul.f32 %v321_v32, %v402_v29 }
 0x139   :  { %v131_v37 = vmul.f32 %v323_v33, %v410_v38  ;;  %v161_v43 = vadd.f32 %v282_v27, %v147_v36 }
 0x13a   :  { %v165_v40 = vpack.c.bf16 %v158_v34, %v157_v20  ;;  %v148_v41 = vmul.f32 %v281_v22, %v134_v35 }
 0x13b   :  { %v325_v28 = vpop.eup %324  ;;  %v145_v45 = vmul.f32 %v281_v22, %v131_v37 }
 0x13c   :  { %v327_v42 = vpop.eup %326  ;;  %300 = vmatprep.mubr.msk.bf16.mxu0 %vm31_vm0, %v165_v40  ;;  %v162_v44 = vadd.f32 %v282_v27, %v148_v41  ;;  %v132_v21 = vmul.f32 %v325_v28, %v412_v39 }
 0x13d   :  { %v135_v46 = vmul.f32 %v327_v42, %v420_v48  ;;  %v159_v29 = vadd.f32 %v282_v27, %v145_v45  ;;  %v283_v48 = vld [vmem:[%s495_s4] ss:$0 sm:$0xff] }
 0x13e   :  { %v167_v47 = vpack.c.bf16 %v162_v44, %v161_v43  ;;  %v146_v50 = vmul.f32 %v281_v22, %v132_v21 }
 0x13f   :  { %v329_v51 = vpop.eup %328  ;;  %v149_v53 = vmul.f32 %v281_v22, %v135_v46 }
 0x140   :  { %304 = vmatprep.mubr.msk.bf16.mxu1 %vm31_vm0, %v167_v47  ;;  %v160_v38 = vadd.f32 %v282_v27, %v146_v50  ;;  %v136_v52 = vmul.f32 %v329_v51, %v422_v49 }
 0x141   :  { %v163_v56 = vadd.f32 %v282_v27, %v149_v53 }
 0x142   :  { %v166_v54 = vpack.c.bf16 %v160_v38, %v159_v29  ;;  %v150_v55 = vmul.f32 %v281_v22, %v136_v52 }
 0x144   :  { %301 = vmatmul.mubr.msk.bf16.vlgmr.msra.gmra.mxu0 %vm31_vm0, %v166_v54  ;;  %v164_v57 = vadd.f32 %v282_v27, %v150_v55 }
 0x146   :  { %v168_v39 = vpack.c.bf16 %v164_v57, %v163_v56 }
 0x148   :  { %305 = vmatmul.mubr.msk.bf16.vlgmr.msra.gmra.mxu1 %vm31_vm0, %v168_v39 }
 0x204   :  { %v302_v58 = vpop.f32.mrf.mxu0 }
 0x205   :  { %v247_v59 = vadd.f32 %v302_v58, %v283_v48 }
 0x206   :  { %v238_v60 = vpop.f32.mrf.mxu0 }
 0x207   :  { %271 = vst.msk [vmem:[%s496_s5 + $0x10] sm:$0xff] %vm31_vm0, %v247_v59  ;;  %v239_v49 = vadd.f32 %v283_v48, %v238_v60 }
 0x208   :  { %v303_v61 = vpop.f32.mrf.mxu0  ;;  %v306_v62 = vpop.f32.mrf.mxu1 }
 0x209   :  { %269 = vst.msk [vmem:[%s496_s5] sm:$0xff] %vm31_vm0, %v239_v49  ;;  %v250_v63 = vadd.f32 %v303_v61, %v283_v48  ;;  %v263_v0 = vadd.f32 %v306_v62, %v283_v48 }
 0x20a   :  { %v241_v1 = vpop.f32.mrf.mxu0  ;;  %v254_v2 = vpop.f32.mrf.mxu1 }
 0x20b   :  { %272 = vst.msk [vmem:[%s496_s5 + $0x18] sm:$0xff] %vm31_vm0, %v250_v63  ;;  %275 = vst.msk [vmem:[%s496_s5 + $0x30] sm:$0xff] %vm31_vm0, %v263_v0  ;;  %v242_v3 = vadd.f32 %v283_v48, %v241_v1  ;;  %v255_v4 = vadd.f32 %v283_v48, %v254_v2 }
 0x20c   :  { %v307_v5 = vpop.f32.mrf.mxu1 }
 0x20d   :  { %270 = vst.msk [vmem:[%s496_s5 + $0x8] sm:$0xff] %vm31_vm0, %v242_v3  ;;  %273 = vst.msk [vmem:[%s496_s5 + $0x20] sm:$0xff] %vm31_vm0, %v255_v4  ;;  %v266_v6 = vadd.f32 %v307_v5, %v283_v48 }
 0x20e   :  { %v257_v7 = vpop.f32.mrf.mxu1 }
 0x20f   :  { %276 = vst.msk [vmem:[%s496_s5 + $0x38] sm:$0xff] %vm31_vm0, %v266_v6  ;;  %v258_v8 = vadd.f32 %v283_v48, %v257_v7 }
 0x211   :  { %274 = vst.msk [vmem:[%s496_s5 + $0x28] sm:$0xff] %vm31_vm0, %v258_v8 }

// kernel: _lambda_.29
= control target key start
LH: loop header
LB: loop body
LE: loop exit
PB: predicated region body
PF: predicated region fallthrough
CT: control target
= control target key end

     0   :  { %vm31_vm0 = vcmask 261120   ;;  %vm301_vm1 = vcmask 781312   ;;  %s540_s0 = inlined_call_operand.vmem [shape: f32[64,32], index: 0, kind: input, shape index: {}]   ;;  %s541_s3 = inlined_call_operand.vmem [shape: bf16[32,96], index: 3, kind: input, shape index: {}]   ;;  %s542_s1 = inlined_call_operand.vmem [shape: f32[1,32], index: 1, kind: input, shape index: {}]   ;;  %s543_s2 = inlined_call_operand.vmem [shape: f32[1,32], index: 2, kind: input, shape index: {}]   ;;  %s544_s4 = inlined_call_operand.vmem [shape: f32[1,96], index: 4, kind: input, shape index: {}]   ;;  %s545_s5 = inlined_call_operand.vmem [shape: bf16[64,96], index: 5, kind: output, shape index: {}]  }
   0x1   :  { %v21_v0 = vld [vmem:[%s540_s0] sm:$0xff]  ;;  %v22_v2 = vld [vmem:[%s540_s0 + $0x8] sm:$0xff]  ;;  %v23_v8 = vld [vmem:[%s540_s0 + $0x10] sm:$0xff] }
   0x2   :  { %v25_v1 = vld [vmem:[%s540_s0 + $0x20] sm:$0xff]  ;;  %v32_v3 = vsel %vm31_vm0, %v21_v0, 0.0  ;;  %v26_v5 = vld [vmem:[%s540_s0 + $0x28] sm:$0xff]  ;;  %v35_v6 = vsel %vm31_vm0, %v22_v2, 0.0  ;;  %v24_v9 = vld [vmem:[%s540_s0 + $0x18] sm:$0xff]  ;;  %v38_v10 = vsel %vm31_vm0, %v23_v8, 0.0 }
   0x3   :  { %v44_v4 = vsel %vm31_vm0, %v25_v1, 0.0  ;;  %33 = vadd.xlane.f32.xlu0 %v32_v3  ;;  %v47_v7 = vsel %vm31_vm0, %v26_v5, 0.0  ;;  %v41_v11 = vsel %vm31_vm0, %v24_v9, 0.0  ;;  %v27_v12 = vld [vmem:[%s540_s0 + $0x30] sm:$0xff]  ;;  %v28_v13 = vld [vmem:[%s540_s0 + $0x38] sm:$0xff]  ;;  %v361_v56 = vld [vmem:[%s541_s3 + $0x8] sm:$0xff]  }
   0x4   :  { %45 = vadd.xlane.f32.xlu1 %v44_v4  ;;  %v50_v14 = vsel %vm31_vm0, %v27_v12, 0.0  ;;  %v53_v15 = vsel %vm31_vm0, %v28_v13, 0.0  ;;  %345 = vmatprep.subr.bf16.mxu0 %v361_v56  ;;  %v362_v57 = vld [vmem:[%s541_s3] sm:$0xff]  }
   0x5   :  { %357 = vmatprep.subr.bf16.mxu1 %v361_v56  ;;  %346 = vmatpush3.bf16.msra.mxu0 %v361_v56 }
   0x6   :  { %359 = vmatpush3.bf16.msra.mxu1 %v361_v56  ;;  %347 = vmatprep.subr.bf16.mxu0 %v362_v57 }
   0x7   :  { %36 = vadd.xlane.f32.xlu0 %v35_v6  ;;  %358 = vmatprep.subr.bf16.mxu1 %v362_v57 }
   0x8   :  { %48 = vadd.xlane.f32.xlu1 %v47_v7 }
   0x9   :  { %348 = vmatpush3.bf16.msra.mxu0 %v362_v57 }
   0xa   :  { %360 = vmatpush3.bf16.msra.mxu1 %v362_v57 }
   0xb   :  { %39 = vadd.xlane.f32.xlu0 %v38_v10 }
   0xc   :  { %42 = vadd.xlane.f32.xlu1 %v41_v11 }
   0xf   :  { %51 = vadd.xlane.f32.xlu0 %v50_v14 }
  0x10   :  { %54 = vadd.xlane.f32.xlu1 %v53_v15 }
  0x8c   :  { %v34_v16 = vpop.xlane.xlu0 %33 }
  0x8d   :  { %v46_v17 = vpop.xlane.xlu1 %45  ;;  %v57_v18 = vmul.f32 0.03125, %v34_v16 }
  0x8e   :  { %v61_v19 = vmul.f32 0.03125, %v46_v17 }
  0x8f   :  { %v441_v20 = vsub.f32 %v21_v0, %v57_v18 }
  0x90   :  { %v443_v21 = vsub.f32 %v25_v1, %v61_v19  ;;  %v37_v22 = vpop.xlane.xlu0 %36 }
  0x91   :  { %v49_v23 = vpop.xlane.xlu1 %48  ;;  %v58_v24 = vmul.f32 0.03125, %v37_v22  ;;  %v73_v26 = vmul.f32 %v441_v20, %v441_v20  ;;  %v314_v22 = vld [vmem:[%s542_s1] ss:$0 sm:$0xff] }
  0x92   :  { %v62_v25 = vmul.f32 0.03125, %v49_v23  ;;  %v77_v27 = vmul.f32 %v443_v21, %v443_v21 }
  0x93   :  { %v449_v28 = vsub.f32 %v22_v2, %v58_v24  ;;  %v81_v30 = vsel %vm31_vm0, %v73_v26, 0.0 }
  0x94   :  { %v451_v29 = vsub.f32 %v26_v5, %v62_v25  ;;  %82 = vadd.xlane.f32.xlu0 %v81_v30  ;;  %v40_v31 = vpop.xlane.xlu0 %39  ;;  %v93_v33 = vsel %vm31_vm0, %v77_v27, 0.0  ;;  %v315_v27 = vld [vmem:[%s543_s2] ss:$0 sm:$0xff] }
  0x95   :  { %v43_v32 = vpop.xlane.xlu1 %42  ;;  %v59_v34 = vmul.f32 0.03125, %v40_v31  ;;  %v74_v36 = vmul.f32 %v449_v28, %v449_v28 }
  0x96   :  { %v60_v35 = vmul.f32 0.03125, %v43_v32  ;;  %v78_v37 = vmul.f32 %v451_v29, %v451_v29 }
  0x97   :  { %v459_v38 = vsub.f32 %v23_v8, %v59_v34  ;;  %v84_v40 = vsel %vm31_vm0, %v74_v36, 0.0 }
  0x98   :  { %v461_v39 = vsub.f32 %v24_v9, %v60_v35  ;;  %94 = vadd.xlane.f32.xlu0 %v93_v33  ;;  %85 = vadd.xlane.f32.xlu1 %v84_v40  ;;  %v52_v41 = vpop.xlane.xlu0 %51  ;;  %v96_v43 = vsel %vm31_vm0, %v78_v37, 0.0 }
  0x99   :  { %v55_v42 = vpop.xlane.xlu1 %54  ;;  %v63_v44 = vmul.f32 0.03125, %v52_v41  ;;  %v75_v46 = vmul.f32 %v459_v38, %v459_v38 }
  0x9a   :  { %v64_v45 = vmul.f32 0.03125, %v55_v42  ;;  %v76_v47 = vmul.f32 %v461_v39, %v461_v39 }
  0x9b   :  { %v469_v48 = vsub.f32 %v27_v12, %v63_v44  ;;  %v87_v50 = vsel %vm31_vm0, %v75_v46, 0.0 }
  0x9c   :  { %v471_v49 = vsub.f32 %v28_v13, %v64_v45  ;;  %97 = vadd.xlane.f32.xlu1 %v96_v43  ;;  %88 = vadd.xlane.f32.xlu0 %v87_v50  ;;  %v90_v51 = vsel %vm31_vm0, %v76_v47, 0.0 }
  0x9d   :  { %v79_v52 = vmul.f32 %v469_v48, %v469_v48 }
  0x9e   :  { %v80_v53 = vmul.f32 %v471_v49, %v471_v49 }
  0x9f   :  { %v99_v54 = vsel %vm31_vm0, %v79_v52, 0.0 }
  0xa0   :  { %91 = vadd.xlane.f32.xlu1 %v90_v51  ;;  %100 = vadd.xlane.f32.xlu0 %v99_v54  ;;  %v102_v55 = vsel %vm31_vm0, %v80_v53, 0.0 }
  0xa4   :  { %103 = vadd.xlane.f32.xlu1 %v102_v55 }
 0x11d   :  { %v83_v58 = vpop.xlane.xlu0 %82 }
 0x11e   :  { %v105_v59 = vmul.f32 0.03125, %v83_v58 }
 0x120   :  { %v113_v60 = vadd.f32 1e-05, %v105_v59 }
 0x121   :  { %v86_v61 = vpop.xlane.xlu1 %85  ;;  %v95_v62 = vpop.xlane.xlu0 %94 }
 0x122   :  { %363 = vrsqrt.f32 %v113_v60  ;;  %v106_v63 = vmul.f32 0.03125, %v86_v61  ;;  %v109_v0 = vmul.f32 0.03125, %v95_v62 }
 0x124   :  { %v114_v1 = vadd.f32 1e-05, %v106_v63  ;;  %v117_v2 = vadd.f32 1e-05, %v109_v0 }
 0x125   :  { %v98_v3 = vpop.xlane.xlu1 %97  ;;  %v89_v4 = vpop.xlane.xlu0 %88 }
 0x126   :  { %365 = vrsqrt.f32 %v114_v1  ;;  %v110_v5 = vmul.f32 0.03125, %v98_v3  ;;  %v107_v6 = vmul.f32 0.03125, %v89_v4 }
 0x127   :  { %367 = vrsqrt.f32 %v117_v2 }
 0x128   :  { %v118_v7 = vadd.f32 1e-05, %v110_v5  ;;  %v115_v8 = vadd.f32 1e-05, %v107_v6 }
 0x129   :  { %v92_v9 = vpop.xlane.xlu1 %91  ;;  %v101_v10 = vpop.xlane.xlu0 %100 }
 0x12a   :  { %369 = vrsqrt.f32 %v118_v7  ;;  %v108_v11 = vmul.f32 0.03125, %v92_v9  ;;  %v111_v12 = vmul.f32 0.03125, %v101_v10 }
 0x12b   :  { %371 = vrsqrt.f32 %v115_v8 }
 0x12c   :  { %v116_v13 = vadd.f32 1e-05, %v108_v11  ;;  %v119_v14 = vadd.f32 1e-05, %v111_v12 }
 0x12d   :  { %v104_v15 = vpop.xlane.xlu1 %103 }
 0x12e   :  { %373 = vrsqrt.f32 %v116_v13  ;;  %v112_v16 = vmul.f32 0.03125, %v104_v15 }
 0x12f   :  { %v364_v17 = vpop.eup %363  ;;  %375 = vrsqrt.f32 %v119_v14 }
 0x130   :  { %v120_v18 = vadd.f32 1e-05, %v112_v16  ;;  %v129_v19 = vmul.f32 %v364_v17, %v441_v20 }
 0x132   :  { %377 = vrsqrt.f32 %v120_v18  ;;  %v143_v26 = vmul.f32 %v314_v22, %v129_v19 }
 0x133   :  { %v366_v23 = vpop.eup %365 }
 0x134   :  { %v368_v24 = vpop.eup %367  ;;  %v130_v25 = vmul.f32 %v366_v23, %v449_v28  ;;  %v157_v20 = vadd.f32 %v315_v27, %v143_v26 }
 0x135   :  { %v133_v30 = vmul.f32 %v368_v24, %v443_v21 }
 0x136   :  { %v144_v31 = vmul.f32 %v314_v22, %v130_v25 }
 0x137   :  { %v370_v32 = vpop.eup %369  ;;  %v147_v36 = vmul.f32 %v314_v22, %v133_v30 }
 0x138   :  { %v372_v33 = vpop.eup %371  ;;  %v158_v34 = vadd.f32 %v315_v27, %v144_v31  ;;  %v134_v35 = vmul.f32 %v370_v32, %v451_v29 }
 0x139   :  { %v131_v37 = vmul.f32 %v372_v33, %v459_v38  ;;  %v161_v43 = vadd.f32 %v315_v27, %v147_v36 }
 0x13a   :  { %v165_v40 = vpack.c.bf16 %v158_v34, %v157_v20  ;;  %v148_v41 = vmul.f32 %v314_v22, %v134_v35 }
 0x13b   :  { %v374_v28 = vpop.eup %373  ;;  %v145_v45 = vmul.f32 %v314_v22, %v131_v37 }
 0x13c   :  { %v376_v42 = vpop.eup %375  ;;  %349 = vmatprep.mubr.msk.bf16.mxu0 %vm31_vm0, %v165_v40  ;;  %v162_v44 = vadd.f32 %v315_v27, %v148_v41  ;;  %v132_v21 = vmul.f32 %v374_v28, %v461_v39 }
 0x13d   :  { %v135_v46 = vmul.f32 %v376_v42, %v469_v48  ;;  %v159_v29 = vadd.f32 %v315_v27, %v145_v45  ;;  %v316_v48 = vld [vmem:[%s544_s4] ss:$0 sm:$0xff] }
 0x13e   :  { %v167_v47 = vpack.c.bf16 %v162_v44, %v161_v43  ;;  %v146_v50 = vmul.f32 %v314_v22, %v132_v21 }
 0x13f   :  { %v378_v51 = vpop.eup %377  ;;  %v149_v53 = vmul.f32 %v314_v22, %v135_v46 }
 0x140   :  { %353 = vmatprep.mubr.msk.bf16.mxu1 %vm31_vm0, %v167_v47  ;;  %v160_v38 = vadd.f32 %v315_v27, %v146_v50  ;;  %v136_v52 = vmul.f32 %v378_v51, %v471_v49 }
 0x141   :  { %v163_v56 = vadd.f32 %v315_v27, %v149_v53 }
 0x142   :  { %v166_v54 = vpack.c.bf16 %v160_v38, %v159_v29  ;;  %v150_v55 = vmul.f32 %v314_v22, %v136_v52 }
 0x144   :  { %350 = vmatmul.mubr.msk.bf16.vlgmr.msra.gmra.mxu0 %vm31_vm0, %v166_v54  ;;  %v164_v57 = vadd.f32 %v315_v27, %v150_v55 }
 0x146   :  { %v168_v39 = vpack.c.bf16 %v164_v57, %v163_v56 }
 0x148   :  { %354 = vmatmul.mubr.msk.bf16.vlgmr.msra.gmra.mxu1 %vm31_vm0, %v168_v39 }
 0x204   :  { %v351_v58 = vpop.f32.mrf.mxu0 }
 0x205   :  { %v247_v59 = vadd.f32 %v351_v58, %v316_v48 }
 0x206   :  { %v238_v60 = vpop.f32.mrf.mxu0 }
 0x207   :  { %v333_v61 = vpack.c.bf16 %v247_v59, %v247_v59  ;;  %v239_v49 = vadd.f32 %v316_v48, %v238_v60 }
 0x208   :  { %v352_v62 = vpop.f32.mrf.mxu0  ;;  %v355_v63 = vpop.f32.mrf.mxu1 }
 0x209   :  { %304 = vst.msk [vmem:[%s545_s5 + $0x8] sm:$0xf] %vm301_vm1, %v333_v61  ;;  %v331_v0 = vpack.c.bf16 %v239_v49, %v239_v49  ;;  %v250_v1 = vadd.f32 %v352_v62, %v316_v48  ;;  %v263_v2 = vadd.f32 %v355_v63, %v316_v48 }
 0x20a   :  { %v241_v3 = vpop.f32.mrf.mxu0  ;;  %v254_v4 = vpop.f32.mrf.mxu1 }
 0x20b   :  { %302 = vst.msk [vmem:[%s545_s5] sm:$0xf] %vm301_vm1, %v331_v0  ;;  %v334_v5 = vpack.c.bf16 %v250_v1, %v250_v1  ;;  %v337_v6 = vpack.c.bf16 %v263_v2, %v263_v2  ;;  %v242_v7 = vadd.f32 %v316_v48, %v241_v3  ;;  %v255_v8 = vadd.f32 %v316_v48, %v254_v4 }
 0x20c   :  { %v356_v9 = vpop.f32.mrf.mxu1 }
 0x20d   :  { %305 = vst.msk [vmem:[%s545_s5 + $0xc] sm:$0xf] %vm301_vm1, %v334_v5  ;;  %308 = vst.msk [vmem:[%s545_s5 + $0x18] sm:$0xf] %vm301_vm1, %v337_v6  ;;  %v332_v10 = vpack.c.bf16 %v242_v7, %v242_v7  ;;  %v335_v11 = vpack.c.bf16 %v255_v8, %v255_v8  ;;  %v266_v12 = vadd.f32 %v356_v9, %v316_v48 }
 0x20e   :  { %v257_v13 = vpop.f32.mrf.mxu1 }
 0x20f   :  { %303 = vst.msk [vmem:[%s545_s5 + $0x4] sm:$0xf] %vm301_vm1, %v332_v10  ;;  %306 = vst.msk [vmem:[%s545_s5 + $0x10] sm:$0xf] %vm301_vm1, %v335_v11  ;;  %v338_v14 = vpack.c.bf16 %v266_v12, %v266_v12  ;;  %v258_v15 = vadd.f32 %v316_v48, %v257_v13 }
 0x211   :  { %309 = vst.msk [vmem:[%s545_s5 + $0x1c] sm:$0xf] %vm301_vm1, %v338_v14  ;;  %v336_v16 = vpack.c.bf16 %v258_v15, %v258_v15 }
 0x213   :  { %307 = vst.msk [vmem:[%s545_s5 + $0x14] sm:$0xf] %vm301_vm1, %v336_v16 }

// kernel: _lambda_.31
= control target key start
LH: loop header
LB: loop body
LE: loop exit
PB: predicated region body
PF: predicated region fallthrough
CT: control target
= control target key end

     0   :  { %vm54_vm0 = vcmask 261120   ;;  %s316_s1 = inlined_call_operand.vmem [shape: bf16[32,32], index: 1, kind: input, shape index: {}]   ;;  %s317_s0 = inlined_call_operand.vmem [shape: f32[64,32], index: 0, kind: input, shape index: {}]   ;;  %s318_s3 = inlined_call_operand.vmem [shape: f32[64,32], index: 3, kind: input, shape index: {}]   ;;  %s319_s2 = inlined_call_operand.vmem [shape: f32[1,32], index: 2, kind: input, shape index: {}]   ;;  %s320_s4 = inlined_call_operand.vmem [shape: f32[64,32], index: 4, kind: output, shape index: {}]  }
   0x1   :  { %v196_v0 = vld [vmem:[%s316_s1 + $0x8] sm:$0xff]   ;;  %v197_v1 = vld [vmem:[%s316_s1] sm:$0xff]   ;;  %v28_v7 = vld [vmem:[%s317_s0 + $0x10] sm:$0xff] }
   0x2   :  { %180 = vmatprep.subr.bf16.mxu0 %v196_v0  ;;  %192 = vmatprep.subr.bf16.mxu1 %v196_v0  ;;  %v26_v2 = vld [vmem:[%s317_s0] sm:$0xff]  ;;  %v27_v3 = vld [vmem:[%s317_s0 + $0x8] sm:$0xff]  ;;  %v29_v8 = vld [vmem:[%s317_s0 + $0x18] sm:$0xff] }
   0x3   :  { %v30_v4 = vld [vmem:[%s317_s0 + $0x20] sm:$0xff]  ;;  %181 = vmatpush3.bf16.msra.mxu0 %v196_v0  ;;  %194 = vmatpush3.bf16.msra.mxu1 %v196_v0  ;;  %v34_v5 = vpack.c.bf16 %v27_v3, %v26_v2  ;;  %v31_v6 = vld [vmem:[%s317_s0 + $0x28] sm:$0xff]  ;;  %v32_v10 = vld [vmem:[%s317_s0 + $0x30] sm:$0xff]  ;;  %v35_v12 = vpack.c.bf16 %v29_v8, %v28_v7 }
   0x4   :  { %182 = vmatprep.subr.bf16.mxu0 %v197_v1  ;;  %193 = vmatprep.subr.bf16.mxu1 %v197_v1  ;;  %v36_v9 = vpack.c.bf16 %v31_v6, %v30_v4  ;;  %v33_v11 = vld [vmem:[%s317_s0 + $0x38] sm:$0xff]  ;;  %v20_v14 = vld [vmem:[%s318_s3 + $0x10] sm:$0xff]  ;;  %v173_v17 = vld [vmem:[%s319_s2] ss:$0 sm:$0xff] }
   0x5   :  { %184 = vmatprep.mubr.msk.bf16.mxu0 %vm54_vm0, %v34_v5  ;;  %v37_v13 = vpack.c.bf16 %v33_v11, %v32_v10  ;;  %v24_v15 = vld [vmem:[%s318_s3 + $0x30] sm:$0xff]  ;;  %v18_v19 = vld [vmem:[%s318_s3] sm:$0xff]  ;;  %v21_v25 = vld [vmem:[%s318_s3 + $0x18] sm:$0xff] }
   0x6   :  { %188 = vmatprep.mubr.msk.bf16.mxu1 %vm54_vm0, %v36_v9  ;;  %v22_v20 = vld [vmem:[%s318_s3 + $0x20] sm:$0xff]  ;;  %v25_v26 = vld [vmem:[%s318_s3 + $0x38] sm:$0xff]  ;;  %v19_v33 = vld [vmem:[%s318_s3 + $0x8] sm:$0xff] }
   0x7   :  { %183 = vmatpush3.bf16.msra.mxu0 %v197_v1  ;;  %195 = vmatpush3.bf16.msra.mxu1 %v197_v1  ;;  %v23_v34 = vld [vmem:[%s318_s3 + $0x28] sm:$0xff] }
   0xa   :  { %185 = vmatmul.mubr.msk.bf16.vlgmr.msra.gmra.mxu0 %vm54_vm0, %v35_v12  ;;  %189 = vmatmul.mubr.msk.bf16.vlgmr.msra.gmra.mxu1 %vm54_vm0, %v37_v13 }
  0xca   :  { %v186_v16 = vpop.f32.mrf.mxu0  ;;  %v190_v18 = vpop.f32.mrf.mxu1 }
  0xcb   :  { %v134_v21 = vadd.f32 %v186_v16, %v20_v14  ;;  %v138_v22 = vadd.f32 %v190_v18, %v24_v15 }
  0xcc   :  { %v101_v23 = vpop.f32.mrf.mxu0  ;;  %v117_v24 = vpop.f32.mrf.mxu1 }
  0xcd   :  { %v149_v27 = vadd.f32 %v173_v17, %v134_v21  ;;  %v153_v28 = vadd.f32 %v173_v17, %v138_v22  ;;  %v132_v29 = vadd.f32 %v101_v23, %v18_v19  ;;  %v136_v30 = vadd.f32 %v117_v24, %v22_v20 }
  0xce   :  { %v187_v31 = vpop.f32.mrf.mxu0  ;;  %v191_v32 = vpop.f32.mrf.mxu1 }
  0xcf   :  { %157 = vst.msk [vmem:[%s320_s4 + $0x10] sm:$0xff] %vm54_vm0, %v149_v27  ;;  %161 = vst.msk [vmem:[%s320_s4 + $0x30] sm:$0xff] %vm54_vm0, %v153_v28  ;;  %v147_v35 = vadd.f32 %v173_v17, %v132_v29  ;;  %v151_v36 = vadd.f32 %v173_v17, %v136_v30  ;;  %v135_v37 = vadd.f32 %v187_v31, %v21_v25 }
  0xd0   :  { %v139_v38 = vadd.f32 %v191_v32, %v25_v26  ;;  %v104_v39 = vpop.f32.mrf.mxu0  ;;  %v120_v40 = vpop.f32.mrf.mxu1 }
  0xd1   :  { %155 = vst.msk [vmem:[%s320_s4] sm:$0xff] %vm54_vm0, %v147_v35  ;;  %159 = vst.msk [vmem:[%s320_s4 + $0x20] sm:$0xff] %vm54_vm0, %v151_v36  ;;  %v150_v41 = vadd.f32 %v173_v17, %v135_v37  ;;  %v133_v43 = vadd.f32 %v104_v39, %v19_v33  ;;  %v137_v44 = vadd.f32 %v120_v40, %v23_v34 }
  0xd2   :  { %v154_v42 = vadd.f32 %v173_v17, %v139_v38 }
  0xd3   :  { %158 = vst.msk [vmem:[%s320_s4 + $0x18] sm:$0xff] %vm54_vm0, %v150_v41  ;;  %v148_v45 = vadd.f32 %v173_v17, %v133_v43  ;;  %v152_v46 = vadd.f32 %v173_v17, %v137_v44 }
  0xd4   :  { %162 = vst.msk [vmem:[%s320_s4 + $0x38] sm:$0xff] %vm54_vm0, %v154_v42 }
  0xd5   :  { %156 = vst.msk [vmem:[%s320_s4 + $0x8] sm:$0xff] %vm54_vm0, %v148_v45  ;;  %160 = vst.msk [vmem:[%s320_s4 + $0x28] sm:$0xff] %vm54_vm0, %v152_v46 }

// kernel: _lambda_.32
= control target key start
LH: loop header
LB: loop body
LE: loop exit
PB: predicated region body
PF: predicated region fallthrough
CT: control target
= control target key end

     0   :  { %vm37_vm0 = vcmask 261120   ;;  %vm534_vm5 = vcmask 523264   ;;  %s1118_s0 = inlined_call_operand.vmem [shape: f32[64,32], index: 0, kind: input, shape index: {}]   ;;  %s1119_s3 = inlined_call_operand.vmem [shape: bf16[32,64], index: 3, kind: input, shape index: {}]   ;;  %s1120_s1 = inlined_call_operand.vmem [shape: f32[1,32], index: 1, kind: input, shape index: {}]   ;;  %s1121_s2 = inlined_call_operand.vmem [shape: f32[1,32], index: 2, kind: input, shape index: {}]   ;;  %s1122_s5 = inlined_call_operand.vmem [shape: bf16[64,32], index: 5, kind: input, shape index: {}]   ;;  %s1123_s4 = inlined_call_operand.vmem [shape: f32[1,64], index: 4, kind: input, shape index: {}]   ;;  %s1124_s6 = inlined_call_operand.vmem [shape: f32[1,32], index: 6, kind: input, shape index: {}]   ;;  %s1125_s7 = inlined_call_operand.vmem [shape: f32[64,32], index: 7, kind: output, shape index: {}]  }
   0x1   :  { %v791_v0 = vld [vmem:[%s1118_s0] sm:$0xff]  ;;  %v796_v1 = vld [vmem:[%s1118_s0 + $0x10] sm:$0xff]  ;;  %v801_v2 = vld [vmem:[%s1118_s0 + $0x8] sm:$0xff] }
   0x2   :  { %v38_v3 = vsel %vm37_vm0, %v791_v0, 0.0  ;;  %v44_v4 = vsel %vm37_vm0, %v796_v1, 0.0  ;;  %v810_v5 = vld [vmem:[%s1118_s0 + $0x18] sm:$0xff]  ;;  %v41_v6 = vsel %vm37_vm0, %v801_v2, 0.0  ;;  %v819_v8 = vld [vmem:[%s1118_s0 + $0x20] sm:$0xff]  ;;  %v824_v9 = vld [vmem:[%s1118_s0 + $0x28] sm:$0xff] }
   0x3   :  { %39 = vadd.xlane.f32.xlu0 %v38_v3  ;;  %45 = vadd.xlane.f32.xlu1 %v44_v4  ;;  %v47_v7 = vsel %vm37_vm0, %v810_v5, 0.0  ;;  %v50_v10 = vsel %vm37_vm0, %v819_v8, 0.0  ;;  %v53_v11 = vsel %vm37_vm0, %v824_v9, 0.0  ;;  %v833_v12 = vld [vmem:[%s1118_s0 + $0x30] sm:$0xff]  ;;  %v838_v13 = vld [vmem:[%s1118_s0 + $0x38] sm:$0xff]  ;;  %v693_v56 = vld [vmem:[%s1119_s3 + $0x8] sm:$0xff]  }
   0x4   :  { %v56_v14 = vsel %vm37_vm0, %v833_v12, 0.0  ;;  %v59_v15 = vsel %vm37_vm0, %v838_v13, 0.0  ;;  %v694_v57 = vld [vmem:[%s1119_s3] sm:$0xff]   ;;  %664 = vmatprep.subr.bf16.mxu0 %v693_v56 }
   0x5   :  { %665 = vmatpush3.bf16.msra.mxu0 %v693_v56 }
   0x6   :  { %666 = vmatprep.subr.bf16.mxu0 %v694_v57 }
   0x7   :  { %42 = vadd.xlane.f32.xlu0 %v41_v6  ;;  %48 = vadd.xlane.f32.xlu1 %v47_v7 }
   0x9   :  { %667 = vmatpush3.bf16.msra.mxu0 %v694_v57 }
   0xb   :  { %51 = vadd.xlane.f32.xlu0 %v50_v10  ;;  %54 = vadd.xlane.f32.xlu1 %v53_v11 }
   0xf   :  { %57 = vadd.xlane.f32.xlu0 %v56_v14  ;;  %60 = vadd.xlane.f32.xlu1 %v59_v15 }
  0x8c   :  { %v40_v16 = vpop.xlane.xlu0 %39  ;;  %v46_v17 = vpop.xlane.xlu1 %45 }
  0x8d   :  { %v63_v18 = vmul.f32 0.03125, %v40_v16  ;;  %v65_v19 = vmul.f32 0.03125, %v46_v17 }
  0x8f   :  { %v845_v20 = vsub.f32 %v791_v0, %v63_v18  ;;  %v848_v21 = vsub.f32 %v796_v1, %v65_v19 }
  0x90   :  { %v43_v22 = vpop.xlane.xlu0 %42  ;;  %v49_v23 = vpop.xlane.xlu1 %48 }
  0x91   :  { %v64_v24 = vmul.f32 0.03125, %v43_v22  ;;  %v66_v25 = vmul.f32 0.03125, %v49_v23  ;;  %v79_v26 = vmul.f32 %v845_v20, %v845_v20  ;;  %v81_v27 = vmul.f32 %v848_v21, %v848_v21 }
  0x93   :  { %v855_v28 = vsub.f32 %v801_v2, %v64_v24  ;;  %v858_v29 = vsub.f32 %v810_v5, %v66_v25  ;;  %v87_v30 = vsel %vm37_vm0, %v79_v26, 0.0  ;;  %v93_v33 = vsel %vm37_vm0, %v81_v27, 0.0 }
  0x94   :  { %88 = vadd.xlane.f32.xlu0 %v87_v30  ;;  %v52_v31 = vpop.xlane.xlu0 %51  ;;  %v55_v32 = vpop.xlane.xlu1 %54 }
  0x95   :  { %v67_v34 = vmul.f32 0.03125, %v52_v31  ;;  %v68_v35 = vmul.f32 0.03125, %v55_v32  ;;  %v80_v36 = vmul.f32 %v855_v28, %v855_v28  ;;  %v82_v37 = vmul.f32 %v858_v29, %v858_v29  ;;  %v632_v32 = vld [vmem:[%s1120_s1] ss:$0 sm:$0xff] }
  0x97   :  { %v867_v38 = vsub.f32 %v819_v8, %v67_v34  ;;  %v870_v39 = vsub.f32 %v824_v9, %v68_v35  ;;  %v90_v40 = vsel %vm37_vm0, %v80_v36, 0.0  ;;  %v96_v43 = vsel %vm37_vm0, %v82_v37, 0.0  ;;  %v633_v37 = vld [vmem:[%s1121_s2] ss:$0 sm:$0xff] }
  0x98   :  { %94 = vadd.xlane.f32.xlu0 %v93_v33  ;;  %91 = vadd.xlane.f32.xlu1 %v90_v40  ;;  %v58_v41 = vpop.xlane.xlu0 %57  ;;  %v61_v42 = vpop.xlane.xlu1 %60 }
  0x99   :  { %v69_v44 = vmul.f32 0.03125, %v58_v41  ;;  %v70_v45 = vmul.f32 0.03125, %v61_v42  ;;  %v83_v46 = vmul.f32 %v867_v38, %v867_v38  ;;  %v84_v47 = vmul.f32 %v870_v39, %v870_v39 }
  0x9b   :  { %v879_v48 = vsub.f32 %v833_v12, %v69_v44  ;;  %v882_v49 = vsub.f32 %v838_v13, %v70_v45  ;;  %v99_v50 = vsel %vm37_vm0, %v83_v46, 0.0  ;;  %v102_v51 = vsel %vm37_vm0, %v84_v47, 0.0 }
  0x9c   :  { %97 = vadd.xlane.f32.xlu1 %v96_v43  ;;  %100 = vadd.xlane.f32.xlu0 %v99_v50 }
  0x9d   :  { %v85_v52 = vmul.f32 %v879_v48, %v879_v48  ;;  %v86_v53 = vmul.f32 %v882_v49, %v882_v49 }
  0x9f   :  { %v105_v54 = vsel %vm37_vm0, %v85_v52, 0.0  ;;  %v108_v55 = vsel %vm37_vm0, %v86_v53, 0.0 }
  0xa0   :  { %103 = vadd.xlane.f32.xlu1 %v102_v51  ;;  %106 = vadd.xlane.f32.xlu0 %v105_v54 }
  0xa4   :  { %109 = vadd.xlane.f32.xlu1 %v108_v55 }
 0x11d   :  { %v89_v58 = vpop.xlane.xlu0 %88 }
 0x11e   :  { %v111_v59 = vmul.f32 0.03125, %v89_v58 }
 0x120   :  { %v119_v60 = vadd.f32 1e-05, %v111_v59 }
 0x121   :  { %v92_v61 = vpop.xlane.xlu1 %91  ;;  %v95_v62 = vpop.xlane.xlu0 %94 }
 0x122   :  { %699 = vrsqrt.f32 %v119_v60  ;;  %v112_v63 = vmul.f32 0.03125, %v92_v61  ;;  %v113_v3 = vmul.f32 0.03125, %v95_v62 }
 0x124   :  { %v120_v4 = vadd.f32 1e-05, %v112_v63  ;;  %v121_v6 = vadd.f32 1e-05, %v113_v3 }
 0x125   :  { %v98_v7 = vpop.xlane.xlu1 %97  ;;  %v101_v10 = vpop.xlane.xlu0 %100 }
 0x126   :  { %701 = vrsqrt.f32 %v120_v4  ;;  %v114_v11 = vmul.f32 0.03125, %v98_v7  ;;  %v115_v14 = vmul.f32 0.03125, %v101_v10  ;;  %v698_v7 = vld [vmem:[%s1122_s5] sm:$0xff]  }
 0x127   :  { %703 = vrsqrt.f32 %v121_v6  ;;  %v697_v6 = vld [vmem:[%s1122_s5 + $0x8] sm:$0xff]   ;;  %v634_v10 = vld [vmem:[%s1123_s4] ss:$0 sm:$0xff] }
 0x128   :  { %v122_v15 = vadd.f32 1e-05, %v114_v11  ;;  %v123_v16 = vadd.f32 1e-05, %v115_v14 }
 0x129   :  { %v104_v17 = vpop.xlane.xlu1 %103  ;;  %v107_v18 = vpop.xlane.xlu0 %106 }
 0x12a   :  { %705 = vrsqrt.f32 %v122_v15  ;;  %v116_v19 = vmul.f32 0.03125, %v104_v17  ;;  %v117_v22 = vmul.f32 0.03125, %v107_v18 }
 0x12b   :  { %707 = vrsqrt.f32 %v123_v16 }
 0x12c   :  { %v124_v23 = vadd.f32 1e-05, %v116_v19  ;;  %v125_v24 = vadd.f32 1e-05, %v117_v22 }
 0x12d   :  { %v110_v25 = vpop.xlane.xlu1 %109 }
 0x12e   :  { %709 = vrsqrt.f32 %v124_v23  ;;  %v118_v26 = vmul.f32 0.03125, %v110_v25 }
 0x12f   :  { %v700_v27 = vpop.eup %699  ;;  %711 = vrsqrt.f32 %v125_v24 }
 0x130   :  { %v126_v30 = vadd.f32 1e-05, %v118_v26  ;;  %v135_v31 = vmul.f32 %v700_v27, %v845_v20 }
 0x132   :  { %713 = vrsqrt.f32 %v126_v30  ;;  %v149_v36 = vmul.f32 %v632_v32, %v135_v31 }
 0x133   :  { %v702_v33 = vpop.eup %701 }
 0x134   :  { %v704_v34 = vpop.eup %703  ;;  %v136_v35 = vmul.f32 %v702_v33, %v855_v28  ;;  %v163_v20 = vadd.f32 %v633_v37, %v149_v36 }
 0x135   :  { %v137_v40 = vmul.f32 %v704_v34, %v848_v21 }
 0x136   :  { %v150_v41 = vmul.f32 %v632_v32, %v136_v35 }
 0x137   :  { %v706_v42 = vpop.eup %705  ;;  %v151_v46 = vmul.f32 %v632_v32, %v137_v40 }
 0x138   :  { %v708_v43 = vpop.eup %707  ;;  %v164_v44 = vadd.f32 %v633_v37, %v150_v41  ;;  %v138_v45 = vmul.f32 %v706_v42, %v858_v29 }
 0x139   :  { %v139_v47 = vmul.f32 %v708_v43, %v867_v38  ;;  %v165_v53 = vadd.f32 %v633_v37, %v151_v46 }
 0x13a   :  { %v171_v50 = vpack.c.bf16 %v164_v44, %v163_v20  ;;  %v152_v51 = vmul.f32 %v632_v32, %v138_v45 }
 0x13b   :  { %v710_v28 = vpop.eup %709  ;;  %v153_v55 = vmul.f32 %v632_v32, %v139_v47 }
 0x13c   :  { %v712_v52 = vpop.eup %711  ;;  %668 = vmatprep.mubr.msk.bf16.mxu0 %vm37_vm0, %v171_v50  ;;  %v166_v54 = vadd.f32 %v633_v37, %v152_v51  ;;  %v140_v21 = vmul.f32 %v710_v28, %v870_v39 }
 0x13d   :  { %v141_v56 = vmul.f32 %v712_v52, %v879_v48  ;;  %v167_v29 = vadd.f32 %v633_v37, %v153_v55  ;;  %v695_v48 = vld [vmem:[%s1122_s5 + $0x18] sm:$0xff]  }
 0x13e   :  { %v172_v57 = vpack.c.bf16 %v166_v54, %v165_v53  ;;  %v154_v58 = vmul.f32 %v632_v32, %v140_v21  ;;  %676 = vmatprep.subr.bf16.mxu1 %v695_v48 }
 0x13f   :  { %v714_v59 = vpop.eup %713  ;;  %v155_v61 = vmul.f32 %v632_v32, %v141_v56  ;;  %677 = vmatpush3.bf16.msra.mxu1 %v695_v48 }
 0x140   :  { %669 = vmatmul.mubr.msk.bf16.vlgmr.msra.gmra.mxu0 %vm37_vm0, %v172_v57  ;;  %v168_v38 = vadd.f32 %v633_v37, %v154_v58  ;;  %v142_v60 = vmul.f32 %v714_v59, %v882_v49  ;;  %v696_v49 = vld [vmem:[%s1122_s5 + $0x10] sm:$0xff]  }
 0x141   :  { %v169_v3 = vadd.f32 %v633_v37, %v155_v61  ;;  %678 = vmatprep.subr.bf16.mxu1 %v696_v49 }
 0x142   :  { %v173_v62 = vpack.c.bf16 %v168_v38, %v167_v29  ;;  %v156_v63 = vmul.f32 %v632_v32, %v142_v60 }
 0x143   :  { %679 = vmatpush3.bf16.msra.mxu1 %v696_v49 }
 0x144   :  { %672 = vmatprep.mubr.msk.bf16.mxu0 %vm37_vm0, %v173_v62  ;;  %v170_v4 = vadd.f32 %v633_v37, %v156_v63  ;;  %680 = vmatprep.subr.bf16.mxu1 %v697_v6 }
 0x146   :  { %v174_v39 = vpack.c.bf16 %v170_v4, %v169_v3 }
 0x147   :  { %681 = vmatpush3.bf16.msra.mxu1 %v697_v6 }
 0x148   :  { %673 = vmatmul.mubr.msk.bf16.gmra.mxu0 %vm37_vm0, %v174_v39  ;;  %682 = vmatprep.subr.bf16.mxu1 %v698_v7 }
 0x14b   :  { %683 = vmatpush3.bf16.msra.mxu1 %v698_v7 }
 0x200   :  { %v670_v11 = vpop.f32.mrf.mxu0 }
 0x201   :  { %v931_v14 = vadd.f32 %v670_v11, %v634_v10 }
 0x202   :  { %v244_v15 = vpop.f32.mrf.mxu0 }
 0x203   :  { %v934_v16 = vmul.f32 0.70710677, %v931_v14  ;;  %v936_v17 = vadd.f32 %v634_v10, %v244_v15 }
 0x204   :  { %v671_v18 = vpop.f32.mrf.mxu0 }
 0x205   :  { %v309_v19 = vand.u32 2147483647, %v934_v16  ;;  %v940_v22 = vmul.f32 0.70710677, %v936_v17  ;;  %v942_v23 = vadd.f32 %v671_v18, %v634_v10  ;;  %vm293_vm1 = vcmp.lt.f32.partialorder %v934_v16, 0.0 }
 0x206   :  { %v247_v24 = vpop.f32.mrf.mxu0 }
 0x207   :  { %v317_v25 = vmul.f32 0.3275911, %v309_v19  ;;  %v307_v26 = vand.u32 2147483647, %v940_v22  ;;  %v946_v27 = vmul.f32 0.70710677, %v942_v23  ;;  %v948_v30 = vadd.f32 %v634_v10, %v247_v24 }
 0x208   :  { %v674_v31 = vpop.f32.mrf.mxu0  ;;  %v421_v46 = vsub.f32 0.0, %v309_v19  ;;  %vm291_vm2 = vcmp.lt.f32.partialorder %v940_v22, 0.0 }
 0x209   :  { %v325_v32 = vadd.f32 1.0, %v317_v25  ;;  %v315_v33 = vmul.f32 0.3275911, %v307_v26  ;;  %v310_v34 = vand.u32 2147483647, %v946_v27  ;;  %v955_v43 = vadd.f32 %v674_v31, %v634_v10 }
 0x20a   :  { %v952_v35 = vmul.f32 0.70710677, %v948_v30  ;;  %v260_v36 = vpop.f32.mrf.mxu0  ;;  %v419_v54 = vsub.f32 0.0, %v307_v26  ;;  %v429_v21 = vmul.f32 %v421_v46, %v309_v19  ;;  %vm294_vm3 = vcmp.lt.f32.partialorder %v946_v27, 0.0 }
 0x20b   :  { %715 = vrcp.f32 %v325_v32  ;;  %v323_v37 = vadd.f32 1.0, %v315_v33  ;;  %v318_v40 = vmul.f32 0.3275911, %v310_v34  ;;  %v957_v45 = vadd.f32 %v634_v10, %v260_v36 }
 0x20c   :  { %v308_v41 = vand.u32 2147483647, %v952_v35  ;;  %v675_v20 = vpop.f32.mrf.mxu0  ;;  %v960_v47 = vmul.f32 0.70710677, %v955_v43  ;;  %v422_v55 = vsub.f32 0.0, %v310_v34  ;;  %v427_v60 = vmul.f32 %v419_v54, %v307_v26 }
 0x20d   :  { %717 = vrcp.f32 %v323_v37  ;;  %v326_v42 = vadd.f32 1.0, %v318_v40  ;;  %v963_v51 = vmul.f32 0.70710677, %v957_v45  ;;  %v966_v52 = vadd.f32 %v675_v20, %v634_v10 }
 0x20e   :  { %v316_v44 = vmul.f32 0.3275911, %v308_v41  ;;  %v313_v28 = vand.u32 2147483647, %v960_v47  ;;  %v263_v53 = vpop.f32.mrf.mxu0  ;;  %v439_v3 = vmul.f32 1.442695, %v429_v21  ;;  %v430_v4 = vmul.f32 %v422_v55, %v310_v34 }
 0x20f   :  { %719 = vrcp.f32 %v326_v42  ;;  %v311_v57 = vand.u32 2147483647, %v963_v51  ;;  %v970_v58 = vmul.f32 0.70710677, %v966_v52  ;;  %v972_v59 = vadd.f32 %v634_v10, %v263_v53 }
 0x210   :  { %v324_v50 = vadd.f32 1.0, %v316_v44  ;;  %v321_v56 = vmul.f32 0.3275911, %v313_v28  ;;  %v420_v49 = vsub.f32 0.0, %v308_v41  ;;  %v425_v7 = vsub.f32 0.0, %v313_v28 }
 0x211   :  { %v319_v38 = vmul.f32 0.3275911, %v311_v57  ;;  %v314_v61 = vand.u32 2147483647, %v970_v58  ;;  %v976_v62 = vmul.f32 0.70710677, %v972_v59 }
 0x212   :  { %721 = vrcp.f32 %v324_v50  ;;  %v329_v29 = vadd.f32 1.0, %v321_v56  ;;  %v435_v18 = vmul.f32 1.442695, %v427_v60  ;;  %v441_v24 = vmul.f32 1.442695, %v430_v4 }
 0x213   :  { %v327_v39 = vadd.f32 1.0, %v319_v38  ;;  %v322_v6 = vmul.f32 0.3275911, %v314_v61  ;;  %v312_v10 = vand.u32 2147483647, %v976_v62  ;;  %v428_v32 = vmul.f32 %v420_v49, %v308_v41 }
 0x214   :  { %723 = vrcp.f32 %v329_v29  ;;  %v433_v36 = vmul.f32 %v425_v7, %v313_v28  ;;  %v423_v37 = vsub.f32 0.0, %v311_v57  ;;  %v747_v42 = vmov 1.0  }
 0x215   :  { %725 = vrcp.f32 %v327_v39  ;;  %v330_v19 = vadd.f32 1.0, %v322_v6  ;;  %v320_v25 = vmul.f32 0.3275911, %v312_v10  ;;  %v991_v20 = vsel %vm293_vm1, -1.0, %v747_v42 }
 0x216   :  { %727 = vpow2.f32 %v439_v3  ;;  %v426_v50 = vsub.f32 0.0, %v314_v61  ;;  %v437_v54 = vmul.f32 1.442695, %v428_v32  ;;  %v447_v56 = vmul.f32 1.442695, %v433_v36 }
 0x217   :  { %729 = vrcp.f32 %v330_v19  ;;  %v328_v40 = vadd.f32 1.0, %v320_v25  ;;  %v431_v29 = vmul.f32 %v423_v37, %v311_v57  ;;  %v1001_v22 = vsel %vm291_vm2, -1.0, %v747_v42 }
 0x218   :  { %v978_v63 = vpop.eup %715  ;;  %731 = vpow2.f32 %v435_v18  ;;  %v434_v39 = vmul.f32 %v426_v50, %v314_v61  ;;  %vm292_vm4 = vcmp.lt.f32.partialorder %v952_v35, 0.0  ;;  %vm297_vm6 = vcmp.lt.f32.partialorder %v960_v47, 0.0 }
 0x219   :  { %v349_v48 = vmul.f32 1.0614054, %v978_v63  ;;  %733 = vrcp.f32 %v328_v40  ;;  %v443_v19 = vmul.f32 1.442695, %v431_v29  ;;  %vm295_vm7 = vcmp.lt.f32.partialorder %v963_v51, 0.0 }
 0x21a   :  { %v982_v11 = vpop.eup %717  ;;  %735 = vpow2.f32 %v441_v24  ;;  %vm298_vm8 = vcmp.lt.f32.partialorder %v970_v58, 0.0  ;;  %vm296_vm9 = vcmp.lt.f32.partialorder %v976_v62, 0.0  ;;  %v281_v62 = vmul.f32 0.5, %v955_v43 }
 0x21b   :  { %v357_v15 = vadd.f32 -1.4531521, %v349_v48  ;;  %v347_v33 = vmul.f32 1.0614054, %v982_v11  ;;  %v424_v48 = vsub.f32 0.0, %v312_v10  ;;  %737 = vpow2.f32 %v437_v54 }
 0x21c   :  { %v985_v26 = vpop.eup %719  ;;  %739 = vpow2.f32 %v447_v56  ;;  %v306_v58 = vsel %vm298_vm8, -1.0, %v747_v42  ;;  %v304_v47 = vsel %vm296_vm9, -1.0, %v747_v42 }
 0x21d   :  { %v365_v31 = vmul.f32 %v978_v63, %v357_v15  ;;  %v350_v34 = vmul.f32 1.0614054, %v985_v26  ;;  %v355_v44 = vadd.f32 -1.4531521, %v347_v33  ;;  %v432_v36 = vmul.f32 %v424_v48, %v312_v10 }
 0x21e   :  { %741 = vpow2.f32 %v443_v19 }
 0x21f   :  { %v373_v16 = vadd.f32 1.4214138, %v365_v31  ;;  %v993_v46 = vpop.eup %721  ;;  %v358_v41 = vadd.f32 -1.4531521, %v350_v34  ;;  %v363_v21 = vmul.f32 %v982_v11, %v355_v44  ;;  %v449_v34 = vmul.f32 1.442695, %v434_v39 }
 0x220   :  { %v348_v28 = vmul.f32 1.0614054, %v993_v46  ;;  %v445_v39 = vmul.f32 1.442695, %v432_v36 }
 0x221   :  { %v381_v53 = vmul.f32 %v978_v63, %v373_v16  ;;  %v366_v55 = vmul.f32 %v985_v26, %v358_v41  ;;  %v371_v3 = vadd.f32 1.4214138, %v363_v21  ;;  %v1003_v49 = vpop.eup %723  ;;  %743 = vpow2.f32 %v449_v34 }
 0x222   :  { %v356_v60 = vadd.f32 -1.4531521, %v348_v28  ;;  %v353_v18 = vmul.f32 1.0614054, %v1003_v49  ;;  %v1011_v31 = vpop.eup %725  ;;  %745 = vpow2.f32 %v445_v39 }
 0x223   :  { %v389_v38 = vadd.f32 -0.28449672, %v381_v53  ;;  %v374_v4 = vadd.f32 1.4214138, %v366_v55  ;;  %v379_v15 = vmul.f32 %v982_v11, %v371_v3  ;;  %v728_v37 = vpop.eup %727  ;;  %v351_v16 = vmul.f32 1.0614054, %v1011_v31 }
 0x224   :  { %v364_v7 = vmul.f32 %v993_v46, %v356_v60  ;;  %v361_v33 = vadd.f32 -1.4531521, %v353_v18  ;;  %v1017_v50 = vpop.eup %729  ;;  %v302_v53 = vsel %vm294_vm3, -1.0, %v747_v42 }
 0x225   :  { %v397_v6 = vmul.f32 %v978_v63, %v389_v38  ;;  %v382_v57 = vmul.f32 %v985_v26, %v374_v4  ;;  %v387_v25 = vadd.f32 -0.28449672, %v379_v15  ;;  %v354_v21 = vmul.f32 1.0614054, %v1017_v50  ;;  %v732_v56 = vpop.eup %731 }
 0x226   :  { %v372_v61 = vadd.f32 1.4214138, %v364_v7  ;;  %v369_v28 = vmul.f32 %v1003_v49, %v361_v33  ;;  %v1026_v3 = vpop.eup %733 }
 0x227   :  { %v405_v24 = vadd.f32 0.2548296, %v397_v6  ;;  %v390_v32 = vadd.f32 -0.28449672, %v382_v57  ;;  %v395_v41 = vmul.f32 %v982_v11, %v387_v25  ;;  %v362_v4 = vadd.f32 -1.4531521, %v354_v21  ;;  %v736_v18 = vpop.eup %735 }
 0x228   :  { %v380_v44 = vmul.f32 %v993_v46, %v372_v61  ;;  %v377_v38 = vadd.f32 1.4214138, %v369_v28  ;;  %v352_v15 = vmul.f32 1.0614054, %v1026_v3 }
 0x229   :  { %v413_v40 = vmul.f32 %v978_v63, %v405_v24  ;;  %v398_v54 = vmul.f32 %v985_v26, %v390_v32  ;;  %v359_v63 = vadd.f32 -1.4531521, %v351_v16  ;;  %v403_v60 = vadd.f32 0.2548296, %v395_v41  ;;  %v738_v16 = vpop.eup %737 }
 0x22a   :  { %v388_v55 = vadd.f32 -0.28449672, %v380_v44  ;;  %v385_v7 = vmul.f32 %v1003_v49, %v377_v38  ;;  %v370_v61 = vmul.f32 %v1017_v50, %v362_v4  ;;  %v360_v34 = vadd.f32 -1.4531521, %v352_v15 }
 0x22b   :  { %v453_v10 = vmul.f32 %v728_v37, %v413_v40  ;;  %v406_v29 = vadd.f32 0.2548296, %v398_v54  ;;  %v367_v27 = vmul.f32 %v1011_v31, %v359_v63  ;;  %v411_v57 = vmul.f32 %v982_v11, %v403_v60 }
 0x22c   :  { %v396_v48 = vmul.f32 %v993_v46, %v388_v55  ;;  %v393_v33 = vadd.f32 -0.28449672, %v385_v7  ;;  %v378_v40 = vadd.f32 1.4214138, %v370_v61  ;;  %v368_v41 = vmul.f32 %v1026_v3, %v360_v34  ;;  %v740_v55 = vpop.eup %739 }
 0x22d   :  { %v414_v6 = vmul.f32 %v985_v26, %v406_v29  ;;  %v461_v19 = vsub.f32 1.0, %v453_v10  ;;  %v375_v24 = vadd.f32 1.4214138, %v367_v27  ;;  %v451_v36 = vmul.f32 %v732_v56, %v411_v57  ;;  %v742_v7 = vpop.eup %741 }
 0x22e   :  { %v404_v25 = vadd.f32 0.2548296, %v396_v48  ;;  %v401_v11 = vmul.f32 %v1003_v49, %v393_v33  ;;  %v386_v63 = vmul.f32 %v1017_v50, %v378_v40  ;;  %v376_v38 = vadd.f32 1.4214138, %v368_v41 }
 0x22f   :  { %v454_v32 = vmul.f32 %v736_v18, %v414_v6  ;;  %v383_v37 = vmul.f32 %v1011_v31, %v375_v24  ;;  %v459_v54 = vsub.f32 1.0, %v451_v36  ;;  %v469_v28 = vmul.f32 %v461_v19, %v991_v20 }
 0x230   :  { %v412_v26 = vmul.f32 %v993_v46, %v404_v25  ;;  %v409_v29 = vadd.f32 0.2548296, %v401_v11  ;;  %v275_v46 = vmul.f32 0.5, %v936_v17  ;;  %v394_v4 = vadd.f32 -0.28449672, %v386_v63  ;;  %v744_v25 = vpop.eup %743 }
 0x231   :  { %v462_v44 = vsub.f32 1.0, %v454_v32  ;;  %v391_v10 = vadd.f32 -0.28449672, %v383_v37  ;;  %v467_v60 = vmul.f32 %v459_v54, %v1001_v22  ;;  %v300_v20 = vsel %vm292_vm4, -1.0, %v747_v42  ;;  %v746_v54 = vpop.eup %745 }
 0x232   :  { %v452_v21 = vmul.f32 %v738_v16, %v412_v26  ;;  %v417_v6 = vmul.f32 %v1003_v49, %v409_v29  ;;  %v402_v22 = vmul.f32 %v1017_v50, %v394_v4  ;;  %v477_v17 = vadd.f32 1.0, %v469_v28 }
 0x233   :  { %v470_v56 = vmul.f32 %v462_v44, %v302_v53  ;;  %v399_v27 = vmul.f32 %v1011_v31, %v391_v10  ;;  %v384_v53 = vmul.f32 %v1026_v3, %v376_v38  ;;  %v475_v18 = vadd.f32 1.0, %v467_v60 }
 0x234   :  { %v460_v39 = vsub.f32 1.0, %v452_v21  ;;  %v278_v19 = vmul.f32 0.5, %v942_v23  ;;  %v276_v24 = vmul.f32 0.5, %v948_v30  ;;  %v457_v32 = vmul.f32 %v740_v55, %v417_v6 }
 0x235   :  { %v478_v48 = vadd.f32 1.0, %v470_v56  ;;  %v407_v15 = vadd.f32 0.2548296, %v399_v27  ;;  %v392_v61 = vadd.f32 -0.28449672, %v384_v53  ;;  %v277_v34 = vmul.f32 0.5, %v931_v14 }
 0x236   :  { %v468_v57 = vmul.f32 %v460_v39, %v300_v20  ;;  %v410_v33 = vadd.f32 0.2548296, %v402_v22  ;;  %v483_v23 = vmul.f32 %v475_v18, %v275_v46  ;;  %v465_v44 = vsub.f32 1.0, %v457_v32 }
 0x237   :  { %v415_v35 = vmul.f32 %v1011_v31, %v407_v15  ;;  %v486_v36 = vmul.f32 %v478_v48, %v278_v19  ;;  %v400_v37 = vmul.f32 %v1026_v3, %v392_v61  ;;  %v485_v30 = vmul.f32 %v477_v17, %v277_v34 }
 0x238   :  { %v476_v49 = vadd.f32 1.0, %v468_v57  ;;  %v418_v26 = vmul.f32 %v1017_v50, %v410_v33  ;;  %v305_v50 = vsel %vm297_vm6, -1.0, %v747_v42  ;;  %v303_v63 = vsel %vm295_vm7, -1.0, %v747_v42 }
 0x239   :  { %v455_v40 = vmul.f32 %v742_v7, %v415_v35  ;;  %v408_v31 = vadd.f32 0.2548296, %v400_v37  ;;  %v492_v28 = vpack.c.bf16 %v486_v36, %v485_v30  ;;  %v473_v56 = vmul.f32 %v465_v44, %v305_v50 }
 0x23a   :  { %v484_v16 = vmul.f32 %v476_v49, %v276_v24  ;;  %v458_v41 = vmul.f32 %v744_v25, %v418_v26  ;;  %v282_v4 = vmul.f32 0.5, %v966_v52  ;;  %v279_v39 = vmul.f32 0.5, %v957_v45  ;;  %v641_v52 = vld [vmem:[%s1124_s6] ss:$0 sm:$0xff] }
 0x23b   :  { %v463_v11 = vsub.f32 1.0, %v455_v40  ;;  %v416_v10 = vmul.f32 %v1026_v3, %v408_v31  ;;  %v481_v27 = vadd.f32 1.0, %v473_v56  ;;  %v280_v48 = vmul.f32 0.5, %v972_v59 }
 0x23c   :  { %v491_v14 = vpack.c.bf16 %v484_v16, %v483_v23  ;;  %v466_v21 = vsub.f32 1.0, %v458_v41 }
 0x23d   :  { %v471_v51 = vmul.f32 %v463_v11, %v303_v63  ;;  %v456_v55 = vmul.f32 %v746_v54, %v416_v10  ;;  %v489_v15 = vmul.f32 %v481_v27, %v281_v62 }
 0x23e   :  { %684 = vmatprep.mubr.msk.bf16.mxu1 %vm534_vm5, %v491_v14  ;;  %v474_v29 = vmul.f32 %v466_v21, %v306_v58 }
 0x23f   :  { %685 = vmatmul.mubr.msk.bf16.vlgmr.msra.gmra.mxu1 %vm534_vm5, %v492_v28  ;;  %v464_v3 = vsub.f32 1.0, %v456_v55  ;;  %v479_v60 = vadd.f32 1.0, %v471_v51 }
 0x240   :  { %v482_v38 = vadd.f32 1.0, %v474_v29 }
 0x241   :  { %v472_v46 = vmul.f32 %v464_v3, %v304_v47  ;;  %v487_v53 = vmul.f32 %v479_v60, %v279_v39 }
 0x242   :  { %v490_v6 = vmul.f32 %v482_v38, %v282_v4 }
 0x243   :  { %v480_v20 = vadd.f32 1.0, %v472_v46 }
 0x244   :  { %v494_v57 = vpack.c.bf16 %v490_v6, %v489_v15 }
 0x245   :  { %v488_v7 = vmul.f32 %v480_v20, %v280_v48 }
 0x247   :  { %v493_v22 = vpack.c.bf16 %v488_v7, %v487_v53 }
 0x249   :  { %688 = vmatprep.mubr.msk.bf16.mxu1 %vm534_vm5, %v493_v22 }
 0x24a   :  { %689 = vmatmul.mubr.msk.bf16.gmra.mxu1 %vm534_vm5, %v494_v57 }
 0x2ff   :  { %v686_v45 = vpop.f32.mrf.mxu1 }
 0x300   :  { %v590_v42 = vadd.f32 %v686_v45, %v641_v52 }
 0x301   :  { %v581_v59 = vpop.f32.mrf.mxu1 }
 0x302   :  { %v614_v18 = vadd.f32 %v590_v42, %v796_v1  ;;  %v582_v43 = vadd.f32 %v641_v52, %v581_v59 }
 0x303   :  { %v687_v17 = vpop.f32.mrf.mxu1 }
 0x304   :  { %622 = vst.msk [vmem:[%s1125_s7 + $0x10] sm:$0xff] %vm37_vm0, %v614_v18  ;;  %v612_v19 = vadd.f32 %v582_v43, %v791_v0  ;;  %v593_v24 = vadd.f32 %v687_v17, %v641_v52 }
 0x305   :  { %v584_v61 = vpop.f32.mrf.mxu1 }
 0x306   :  { %620 = vst.msk [vmem:[%s1125_s7] sm:$0xff] %vm37_vm0, %v612_v19  ;;  %v615_v25 = vadd.f32 %v593_v24, %v810_v5  ;;  %v585_v32 = vadd.f32 %v641_v52, %v584_v61 }
 0x308   :  { %623 = vst.msk [vmem:[%s1125_s7 + $0x18] sm:$0xff] %vm37_vm0, %v615_v25  ;;  %v613_v1 = vadd.f32 %v585_v32, %v801_v2 }
 0x30a   :  { %621 = vst.msk [vmem:[%s1125_s7 + $0x8] sm:$0xff] %vm37_vm0, %v613_v1  ;;  %v690_v0 = vpop.f32.mrf.mxu1 }
 0x30b   :  { %v606_v35 = vadd.f32 %v690_v0, %v641_v52 }
 0x30c   :  { %v597_v33 = vpop.f32.mrf.mxu1 }
 0x30d   :  { %v618_v49 = vadd.f32 %v606_v35, %v833_v12  ;;  %v598_v34 = vadd.f32 %v641_v52, %v597_v33 }
 0x30e   :  { %v691_v5 = vpop.f32.mrf.mxu1 }
 0x30f   :  { %626 = vst.msk [vmem:[%s1125_s7 + $0x30] sm:$0xff] %vm37_vm0, %v618_v49  ;;  %v616_v36 = vadd.f32 %v598_v34, %v819_v8  ;;  %v609_v2 = vadd.f32 %v691_v5, %v641_v52 }
 0x310   :  { %v600_v37 = vpop.f32.mrf.mxu1 }
 0x311   :  { %624 = vst.msk [vmem:[%s1125_s7 + $0x20] sm:$0xff] %vm37_vm0, %v616_v36  ;;  %v619_v40 = vadd.f32 %v609_v2, %v838_v13  ;;  %v601_v26 = vadd.f32 %v641_v52, %v600_v37 }
 0x313   :  { %627 = vst.msk [vmem:[%s1125_s7 + $0x38] sm:$0xff] %vm37_vm0, %v619_v40  ;;  %v617_v12 = vadd.f32 %v601_v26, %v824_v9 }
 0x315   :  { %625 = vst.msk [vmem:[%s1125_s7 + $0x28] sm:$0xff] %vm37_vm0, %v617_v12 }

// kernel: _lambda_.37
= control target key start
LH: loop header
LB: loop body
LE: loop exit
PB: predicated region body
PF: predicated region fallthrough
CT: control target
= control target key end

     0   :  { %14 = vsyncpa [#allocation3], 0  ;;  %vm41_vm0 = vcmask 261120   ;;  %s641_s0 = inlined_call_operand.vmem [shape: f32[2,32,32], index: 0, kind: input, shape index: {}]   ;;  %s642_s1 = inlined_call_operand.vmem [shape: f32[1,1,32], index: 1, kind: input, shape index: {}]   ;;  %s643_s2 = inlined_call_operand.vmem [shape: f32[1,1,32], index: 2, kind: input, shape index: {}]   ;;  %s644_s3 = inlined_call_operand.vmem [shape: bf16[32,4], index: 3, kind: input, shape index: {}]   ;;  %s645_s4 = inlined_call_operand.vmem [shape: f32[1,4], index: 4, kind: input, shape index: {}]   ;;  %s646_s5 = inlined_call_operand.vmem [shape: bf16[32,4], index: 5, kind: input, shape index: {}]   ;;  %s647_s6 = inlined_call_operand.vmem [shape: f32[1,4], index: 6, kind: input, shape index: {}]   ;;  %s648_s7 = inlined_call_operand.hbm [shape: f32[2,4], index: 7, kind: output, shape index: {0}]   ;;  %s649_s8 = inlined_call_operand.hbm [shape: f32[2,4], index: 8, kind: output, shape index: {1}]  }
   0x1   :  { %v31_v0 = vld [vmem:[%s641_s0] sm:$0xff]  ;;  %v32_v2 = vld [vmem:[%s641_s0 + $0x8] sm:$0xff]  ;;  %v33_v7 = vld [vmem:[%s641_s0 + $0x10] sm:$0xff] }
   0x2   :  { %v35_v1 = vld [vmem:[%s641_s0 + $0x20] sm:$0xff]  ;;  %v42_v3 = vsel %vm41_vm0, %v31_v0, 0.0  ;;  %v36_v5 = vld [vmem:[%s641_s0 + $0x28] sm:$0xff]  ;;  %v45_v6 = vsel %vm41_vm0, %v32_v2, 0.0  ;;  %v37_v9 = vld [vmem:[%s641_s0 + $0x30] sm:$0xff] }
   0x3   :  { %v54_v4 = vsel %vm41_vm0, %v35_v1, 0.0  ;;  %43 = vadd.xlane.f32.xlu0 %v42_v3  ;;  %v57_v8 = vsel %vm41_vm0, %v36_v5, 0.0 }
   0x4   :  { %55 = vadd.xlane.f32.xlu1 %v54_v4 }
   0x7   :  { %46 = vadd.xlane.f32.xlu0 %v45_v6 }
   0x8   :  { %58 = vadd.xlane.f32.xlu1 %v57_v8 }
   0x9   :  { %15 = vsyncpa [#allocation5], 0  ;;  %v48_v10 = vsel %vm41_vm0, %v33_v7, 0.0  ;;  %v60_v11 = vsel %vm41_vm0, %v37_v9, 0.0  ;;  %v34_v12 = vld [vmem:[%s641_s0 + $0x18] sm:$0xff]  ;;  %v408_v56 = vld [vmem:[%s644_s3 + $0x8] sm:$0xff]  }
   0xa   :  { %v38_v13 = vld [vmem:[%s641_s0 + $0x38] sm:$0xff]  ;;  %v51_v14 = vsel %vm41_vm0, %v34_v12, 0.0  ;;  %v409_v57 = vld [vmem:[%s646_s5 + $0x8] sm:$0xff]   ;;  %v472_v58 = vmov 0.0   ;;  %v410_v59 = vld [vmem:[%s644_s3] sm:$0xff]   ;;  %vm473_vm1 = vmmov 0  }
   0xb   :  { %49 = vadd.xlane.f32.xlu0 %v48_v10  ;;  %v63_v15 = vsel %vm41_vm0, %v38_v13, 0.0  ;;  %388 = vmatprep.subr.bf16.mxu0 %v472_v58  ;;  %v411_v60 = vld [vmem:[%s646_s5] sm:$0xff]   ;;  %vm220_vm2 = vcmask 1041409   ;;  %s474_s10 = smov [#allocation2]   ;;  %s475_s12 = smov [#allocation4]   ;;  %vm278_vm3 = vcmask 25600  }
   0xc   :  { %61 = vadd.xlane.f32.xlu1 %v60_v11  ;;  %396 = vmatprep.subr.bf16.mxu1 %v472_v58  ;;  %s350_s11 = sshll.u32 %s474_s10, 4  ;;  %s360_s13 = sshll.u32 %s475_s12, 4  ;;  %s351_s11 = int_to_ptr.vmem [resolvable:$true] %s350_s11  ;;  %s361_s13 = int_to_ptr.vmem [resolvable:$true] %s360_s13 }
   0xd   :  { %389 = vmatpush3.bf16.msra.mxu0 %v408_v56  ;;  %397 = vmatpush3.bf16.msra.mxu1 %v409_v57  ;;  %p433_p1 = scmp.lt.s32.totalorder %s351_s11, %s351_s11 }
   0xe   :  { %390 = vmatprep.subr.bf16.mxu0 %v472_v58  ;;  %398 = vmatprep.subr.bf16.mxu1 %v472_v58 }
   0xf   :  { %52 = vadd.xlane.f32.xlu0 %v51_v14  ;;  %392 = vmatprep.mubr.msk.bf16.mxu0 %vm473_vm1, %v472_v58 }
  0x10   :  { %64 = vadd.xlane.f32.xlu1 %v63_v15  ;;  %400 = vmatprep.mubr.msk.bf16.mxu1 %vm473_vm1, %v472_v58 }
  0x11   :  { %391 = vmatpush3.bf16.msra.mxu0 %v410_v59  ;;  %399 = vmatpush3.bf16.msra.mxu1 %v411_v60 }
  0x8c   :  { %v44_v16 = vpop.xlane.xlu0 %43 }
  0x8d   :  { %v56_v17 = vpop.xlane.xlu1 %55  ;;  %v67_v18 = vmul.f32 0.03125, %v44_v16 }
  0x8e   :  { %v71_v19 = vmul.f32 0.03125, %v56_v17 }
  0x8f   :  { %v553_v20 = vsub.f32 %v31_v0, %v67_v18 }
  0x90   :  { %v555_v21 = vsub.f32 %v35_v1, %v71_v19  ;;  %v47_v22 = vpop.xlane.xlu0 %46 }
  0x91   :  { %v59_v23 = vpop.xlane.xlu1 %58  ;;  %v68_v24 = vmul.f32 0.03125, %v47_v22  ;;  %v83_v26 = vmul.f32 %v553_v20, %v553_v20 }
  0x92   :  { %v72_v25 = vmul.f32 0.03125, %v59_v23  ;;  %v87_v27 = vmul.f32 %v555_v21, %v555_v21 }
  0x93   :  { %v561_v28 = vsub.f32 %v32_v2, %v68_v24  ;;  %v91_v30 = vsel %vm41_vm0, %v83_v26, 0.0 }
  0x94   :  { %v563_v29 = vsub.f32 %v36_v5, %v72_v25  ;;  %92 = vadd.xlane.f32.xlu0 %v91_v30  ;;  %v50_v31 = vpop.xlane.xlu0 %49  ;;  %v103_v33 = vsel %vm41_vm0, %v87_v27, 0.0  ;;  %v372_v27 = vld [vmem:[%s642_s1] ss:$0 sm:$0xff] }
  0x95   :  { %v62_v32 = vpop.xlane.xlu1 %61  ;;  %v69_v34 = vmul.f32 0.03125, %v50_v31  ;;  %v84_v36 = vmul.f32 %v561_v28, %v561_v28 }
  0x96   :  { %v73_v35 = vmul.f32 0.03125, %v62_v32  ;;  %v88_v37 = vmul.f32 %v563_v29, %v563_v29 }
  0x97   :  { %v571_v38 = vsub.f32 %v33_v7, %v69_v34  ;;  %v94_v40 = vsel %vm41_vm0, %v84_v36, 0.0  ;;  %v373_v36 = vld [vmem:[%s643_s2] ss:$0 sm:$0xff] }
  0x98   :  { %v573_v39 = vsub.f32 %v37_v9, %v73_v35  ;;  %104 = vadd.xlane.f32.xlu0 %v103_v33  ;;  %95 = vadd.xlane.f32.xlu1 %v94_v40  ;;  %v53_v41 = vpop.xlane.xlu0 %52  ;;  %v106_v43 = vsel %vm41_vm0, %v88_v37, 0.0 }
  0x99   :  { %v65_v42 = vpop.xlane.xlu1 %64  ;;  %v70_v44 = vmul.f32 0.03125, %v53_v41  ;;  %v85_v46 = vmul.f32 %v571_v38, %v571_v38 }
  0x9a   :  { %v74_v45 = vmul.f32 0.03125, %v65_v42  ;;  %v89_v47 = vmul.f32 %v573_v39, %v573_v39 }
  0x9b   :  { %v581_v48 = vsub.f32 %v34_v12, %v70_v44  ;;  %v97_v50 = vsel %vm41_vm0, %v85_v46, 0.0 }
  0x9c   :  { %v583_v49 = vsub.f32 %v38_v13, %v74_v45  ;;  %107 = vadd.xlane.f32.xlu1 %v106_v43  ;;  %98 = vadd.xlane.f32.xlu0 %v97_v50  ;;  %v109_v51 = vsel %vm41_vm0, %v89_v47, 0.0 }
  0x9d   :  { %v86_v52 = vmul.f32 %v581_v48, %v581_v48 }
  0x9e   :  { %v90_v53 = vmul.f32 %v583_v49, %v583_v49 }
  0x9f   :  { %v100_v54 = vsel %vm41_vm0, %v86_v52, 0.0 }
  0xa0   :  { %110 = vadd.xlane.f32.xlu1 %v109_v51  ;;  %101 = vadd.xlane.f32.xlu0 %v100_v54  ;;  %v112_v55 = vsel %vm41_vm0, %v90_v53, 0.0 }
  0xa4   :  { %113 = vadd.xlane.f32.xlu1 %v112_v55 }
 0x11d   :  { %v93_v61 = vpop.xlane.xlu0 %92 }
 0x11e   :  { %v115_v62 = vmul.f32 0.03125, %v93_v61 }
 0x120   :  { %v123_v63 = vadd.f32 1e-05, %v115_v62 }
 0x121   :  { %v96_v0 = vpop.xlane.xlu1 %95  ;;  %v105_v1 = vpop.xlane.xlu0 %104 }
 0x122   :  { %v116_v2 = vmul.f32 0.03125, %v96_v0  ;;  %v119_v3 = vmul.f32 0.03125, %v105_v1  ;;  %412 = vrsqrt.f32 %v123_v63 }
 0x124   :  { %v124_v4 = vadd.f32 1e-05, %v116_v2  ;;  %v127_v5 = vadd.f32 1e-05, %v119_v3 }
 0x125   :  { %v108_v6 = vpop.xlane.xlu1 %107  ;;  %v99_v7 = vpop.xlane.xlu0 %98 }
 0x126   :  { %414 = vrsqrt.f32 %v124_v4  ;;  %v120_v8 = vmul.f32 0.03125, %v108_v6  ;;  %v117_v9 = vmul.f32 0.03125, %v99_v7 }
 0x127   :  { %416 = vrsqrt.f32 %v127_v5 }
 0x128   :  { %v128_v10 = vadd.f32 1e-05, %v120_v8  ;;  %v125_v11 = vadd.f32 1e-05, %v117_v9 }
 0x129   :  { %v111_v12 = vpop.xlane.xlu1 %110  ;;  %v102_v13 = vpop.xlane.xlu0 %101 }
 0x12a   :  { %418 = vrsqrt.f32 %v128_v10  ;;  %v121_v14 = vmul.f32 0.03125, %v111_v12  ;;  %v118_v15 = vmul.f32 0.03125, %v102_v13 }
 0x12b   :  { %420 = vrsqrt.f32 %v125_v11 }
 0x12c   :  { %v129_v16 = vadd.f32 1e-05, %v121_v14  ;;  %v126_v17 = vadd.f32 1e-05, %v118_v15 }
 0x12d   :  { %v114_v18 = vpop.xlane.xlu1 %113 }
 0x12e   :  { %422 = vrsqrt.f32 %v129_v16  ;;  %v122_v19 = vmul.f32 0.03125, %v114_v18 }
 0x12f   :  { %424 = vrsqrt.f32 %v126_v17  ;;  %v413_v22 = vpop.eup %412 }
 0x130   :  { %v130_v23 = vadd.f32 1e-05, %v122_v19  ;;  %v139_v25 = vmul.f32 %v413_v22, %v553_v20 }
 0x132   :  { %426 = vrsqrt.f32 %v130_v23  ;;  %v153_v34 = vmul.f32 %v372_v27, %v139_v25 }
 0x133   :  { %v415_v24 = vpop.eup %414 }
 0x134   :  { %v417_v26 = vpop.eup %416  ;;  %v140_v30 = vmul.f32 %v415_v24, %v561_v28  ;;  %v167_v44 = vadd.f32 %v373_v36, %v153_v34 }
 0x135   :  { %v143_v32 = vmul.f32 %v417_v26, %v555_v21 }
 0x136   :  { %v154_v31 = vmul.f32 %v372_v27, %v140_v30  ;;  %v175_v54 = vsel %vm41_vm0, %v167_v44, 0.0  ;;  %v378_v30 = vld [vmem:[%s647_s6] ss:$0 sm:$0xff] }
 0x137   :  { %v419_v33 = vpop.eup %418  ;;  %v157_v41 = vmul.f32 %v372_v27, %v143_v32 }
 0x138   :  { %v421_v35 = vpop.eup %420  ;;  %v144_v37 = vmul.f32 %v419_v33, %v563_v29  ;;  %v168_v20 = vadd.f32 %v373_v36, %v154_v31 }
 0x139   :  { %v141_v40 = vmul.f32 %v421_v35, %v571_v38  ;;  %v171_v52 = vadd.f32 %v373_v36, %v157_v41 }
 0x13a   :  { %v158_v42 = vmul.f32 %v372_v27, %v144_v37  ;;  %v176_v47 = vsel %vm41_vm0, %v168_v20, 0.0 }
 0x13b   :  { %v423_v43 = vpop.eup %422  ;;  %v155_v28 = vmul.f32 %v372_v27, %v141_v40  ;;  %v177_v56 = vadd.f32 %v176_v47, %v175_v54  ;;  %v188_v60 = vsel %vm41_vm0, %v171_v52, 0.0 }
 0x13c   :  { %v425_v45 = vpop.eup %424  ;;  %v172_v46 = vadd.f32 %v373_v36, %v158_v42  ;;  %v145_v21 = vmul.f32 %v423_v43, %v573_v39 }
 0x13d   :  { %v169_v50 = vadd.f32 %v373_v36, %v155_v28  ;;  %v142_v51 = vmul.f32 %v425_v45, %v581_v48 }
 0x13e   :  { %v159_v53 = vmul.f32 %v372_v27, %v145_v21  ;;  %v189_v57 = vsel %vm41_vm0, %v172_v46, 0.0 }
 0x13f   :  { %v427_v29 = vpop.eup %426  ;;  %v178_v38 = vsel %vm41_vm0, %v169_v50, 0.0  ;;  %v156_v55 = vmul.f32 %v372_v27, %v142_v51  ;;  %v190_v63 = vadd.f32 %v189_v57, %v188_v60 }
 0x140   :  { %v173_v58 = vadd.f32 %v373_v36, %v159_v53  ;;  %v146_v59 = vmul.f32 %v427_v29, %v583_v49  ;;  %v179_v62 = vadd.f32 %v178_v38, %v177_v56 }
 0x141   :  { %v170_v39 = vadd.f32 %v373_v36, %v156_v55 }
 0x142   :  { %v191_v61 = vsel %vm41_vm0, %v173_v58, 0.0  ;;  %v160_v48 = vmul.f32 %v372_v27, %v146_v59  ;;  %v374_v27 = vld [vmem:[%s645_s4] ss:$0 sm:$0xff]  ;;  %s428_s4 = scalar_lea.vmem %s351_s11, 32 }
 0x143   :  { %v180_v0 = vsel %vm41_vm0, %v170_v39, 0.0  ;;  %v192_v3 = vadd.f32 %v191_v61, %v190_v63  ;;  %p429_p0 = scmp.ne.s32.totalorder %s351_s11, %s428_s4  ;;  %p434_p2 = scmp.lt.s32.totalorder %s428_s4, %s428_s4 }
 0x144   :  { %v174_v1 = vadd.f32 %v373_v36, %v160_v48  ;;  %v181_v2 = vadd.f32 %v180_v0, %v179_v62 }
 0x145   :  { %p435_p3 = por %p434_p2, %p433_p1 }
 0x146   :  { %v182_v4 = vrot.slane %v181_v2, 4  ;;  %v193_v5 = vsel %vm41_vm0, %v174_v1, 0.0 }
 0x147   :  { %v194_v6 = vadd.f32 %v193_v5, %v192_v3  ;;  %p436_p4 = pnand %p435_p3, %p429_p0 }
 0x148   :  { %v183_v7 = vadd.f32 %v182_v4, %v181_v2 }
 0x149   :  { %v195_v8 = vrot.slane %v194_v6, 4 }
 0x14a   :  { %v184_v49 = vrot.slane %v183_v7, 2 }
 0x14b   :  { %v196_v9 = vadd.f32 %v195_v8, %v194_v6 }
 0x14c   :  { %v185_v10 = vadd.f32 %v184_v49, %v183_v7 }
 0x14d   :  { %v197_v11 = vrot.slane %v196_v9, 2 }
 0x14e   :  { %v186_v12 = vrot.slane %v185_v10, 1 }
 0x14f   :  { %v198_v13 = vadd.f32 %v197_v11, %v196_v9 }
 0x150   :  { %v187_v14 = vadd.f32 %v186_v12, %v185_v10 }
 0x151   :  { %v199_v15 = vrot.slane %v198_v13, 1 }
 0x152   :  { %v201_v16 = vmul.f32 0.03125, %v187_v14 }
 0x153   :  { %v200_v17 = vadd.f32 %v199_v15, %v198_v13 }
 0x154   :  { %v203_v19 = vpack.c.bf16 %v201_v16, %v201_v16 }
 0x155   :  { %v202_v18 = vmul.f32 0.03125, %v200_v17 }
 0x156   :  { %v218_v23 = vunpack.c.l.b16 %v203_v19 }
 0x157   :  { %v204_v22 = vpack.c.bf16 %v202_v18, %v202_v18 }
 0x159   :  { %v219_v24 = vunpack.c.l.b16 %v204_v22 }
 0x15b   :  { %v221_v25 = vsel %vm220_vm2, %v219_v24, %v218_v23 }
 0x15c   :  { %v222_v26 = vpack.c.b16 %v221_v25, %v221_v25 }
 0x15e   :  { %393 = vmatmul.mubr.msk.bf16.vlgmr.msra.gmra.mxu0 %vm41_vm0, %v222_v26  ;;  %401 = vmatmul.mubr.msk.bf16.vlgmr.msra.gmra.mxu1 %vm41_vm0, %v222_v26 }
 0x21e   :  { %v272_v31 = vpop.f32.mrf.mxu0  ;;  %v337_v32 = vpop.f32.mrf.mxu1 }
 0x21f   :  { %v273_v33 = vadd.f32 %v374_v27, %v272_v31  ;;  %v338_v34 = vadd.f32 %v378_v30, %v337_v32 }
 0x220   :  { %v394_v35 = vpop.f32.mrf.mxu0  ;;  %v402_v36 = vpop.f32.mrf.mxu1 }
 0x221   :  { %279 = vst.msk [vmem:[#allocation2] sm:$0x3] %vm278_vm3, %v273_v33  ;;  %343 = vst.msk [vmem:[#allocation4] sm:$0x3] %vm278_vm3, %v338_v34 }
 0x222   :  { %v275_v37 = vpop.f32.mrf.mxu0  ;;  %v340_v20 = vpop.f32.mrf.mxu1 }
 0x223   :  { %439 = shalt.err (!%p436_p4)
}
 0x224   :  { %353 = dma.vmem_to_hbm [thread:$0]  %s351_s11, 32, %s648_s7, [#allocation3]  }
 0x225   :  { %s448_s15 = scalar_lea.vmem %s361_s13, 32  ;;  %p453_p6 = scmp.lt.s32.totalorder %s361_s13, %s361_s13 }
 0x226   :  { %p449_p5 = scmp.ne.s32.totalorder %s361_s13, %s448_s15  ;;  %p454_p7 = scmp.lt.s32.totalorder %s448_s15, %s448_s15 }
 0x228   :  { %p455_p8 = por %p454_p7, %p453_p6 }
 0x22a   :  { %p456_p9 = pnand %p455_p8, %p449_p5 }
 0x22c   :  { %459 = shalt.err (!%p456_p9)
}
 0x22d   :  { %363 = dma.vmem_to_hbm [thread:$0]  %s361_s13, 32, %s649_s8, [#allocation5]   ;;  %v395_v40 = vpop.f32.mrf.mxu0  ;;  %v403_v41 = vpop.f32.mrf.mxu1 }
 0x22e   :  { %468 = dma.done.wait [#allocation3], 32  }
 0x22f   :  { %469 = vsyncadd [#allocation3], 4294967264 }
 0x230   :  { %470 = dma.done.wait [#allocation5], 32  }
 0x231   :  { %471 = vsyncadd [#allocation5], 4294967264 }
 0x232   :  { %370 = vsyncpa [#allocation3], 1 }
 0x233   :  { %371 = vsyncpa [#allocation5], 1 }

</bundles_post_ra>
